<compile_context>
chip_gen: v6e
topology: v6e:2x2x1
jax: 0.10.0
libtpu: 0.0.40
codegen_flags: <defaults>
</compile_context>

<pallas_src>
import math

import jax
import jax.numpy as jnp
from jax.experimental import pallas as pl
from jax.experimental.pallas import tpu as pltpu

NEG_FILL = float(-(2 ** 32) + 1)


def _round_up(x, m):
    return ((x + m - 1) // m) * m


def din_attn_kernel(q_ref, k_ref, bias_ref,
                    w1q_ref, w1kp_ref, b1_ref,
                    w2_ref, b2_ref, w3_ref,
                    o_ref):
    # Block shapes seen by the kernel (one batch-block per grid step):
    #   q_ref : (TB, H) f32     k_ref : (TB, T, H) f32    bias_ref : (TB, T) f32
    #   w1q   : (H, D1p) f32    w1kp  : (2H, D1p) bf16    b1 : (1, D1p) f32
    #   w2    : (D1p, D2) bf16  b2    : (1, D2) f32       w3 : (1, D2) f32
    #   o_ref : (TB, H) f32
    TB, T, H = k_ref.shape
    D1p = w1q_ref.shape[-1]
    D2 = w2_ref.shape[-1]

    q = q_ref[...]                                        # (TB, H)
    k3 = k_ref[...]                                       # (TB, T, H)

    # Fused layer-1 LHS: per (b, t) row -> [k, q*k]; bf16 rows feed the MXU
    # natively (the q and q-k terms were folded into the weights wrapper-side).
    kf = k3.reshape(TB * T, H)
    qkf = (q[:, None, :] * k3).reshape(TB * T, H)
    kqk = jnp.concatenate([kf, qkf], axis=-1).astype(jnp.bfloat16)   # (TB*T, 2H)

    # q-path term (tiny: TB rows, 1/T of the work) in f32, b1 folded in.
    hq = jnp.dot(q, w1q_ref[...], preferred_element_type=jnp.float32) + b1_ref[...]

    # Layer 1: a single bf16 MXU matmul with contraction depth 2H; the q term
    # is added with a sublane-broadcast add (no materialized (TB*T, D1) copy).
    pre1 = jnp.dot(kqk, w1kp_ref[...], preferred_element_type=jnp.float32)
    h1 = jax.nn.sigmoid(pre1.reshape(TB, T, D1p) + hq[:, None, :])   # (TB, T, D1p)

    # Layer 2 (bf16 MXU matmul, K = D1p, lane-dense).
    h1_bf = h1.reshape(TB * T, D1p).astype(jnp.bfloat16)
    h2 = jax.nn.sigmoid(
        jnp.dot(h1_bf, w2_ref[...], preferred_element_type=jnp.float32)
        + b2_ref[...])                                               # (TB*T, D2)

    # Linear(D2 -> 1) as a lane reduction; logits land lane-major: (TB, T).
    logits = jnp.sum(h2.reshape(TB, T, D2) * w3_ref[...], axis=-1)

    # Additive mask bias (b3 on valid slots, -2**32+1 on masked slots), then
    # the 1/sqrt(T) scaling from the reference module.
    inv_sqrt_t = jnp.float32(1.0 / math.sqrt(T))
    logits = (logits + bias_ref[...]) * inv_sqrt_t

    # Softmax over T (lane axis); EUP approximate reciprocal for the denom.
    m = jnp.max(logits, axis=-1, keepdims=True)
    e = jnp.exp(logits - m)
    scores = e * pl.reciprocal(jnp.sum(e, axis=-1, keepdims=True), approx=True)

    # scores @ keys OFF the MXU: unrolled VPU weighted sum over the small,
    # static T axis (M=1 batched matmuls would double the MXU push count).
    out = scores[:, 0:1] * k_ref[:, 0, :]
    for t in range(1, T):
        out = out + scores[:, t:t + 1] * k_ref[:, t, :]              # (TB, H)

    # TODO(synk): H=32 makes this a 32-lane (masked) store; packing to a
    # (TB/4, 128) lane-dense slab needs a lane-regrouping reshape whose Mosaic
    # lowering is not guaranteed, and the store volume is T x smaller than the
    # keys input (compute-dominated), so it is left unpacked.
    o_ref[...] = out.astype(o_ref.dtype)


def din_attention(queries, keys, params, mask=None, block_b=None):
    """queries: [B, H] f32, keys: [B, T, H] f32, mask: optional [B, T] -> [B, 1, H]."""
    B, T, H = keys.shape
    W1, b1, W2, b2, w3, b3 = params
    D1 = W1.shape[1]
    D2 = W2.shape[1]

    # Fold the 4-way concat matmul algebraically (free at trace time):
    #   [q, k, q-k, q*k] @ W1 = q@(Wq+Wd) + [k, q*k] @ [[Wk-Wd], [Wp]]
    Wq = W1[0 * H:1 * H, :]
    Wk = W1[1 * H:2 * H, :]
    Wd = W1[2 * H:3 * H, :]
    Wp = W1[3 * H:4 * H, :]
    W1_q = Wq + Wd                                        # (H, D1)  q path
    W1_kp = jnp.concatenate([Wk - Wd, Wp], axis=0)        # (2H, D1) fused k / q*k path

    # Zero-pad D1 -> multiple of 128: lane-dense layer-1 output and a full-depth
    # layer-2 contraction. Padded h1 columns (sigmoid(0)=0.5) are killed by the
    # zero-padded W2 rows, so the math is unchanged.
    D1p = _round_up(D1, 128)
    if D1p != D1:
        padc = D1p - D1
        W1_q = jnp.pad(W1_q, ((0, 0), (0, padc)))
        W1_kp = jnp.pad(W1_kp, ((0, 0), (0, padc)))
        b1 = jnp.pad(b1, ((0, 0), (0, padc)))
        W2 = jnp.pad(W2, ((0, padc), (0, 0)))

    # bf16 weights for the two big MXU matmuls (f32 accumulation in-kernel).
    W1_kp = W1_kp.astype(jnp.bfloat16)
    W2 = W2.astype(jnp.bfloat16)

    # Additive mask bias (also carries the last Linear's scalar bias b3).
    b3s = b3.reshape(())
    if mask is None:
        bias = jnp.full((B, T), b3s, dtype=jnp.float32)
    else:
        bias = jnp.where(mask == 0, jnp.float32(NEG_FILL), b3s).astype(jnp.float32)

    align = 8
    if block_b is None:
        # Aim for ~4096 MLP rows (TB*T) per grid step to amortize the ~0.35 us
        # per-step overhead; keep >= 4 grid steps for v7x's two TensorCores
        # when the per-step work would stay large anyway.
        target_rows = 4096
        block_b = max(align, ((target_rows // max(T, 1)) // align) * align)
        b_ceil = _round_up(B, align)
        block_b = min(block_b, b_ceil)
        quarter = max(align, ((b_ceil // 4) // align) * align)
        if quarter * T >= 1024:
            block_b = min(block_b, quarter)
    else:
        block_b = max(align, (block_b // align) * align)

    Bp = _round_up(B, block_b)
    if Bp != B:
        pad = Bp - B
        queries = jnp.pad(queries, ((0, pad), (0, 0)))
        keys = jnp.pad(keys, ((0, pad), (0, 0), (0, 0)))
        bias = jnp.pad(bias, ((0, pad), (0, 0)))

    grid = (Bp // block_b,)

    # VMEM budget: double-buffered inputs + live per-row intermediates + slack.
    rows = block_b * T
    per_row = (4 * H * 4          # k3, q*k and the concatenated f32 rows
               + 2 * H * 2        # kqk bf16
               + 2 * D1p * 4      # layer-1 pre-activation / h1 f32
               + D1p * 2          # h1 bf16
               + 2 * D2 * 4)      # h2 f32
    est = (2 * block_b * T * H * 4 + 2 * block_b * (2 * H + T) * 4
           + rows * per_row + (4 << 20))
    vmem_limit = int(min(max(2 * est, 32 << 20), 48 << 20))

    grid_spec = pltpu.PrefetchScalarGridSpec(
        num_scalar_prefetch=0,
        grid=grid,
        in_specs=[
            pl.BlockSpec((block_b, H), lambda i: (i, 0)),          # queries
            pl.BlockSpec((block_b, T, H), lambda i: (i, 0, 0)),    # keys
            pl.BlockSpec((block_b, T), lambda i: (i, 0)),          # mask bias
            pl.BlockSpec((H, D1p), lambda i: (0, 0)),              # W1_q (q path, f32)
            pl.BlockSpec((2 * H, D1p), lambda i: (0, 0)),          # W1_kp (k & q*k, bf16)
            pl.BlockSpec((1, D1p), lambda i: (0, 0)),              # b1
            pl.BlockSpec((D1p, D2), lambda i: (0, 0)),             # W2 (bf16)
            pl.BlockSpec((1, D2), lambda i: (0, 0)),               # b2
            pl.BlockSpec((1, D2), lambda i: (0, 0)),               # w3 (W3^T)
        ],
        out_specs=pl.BlockSpec((block_b, H), lambda i: (i, 0)),
    )

    out = pl.pallas_call(
        din_attn_kernel,
        out_shape=jax.ShapeDtypeStruct((Bp, H), jnp.float32),
        grid_spec=grid_spec,
        compiler_params=pltpu.CompilerParams(
            dimension_semantics=("parallel",),
            vmem_limit_bytes=vmem_limit,
        ),
    )(queries, keys, bias, W1_q, W1_kp, b1, W2, b2, w3)

    return out[:B].reshape(B, 1, H)


def init_params(key, hidden_dim):
    """Deterministic init mimicking nn.Linear defaults (uniform +-1/sqrt(fan_in))."""
    dims = [(4 * hidden_dim, 80), (80, 40), (40, 1)]
    keys = jax.random.split(key, 2 * len(dims))
    params = []
    for i, (fin, fout) in enumerate(dims):
        bound = 1.0 / (fin ** 0.5)
        W = jax.random.uniform(keys[2 * i], (fin, fout), jnp.float32, -bound, bound)
        b = jax.random.uniform(keys[2 * i + 1], (1, fout), jnp.float32, -bound, bound)
        params.append((W, b))
    (W1, b1), (W2, b2), (W3, b3) = params
    # Linear(40, 1): pass the weight as a (1, 40) row (i.e. W3^T) for the kernel.
    return (W1, b1, W2, b2, W3.reshape(1, 40), b3.reshape(1, 1))


def ref_forward(queries, keys, params, mask=None):
    """Pure-JAX (f32) reference reproducing the PyTorch forward exactly."""
    B, T, H = keys.shape
    W1, b1, W2, b2, w3, b3 = params
    q = jnp.broadcast_to(queries[:, None, :], (B, T, H))
    din_all = jnp.concatenate([q, keys, q - keys, q * keys], axis=-1)
    h1 = jax.nn.sigmoid(din_all @ W1 + b1)
    h2 = jax.nn.sigmoid(h1 @ W2 + b2)
    out = jnp.sum(h2 * w3, axis=-1) + b3[0, 0]            # [B, T]
    if mask is not None:
        out = jnp.where(mask == 0, jnp.float32(NEG_FILL), out)
    out = out[:, None, :] / jnp.sqrt(jnp.float32(T))      # [B, 1, T]
    scores = jax.nn.softmax(out, axis=-1)
    return scores @ keys                                  # [B, 1, H]


if __name__ == "__main__":
    H = 32                       # hidden_dim H=32 -> Attention(dim=4*H=128)
    key = jax.random.PRNGKey(0)
    k_q, k_k, k_p, k_q2, k_k2, k_m2 = jax.random.split(key, 6)

    params = init_params(k_p, H)

    # Small shape from the module spec.
    B, T = 2, 8
    queries = jax.random.normal(k_q, (B, H), dtype=jnp.float32)
    keys = jax.random.normal(k_k, (B, T, H), dtype=jnp.float32)
    # mask: last two timesteps of every sequence are padded out
    mask = jnp.concatenate(
        [jnp.ones((B, T - 2), jnp.int32), jnp.zeros((B, 2), jnp.int32)], axis=-1)

    out = jax.block_until_ready(din_attention(queries, keys, params, mask))
    ref = ref_forward(queries, keys, params, mask)
    assert out.shape == (B, 1, H)
    # bf16 MXU matmuls + approx reciprocal: compare at 1e-2 (observed error ~1e-3).
    assert jnp.allclose(out, ref, atol=1e-2, rtol=1e-2), "mismatch vs reference (masked)"

    # Unmasked path.
    out_nm = jax.block_until_ready(din_attention(queries, keys, params, None))
    ref_nm = ref_forward(queries, keys, params, None)
    assert jnp.allclose(out_nm, ref_nm, atol=1e-2, rtol=1e-2), "mismatch vs reference (no mask)"

    # Larger shape: exercises batch padding + a multi-step grid (megacore path).
    B2, T2 = 50, 32
    q2 = jax.random.normal(k_q2, (B2, H), dtype=jnp.float32)
    k2 = jax.random.normal(k_k2, (B2, T2, H), dtype=jnp.float32)
    m2 = (jax.random.uniform(k_m2, (B2, T2)) > 0.25).astype(jnp.int32)
    m2 = m2.at[:, 0].set(1)      # keep >=1 valid slot per row (all-masked is an
                                 # undefined-ish edge case in the reference too)
    out2 = jax.block_until_ready(din_attention(q2, k2, params, m2, block_b=32))
    ref2 = ref_forward(q2, k2, params, m2)
    assert out2.shape == (B2, 1, H)
    assert jnp.allclose(out2, ref2, atol=1e-2, rtol=1e-2), "mismatch vs reference (large)"

    print("KERNEL_OK")
</pallas_src>

<mosaic_0001>
module attributes {stable_mosaic.version = 11 : i64} {
  func.func @din_attn_kernel(%arg0: i32, %arg1: memref<8x32xf32, #tpu.memory_space<vmem>>, %arg2: memref<8x8x32xf32, #tpu.memory_space<vmem>>, %arg3: memref<8x8xf32, #tpu.memory_space<vmem>>, %arg4: memref<32x128xf32, #tpu.memory_space<vmem>>, %arg5: memref<64x128xbf16, #tpu.memory_space<vmem>>, %arg6: memref<1x128xf32, #tpu.memory_space<vmem>>, %arg7: memref<128x40xbf16, #tpu.memory_space<vmem>>, %arg8: memref<1x40xf32, #tpu.memory_space<vmem>>, %arg9: memref<1x40xf32, #tpu.memory_space<vmem>>, %arg10: memref<8x32xf32, #tpu.memory_space<vmem>>) attributes {dimension_semantics = [#tpu.dimension_semantics<parallel>], iteration_bounds = array<i64: 1>, scalar_prefetch = 0 : i64, scratch_operands = 0 : i64, tpu.core_type = #tpu.core_type<tc>, window_params = [{transform_indices = @transform_0, window_bounds = array<i64: 8, 32>}, {transform_indices = @transform_1, window_bounds = array<i64: 8, 8, 32>}, {transform_indices = @transform_2, window_bounds = array<i64: 8, 8>}, {pipeline_mode = #tpu.pipeline_mode<synchronous>, transform_indices = @transform_3, window_bounds = array<i64: 32, 128>}, {pipeline_mode = #tpu.pipeline_mode<synchronous>, transform_indices = @transform_4, window_bounds = array<i64: 64, 128>}, {pipeline_mode = #tpu.pipeline_mode<synchronous>, transform_indices = @transform_5, window_bounds = array<i64: 1, 128>}, {pipeline_mode = #tpu.pipeline_mode<synchronous>, transform_indices = @transform_6, window_bounds = array<i64: 128, 40>}, {pipeline_mode = #tpu.pipeline_mode<synchronous>, transform_indices = @transform_7, window_bounds = array<i64: 1, 40>}, {pipeline_mode = #tpu.pipeline_mode<synchronous>, transform_indices = @transform_8, window_bounds = array<i64: 1, 40>}, {transform_indices = @transform_9, window_bounds = array<i64: 8, 32>}]} {
    %c0 = arith.constant 0 : index
    %c0_0 = arith.constant 0 : index
    %0 = vector.load %arg1[%c0, %c0_0] : memref<8x32xf32, #tpu.memory_space<vmem>>, vector<8x32xf32>
    %c0_1 = arith.constant 0 : index
    %c0_2 = arith.constant 0 : index
    %c0_3 = arith.constant 0 : index
    %1 = vector.load %arg2[%c0_1, %c0_2, %c0_3] : memref<8x8x32xf32, #tpu.memory_space<vmem>>, vector<8x8x32xf32>
    %2 = vector.shape_cast %1 : vector<8x8x32xf32> to vector<64x32xf32>
    %3 = vector.shape_cast %0 : vector<8x32xf32> to vector<8x1x32xf32>
    %4 = vector.broadcast %3 : vector<8x1x32xf32> to vector<8x8x32xf32>
    %5 = arith.mulf %4, %1 : vector<8x8x32xf32>
    %6 = vector.shape_cast %5 : vector<8x8x32xf32> to vector<64x32xf32>
    %7 = tpu.concatenate %2, %6 in 1 : vector<64x32xf32>, vector<64x32xf32> -> vector<64x64xf32>
    %8 = arith.truncf %7 : vector<64x64xf32> to vector<64x64xbf16>
    %c0_4 = arith.constant 0 : index
    %c0_5 = arith.constant 0 : index
    %9 = vector.load %arg4[%c0_4, %c0_5] : memref<32x128xf32, #tpu.memory_space<vmem>>, vector<32x128xf32>
    %cst = arith.constant dense<0.000000e+00> : vector<8x128xf32>
    %10 = tpu.matmul %0, %9, %cst {dimension_numbers = #tpu.dot_dimension_numbers<[1], [0], [0], [1], [0, 0, 1, 1], [], []>} : vector<8x32xf32>, vector<32x128xf32>, vector<8x128xf32> -> vector<8x128xf32>
    %c0_6 = arith.constant 0 : index
    %c0_7 = arith.constant 0 : index
    %11 = vector.load %arg6[%c0_6, %c0_7] : memref<1x128xf32, #tpu.memory_space<vmem>>, vector<1x128xf32>
    %12 = vector.broadcast %11 : vector<1x128xf32> to vector<8x128xf32>
    %13 = arith.addf %10, %12 : vector<8x128xf32>
    %c0_8 = arith.constant 0 : index
    %c0_9 = arith.constant 0 : index
    %14 = vector.load %arg5[%c0_8, %c0_9] : memref<64x128xbf16, #tpu.memory_space<vmem>>, vector<64x128xbf16>
    %cst_10 = arith.constant dense<0.000000e+00> : vector<64x128xf32>
    %15 = tpu.matmul %8, %14, %cst_10 {dimension_numbers = #tpu.dot_dimension_numbers<[1], [0], [0], [1], [0, 0, 1, 1], [], []>} : vector<64x64xbf16>, vector<64x128xbf16>, vector<64x128xf32> -> vector<64x128xf32>
    %16 = vector.shape_cast %15 : vector<64x128xf32> to vector<8x8x128xf32>
    %17 = vector.shape_cast %13 : vector<8x128xf32> to vector<8x1x128xf32>
    %18 = vector.broadcast %17 : vector<8x1x128xf32> to vector<8x8x128xf32>
    %19 = arith.addf %16, %18 : vector<8x8x128xf32>
    %20 = arith.negf %19 : vector<8x8x128xf32>
    %21 = math.exp %20 : vector<8x8x128xf32>
    %cst_11 = arith.constant 1.000000e+00 : f32
    %22 = vector.broadcast %cst_11 : f32 to vector<8x8x128xf32>
    %23 = arith.addf %22, %21 : vector<8x8x128xf32>
    %24 = arith.divf %22, %23 : vector<8x8x128xf32>
    %25 = vector.shape_cast %24 : vector<8x8x128xf32> to vector<64x128xf32>
    %26 = arith.truncf %25 : vector<64x128xf32> to vector<64x128xbf16>
    %c0_12 = arith.constant 0 : index
    %c0_13 = arith.constant 0 : index
    %27 = vector.load %arg7[%c0_12, %c0_13] : memref<128x40xbf16, #tpu.memory_space<vmem>>, vector<128x40xbf16>
    %cst_14 = arith.constant dense<0.000000e+00> : vector<64x40xf32>
    %28 = tpu.matmul %26, %27, %cst_14 {dimension_numbers = #tpu.dot_dimension_numbers<[1], [0], [0], [1], [0, 0, 1, 1], [], []>} : vector<64x128xbf16>, vector<128x40xbf16>, vector<64x40xf32> -> vector<64x40xf32>
    %c0_15 = arith.constant 0 : index
    %c0_16 = arith.constant 0 : index
    %29 = vector.load %arg8[%c0_15, %c0_16] : memref<1x40xf32, #tpu.memory_space<vmem>>, vector<1x40xf32>
    %30 = vector.broadcast %29 : vector<1x40xf32> to vector<64x40xf32>
    %31 = arith.addf %28, %30 : vector<64x40xf32>
    %32 = arith.negf %31 : vector<64x40xf32>
    %33 = math.exp %32 : vector<64x40xf32>
    %cst_17 = arith.constant 1.000000e+00 : f32
    %34 = vector.broadcast %cst_17 : f32 to vector<64x40xf32>
    %35 = arith.addf %34, %33 : vector<64x40xf32>
    %36 = arith.divf %34, %35 : vector<64x40xf32>
    %37 = vector.shape_cast %36 : vector<64x40xf32> to vector<8x8x40xf32>
    %c0_18 = arith.constant 0 : index
    %c0_19 = arith.constant 0 : index
    %38 = vector.load %arg9[%c0_18, %c0_19] : memref<1x40xf32, #tpu.memory_space<vmem>>, vector<1x40xf32>
    %39 = vector.shape_cast %38 : vector<1x40xf32> to vector<1x1x40xf32>
    %40 = vector.broadcast %39 : vector<1x1x40xf32> to vector<8x8x40xf32>
    %41 = arith.mulf %37, %40 : vector<8x8x40xf32>
    %cst_20 = arith.constant dense<0.000000e+00> : vector<8x8xf32>
    %42 = vector.multi_reduction <add>, %41, %cst_20 [2] : vector<8x8x40xf32> to vector<8x8xf32>
    %c0_21 = arith.constant 0 : index
    %c0_22 = arith.constant 0 : index
    %43 = vector.load %arg3[%c0_21, %c0_22] : memref<8x8xf32, #tpu.memory_space<vmem>>, vector<8x8xf32>
    %44 = arith.addf %42, %43 : vector<8x8xf32>
    %cst_23 = arith.constant 0.353553385 : f32
    %45 = vector.broadcast %cst_23 : f32 to vector<8x8xf32>
    %46 = arith.mulf %44, %45 : vector<8x8xf32>
    %cst_24 = arith.constant dense<0xFF800000> : vector<8xf32>
    %47 = vector.multi_reduction <maximumf>, %46, %cst_24 [1] : vector<8x8xf32> to vector<8xf32>
    %48 = vector.shape_cast %47 : vector<8xf32> to vector<8x1xf32>
    %49 = vector.broadcast %48 : vector<8x1xf32> to vector<8x8xf32>
    %50 = arith.subf %46, %49 : vector<8x8xf32>
    %51 = math.exp %50 : vector<8x8xf32>
    %cst_25 = arith.constant dense<0.000000e+00> : vector<8xf32>
    %52 = vector.multi_reduction <add>, %51, %cst_25 [1] : vector<8x8xf32> to vector<8xf32>
    %53 = vector.shape_cast %52 : vector<8xf32> to vector<8x1xf32>
    %54 = tpu.reciprocal %53 {approx = true} : vector<8x1xf32> -> vector<8x1xf32>
    %55 = vector.broadcast %54 : vector<8x1xf32> to vector<8x8xf32>
    %56 = arith.mulf %51, %55 : vector<8x8xf32>
    %57 = vector.extract_strided_slice %56 {offsets = [0, 0], sizes = [8, 1], strides = [1, 1]} : vector<8x8xf32> to vector<8x1xf32>
    %c0_26 = arith.constant 0 : index
    %c0_27 = arith.constant 0 : index
    %c0_28 = arith.constant 0 : index
    %58 = vector.load %arg2[%c0_26, %c0_27, %c0_28] : memref<8x8x32xf32, #tpu.memory_space<vmem>>, vector<8x1x32xf32>
    %59 = vector.shape_cast %58 : vector<8x1x32xf32> to vector<8x32xf32>
    %60 = vector.broadcast %57 : vector<8x1xf32> to vector<8x32xf32>
    %61 = arith.mulf %60, %59 : vector<8x32xf32>
    %62 = vector.extract_strided_slice %56 {offsets = [0, 1], sizes = [8, 1], strides = [1, 1]} : vector<8x8xf32> to vector<8x1xf32>
    %c0_29 = arith.constant 0 : index
    %c1 = arith.constant 1 : index
    %c0_30 = arith.constant 0 : index
    %63 = vector.load %arg2[%c0_29, %c1, %c0_30] : memref<8x8x32xf32, #tpu.memory_space<vmem>>, vector<8x1x32xf32>
    %64 = vector.shape_cast %63 : vector<8x1x32xf32> to vector<8x32xf32>
    %65 = vector.broadcast %62 : vector<8x1xf32> to vector<8x32xf32>
    %66 = arith.mulf %65, %64 : vector<8x32xf32>
    %67 = arith.addf %61, %66 : vector<8x32xf32>
    %68 = vector.extract_strided_slice %56 {offsets = [0, 2], sizes = [8, 1], strides = [1, 1]} : vector<8x8xf32> to vector<8x1xf32>
    %c0_31 = arith.constant 0 : index
    %c2 = arith.constant 2 : index
    %c0_32 = arith.constant 0 : index
    %69 = vector.load %arg2[%c0_31, %c2, %c0_32] : memref<8x8x32xf32, #tpu.memory_space<vmem>>, vector<8x1x32xf32>
    %70 = vector.shape_cast %69 : vector<8x1x32xf32> to vector<8x32xf32>
    %71 = vector.broadcast %68 : vector<8x1xf32> to vector<8x32xf32>
    %72 = arith.mulf %71, %70 : vector<8x32xf32>
    %73 = arith.addf %67, %72 : vector<8x32xf32>
    %74 = vector.extract_strided_slice %56 {offsets = [0, 3], sizes = [8, 1], strides = [1, 1]} : vector<8x8xf32> to vector<8x1xf32>
    %c0_33 = arith.constant 0 : index
    %c3 = arith.constant 3 : index
    %c0_34 = arith.constant 0 : index
    %75 = vector.load %arg2[%c0_33, %c3, %c0_34] : memref<8x8x32xf32, #tpu.memory_space<vmem>>, vector<8x1x32xf32>
    %76 = vector.shape_cast %75 : vector<8x1x32xf32> to vector<8x32xf32>
    %77 = vector.broadcast %74 : vector<8x1xf32> to vector<8x32xf32>
    %78 = arith.mulf %77, %76 : vector<8x32xf32>
    %79 = arith.addf %73, %78 : vector<8x32xf32>
    %80 = vector.extract_strided_slice %56 {offsets = [0, 4], sizes = [8, 1], strides = [1, 1]} : vector<8x8xf32> to vector<8x1xf32>
    %c0_35 = arith.constant 0 : index
    %c4 = arith.constant 4 : index
    %c0_36 = arith.constant 0 : index
    %81 = vector.load %arg2[%c0_35, %c4, %c0_36] : memref<8x8x32xf32, #tpu.memory_space<vmem>>, vector<8x1x32xf32>
    %82 = vector.shape_cast %81 : vector<8x1x32xf32> to vector<8x32xf32>
    %83 = vector.broadcast %80 : vector<8x1xf32> to vector<8x32xf32>
    %84 = arith.mulf %83, %82 : vector<8x32xf32>
    %85 = arith.addf %79, %84 : vector<8x32xf32>
    %86 = vector.extract_strided_slice %56 {offsets = [0, 5], sizes = [8, 1], strides = [1, 1]} : vector<8x8xf32> to vector<8x1xf32>
    %c0_37 = arith.constant 0 : index
    %c5 = arith.constant 5 : index
    %c0_38 = arith.constant 0 : index
    %87 = vector.load %arg2[%c0_37, %c5, %c0_38] : memref<8x8x32xf32, #tpu.memory_space<vmem>>, vector<8x1x32xf32>
    %88 = vector.shape_cast %87 : vector<8x1x32xf32> to vector<8x32xf32>
    %89 = vector.broadcast %86 : vector<8x1xf32> to vector<8x32xf32>
    %90 = arith.mulf %89, %88 : vector<8x32xf32>
    %91 = arith.addf %85, %90 : vector<8x32xf32>
    %92 = vector.extract_strided_slice %56 {offsets = [0, 6], sizes = [8, 1], strides = [1, 1]} : vector<8x8xf32> to vector<8x1xf32>
    %c0_39 = arith.constant 0 : index
    %c6 = arith.constant 6 : index
    %c0_40 = arith.constant 0 : index
    %93 = vector.load %arg2[%c0_39, %c6, %c0_40] : memref<8x8x32xf32, #tpu.memory_space<vmem>>, vector<8x1x32xf32>
    %94 = vector.shape_cast %93 : vector<8x1x32xf32> to vector<8x32xf32>
    %95 = vector.broadcast %92 : vector<8x1xf32> to vector<8x32xf32>
    %96 = arith.mulf %95, %94 : vector<8x32xf32>
    %97 = arith.addf %91, %96 : vector<8x32xf32>
    %98 = vector.extract_strided_slice %56 {offsets = [0, 7], sizes = [8, 1], strides = [1, 1]} : vector<8x8xf32> to vector<8x1xf32>
    %c0_41 = arith.constant 0 : index
    %c7 = arith.constant 7 : index
    %c0_42 = arith.constant 0 : index
    %99 = vector.load %arg2[%c0_41, %c7, %c0_42] : memref<8x8x32xf32, #tpu.memory_space<vmem>>, vector<8x1x32xf32>
    %100 = vector.shape_cast %99 : vector<8x1x32xf32> to vector<8x32xf32>
    %101 = vector.broadcast %98 : vector<8x1xf32> to vector<8x32xf32>
    %102 = arith.mulf %101, %100 : vector<8x32xf32>
    %103 = arith.addf %97, %102 : vector<8x32xf32>
    %c0_43 = arith.constant 0 : index
    %c0_44 = arith.constant 0 : index
    %104 = vector.load %arg10[%c0_43, %c0_44] : memref<8x32xf32, #tpu.memory_space<vmem>>, vector<8x32xf32>
    tpu.vector_store %arg10[%c0_43, %c0_44], %103 {strides = array<i32>} : memref<8x32xf32, #tpu.memory_space<vmem>>, vector<8x32xf32>,
    return
  }
  func.func @transform_0(%arg0: i32) -> (i32, i32) {
    %c0_i32 = arith.constant 0 : i32
    %c0_i32_0 = arith.constant 0 : i32
    return %arg0, %c0_i32 : i32, i32
  }
  func.func @transform_1(%arg0: i32) -> (i32, i32, i32) {
    %c0_i32 = arith.constant 0 : i32
    %c0_i32_0 = arith.constant 0 : i32
    %c0_i32_1 = arith.constant 0 : i32
    return %arg0, %c0_i32, %c0_i32_0 : i32, i32, i32
  }
  func.func @transform_2(%arg0: i32) -> (i32, i32) {
    %c0_i32 = arith.constant 0 : i32
    %c0_i32_0 = arith.constant 0 : i32
    return %arg0, %c0_i32 : i32, i32
  }
  func.func @transform_3(%arg0: i32) -> (i32, i32) {
    %c0_i32 = arith.constant 0 : i32
    %c0_i32_0 = arith.constant 0 : i32
    %c0_i32_1 = arith.constant 0 : i32
    return %c0_i32, %c0_i32_0 : i32, i32
  }
  func.func @transform_4(%arg0: i32) -> (i32, i32) {
    %c0_i32 = arith.constant 0 : i32
    %c0_i32_0 = arith.constant 0 : i32
    %c0_i32_1 = arith.constant 0 : i32
    return %c0_i32, %c0_i32_0 : i32, i32
  }
  func.func @transform_5(%arg0: i32) -> (i32, i32) {
    %c0_i32 = arith.constant 0 : i32
    %c0_i32_0 = arith.constant 0 : i32
    %c0_i32_1 = arith.constant 0 : i32
    return %c0_i32, %c0_i32_0 : i32, i32
  }
  func.func @transform_6(%arg0: i32) -> (i32, i32) {
    %c0_i32 = arith.constant 0 : i32
    %c0_i32_0 = arith.constant 0 : i32
    %c0_i32_1 = arith.constant 0 : i32
    return %c0_i32, %c0_i32_0 : i32, i32
  }
  func.func @transform_7(%arg0: i32) -> (i32, i32) {
    %c0_i32 = arith.constant 0 : i32
    %c0_i32_0 = arith.constant 0 : i32
    %c0_i32_1 = arith.constant 0 : i32
    return %c0_i32, %c0_i32_0 : i32, i32
  }
  func.func @transform_8(%arg0: i32) -> (i32, i32) {
    %c0_i32 = arith.constant 0 : i32
    %c0_i32_0 = arith.constant 0 : i32
    %c0_i32_1 = arith.constant 0 : i32
    return %c0_i32, %c0_i32_0 : i32, i32
  }
  func.func @transform_9(%arg0: i32) -> (i32, i32) {
    %c0_i32 = arith.constant 0 : i32
    %c0_i32_0 = arith.constant 0 : i32
    return %arg0, %c0_i32 : i32, i32
  }
}

</mosaic_0001>

<bundles_post_ra>
// kernel: tpu_custom_call.1
= control target key start
LH: loop header
LB: loop body
LE: loop exit
PB: predicated region body
PF: predicated region fallthrough
CT: control target
= control target key end

     0   :  { %14 = vsyncpa [#allocation3], 0  ;;  %s6130_s0 = inlined_call_operand.vmem [shape: f32[8,32], index: 0, kind: input, shape index: {}]   ;;  %s6131_s1 = inlined_call_operand.vmem [shape: f32[8,8,32], index: 1, kind: input, shape index: {}]   ;;  %s6132_s2 = inlined_call_operand.vmem [shape: f32[8,8], index: 2, kind: input, shape index: {}]   ;;  %s6133_s3 = inlined_call_operand.hbm [shape: f32[32,128], index: 3, kind: input, shape index: {}]   ;;  %s6134_s4 = inlined_call_operand.hbm [shape: bf16[64,128], index: 4, kind: input, shape index: {}]   ;;  %s6135_s5 = inlined_call_operand.vmem [shape: f32[1,128], index: 5, kind: input, shape index: {}]   ;;  %s6136_s6 = inlined_call_operand.vmem [shape: bf16[128,40], index: 6, kind: input, shape index: {}]   ;;  %s6137_s7 = inlined_call_operand.vmem [shape: f32[1,40], index: 7, kind: input, shape index: {}]   ;;  %s6138_s8 = inlined_call_operand.vmem [shape: f32[1,40], index: 8, kind: input, shape index: {}]   ;;  %s6139_s9 = inlined_call_operand.hbm [shape: f32[8,32], index: 9, kind: output, shape index: {}]  }
   0x1   :  { %15 = vsyncpa [#allocation6], 0 }
   0x2   :  { %16 = vsyncpa [#allocation4], 0  ;;  %s4156_s30 = smov [#allocation2]  }
   0x3   :  { %s28_s10 = sshll.u32 %s4156_s30, 4  ;;  %s29_s10 = int_to_ptr.vmem [resolvable:$true] %s28_s10 }
   0x4   :  { %s4098_s11 = scalar_lea.vmem %s29_s10, 512  ;;  %p4103_p1 = scmp.lt.s32.totalorder %s29_s10, %s29_s10 }
   0x5   :  { %p4099_p0 = scmp.ne.s32.totalorder %s29_s10, %s4098_s11  ;;  %p4104_p2 = scmp.lt.s32.totalorder %s4098_s11, %s4098_s11 }
   0x7   :  { %p4105_p3 = por %p4104_p2, %p4103_p1 }
   0x9   :  { %p4106_p4 = pnand %p4105_p3, %p4099_p0 }
   0xb   :  { %4109 = shalt.err (!%p4106_p4)
}
   0xc   :  { %s4157_s12 = smov 128   ;;  %s4158_s13 = smov 8  }
   0xd   :  { %34 = dma.hbm_to_vmem [thread:$0]  %s6133_s3, 512, %s29_s10, [#allocation3], %s4157_s12, %s4157_s12, %s4158_s13  }
   0xe   :  { %s4159_s16 = smov [#allocation5]  }
   0xf   :  { %s40_s17 = sshll.u32 %s4159_s16, 4  ;;  %s41_s17 = int_to_ptr.vmem [resolvable:$true] %s40_s17 }
  0x10   :  { %s4118_s18 = scalar_lea.vmem %s41_s17, 512  ;;  %p4123_p6 = scmp.lt.s32.totalorder %s41_s17, %s41_s17 }
  0x11   :  { %p4119_p5 = scmp.ne.s32.totalorder %s41_s17, %s4118_s18  ;;  %p4124_p7 = scmp.lt.s32.totalorder %s4118_s18, %s4118_s18 }
  0x13   :  { %p4125_p8 = por %p4124_p7, %p4123_p6 }
  0x15   :  { %p4126_p9 = pnand %p4125_p8, %p4119_p5 }
  0x17   :  { %4129 = shalt.err (!%p4126_p9)
}
  0x18   :  { %s4160_s19 = smov 64   ;;  %s4161_s20 = smov 4  }
  0x19   :  { %46 = dma.hbm_to_vmem [thread:$0]  %s6134_s4, 512, %s41_s17, [#allocation6], %s4160_s19, %s4160_s19, %s4161_s20  }
  0x1a   :  { %4150 = dma.done.wait [#allocation3], 512  }
  0x1b   :  { %4151 = vsyncadd [#allocation3], 4294966784 }
  0x1c   :  { %4152 = dma.done.wait [#allocation6], 512  }
  0x1d   :  { %4153 = vsyncadd [#allocation6], 4294966784  ;;  %v6140_v0 = vlaneseq  ;;  %v4162_v1 = vmov 1966171168   ;;  %v4163_v3 = vmov 0.0   ;;  %vm4164_vm0 = vmmov 0  }
  0x1e   :  { %v74_v2 = vunpack.c.l.s4 %v4162_v1  ;;  %3910 = vmatprep.subr.mxu1 %v4163_v3  ;;  %3918 = vmatprep.mubr.msk.f32.mxu1 %vm4164_vm0, %v4163_v3  ;;  %v62_v7 = vld [vmem:[%s6130_s0] sm:$0xff]  ;;  %v217_v15 = vld [vmem:[#allocation2 + $0x18] sm:$0xff]  ;;  %v216_v16 = vld [vmem:[#allocation2 + $0x10] sm:$0xff]  ;;  %vm201_vm1 = vcmask 261120   ;;  %s4165_s17 = smov 32   ;;  %vm329_vm2 = vcmask 523264  }
  0x1f   :  { %v4225_v4 = vshrl.u32 %v6140_v0, 7  ;;  %v72_v10 = vcombine.high %v62_v7, %v62_v7  ;;  %v4240_v11 = vld [vmem:[%s6131_s1] sm:$0xff]  ;;  %v4247_v17 = vld [vmem:[%s6131_s1 + $0x8] sm:$0xff]  ;;  %v4252_v18 = vld [vmem:[%s6131_s1 + $0x10] sm:$0xff]  ;;  %3911 = vmatpush3.msra.mxu1 %v217_v15  ;;  %vm756_vm3 = vcmask 326656   ;;  %vm929_vm4 = vcmask 1041409  }
  0x20   :  { %v75_v5 = vunpack.c.0.s8 %v74_v2  ;;  %v4259_v22 = vld [vmem:[%s6131_s1 + $0x20] sm:$0xff]  ;;  %3912 = vmatprep.subr.mxu1 %v4163_v3  ;;  %v215_v24 = vld [vmem:[#allocation2 + $0x8] sm:$0xff]  ;;  %v4264_v25 = vld [vmem:[%s6131_s1 + $0x18] sm:$0xff]  ;;  %vm931_vm5 = vcmask 1042434   ;;  %vm933_vm6 = vcmask 1043459   ;;  %vm935_vm7 = vcmask 1044484  }
  0x21   :  { %6154 = vst [vmem:[#allocation11_spill] sm:$0xff] %v4225_v4  ;;  %v4235_v9 = vsub.s32 0, %v4225_v4  ;;  %3913 = vmatpush3.msra.mxu1 %v216_v16  ;;  %v214_v27 = vld [vmem:[#allocation2] sm:$0xff]  ;;  %v4273_v32 = vld [vmem:[%s6131_s1 + $0x28] sm:$0xff]  ;;  %v4278_v33 = vld [vmem:[%s6131_s1 + $0x30] sm:$0xff]  ;;  %v4307_v60 = vsub.s32 2, %v4225_v4 }
  0x22   :  { %v4228_v6 = vsub.s32 %v75_v5, %v4225_v4  ;;  %3914 = vmatprep.subr.mxu1 %v4163_v3  ;;  %v3996_v34 = vld [vmem:[#allocation5 + $0x18] sm:$0xff]   ;;  %v3997_v38 = vld [vmem:[#allocation5 + $0x10] sm:$0xff]   ;;  %v3998_v53 = vld [vmem:[#allocation5 + $0x8] sm:$0xff]   ;;  %v4312_v62 = vsub.s32 3, %v4225_v4  ;;  %v4317_v1 = vsub.s32 5, %v4225_v4  ;;  %vm937_vm8 = vcmask 1045509  }
  0x23   :  { %3915 = vmatpush3.msra.mxu1 %v215_v24  ;;  %v4288_v42 = vld [vmem:[%s6131_s1 + $0x38] sm:$0xff]  ;;  %v3999_v57 = vld [vmem:[#allocation5] sm:$0xff]   ;;  %vm939_vm9 = vcmask 1046534   ;;  %vm941_vm10 = vcmask 1047559   ;;  %vm944_vm11 = vcmask 64512   ;;  %vm3611_vm12 = vcmask 130112  }
  0x24   :  { %v79_v8 = vrot.slane %v62_v7, %v4228_v6  ;;  %v86_v14 = vrot.slane %v72_v10, %v4228_v6  ;;  %3916 = vmatprep.subr.mxu1 %v4163_v3  ;;  %v4302_v58 = vld [vmem:[%s6132_s2] sm:$0xff]  ;;  %v4322_v3 = vsub.s32 7, %v4225_v4  ;;  %v4333_v10 = vsub.s32 1, %v4225_v4 }
  0x25   :  { %3917 = vmatpush3.msra.mxu1 %v214_v27  ;;  %v786_v59 = vrot.slane %v4302_v58, %v4235_v9  ;;  %v800_v61 = vrot.slane %v4302_v58, %v4307_v60  ;;  %v807_v63 = vrot.slane %v4302_v58, %v4312_v62  ;;  %v821_v2 = vrot.slane %v4302_v58, %v4317_v1 }
  0x26   :  { %v87_v12 = vcombine.high %v79_v8, %v79_v8  ;;  %v95_v13 = vrot.slane %v79_v8, %v4228_v6  ;;  %v88_v23 = vcombine.high %v86_v14, %v86_v14  ;;  %v102_v26 = vrot.slane %v86_v14, %v4228_v6  ;;  %3919 = vmatmul.mubr.msk.f32.vlgmr.msra.gmra.mxu1 %vm201_vm1, %v62_v7  ;;  %v3821_v7 = vld [vmem:[%s6131_s1] ss:$0 sm:$0xff]  ;;  %v3822_v8 = vld [vmem:[%s6131_s1 + $0x8] ss:$0 sm:$0xff] }
  0x27   :  { %3921 = vmatprep.subr.bf16.mxu1 %v3996_v34  ;;  %v835_v5 = vrot.slane %v4302_v58, %v4322_v3  ;;  %vm3618_vm13 = vcmask 195712   ;;  %vm3625_vm14 = vcmask 261312  }
  0x28   :  { %v109_v19 = vrot.slane %v87_v12, %v4228_v6  ;;  %v117_v20 = vcombine.high %v95_v13, %v95_v13  ;;  %v124_v21 = vrot.slane %v95_v13, %v4235_v9  ;;  %v116_v35 = vrot.slane %v88_v23, %v4228_v6  ;;  %3922 = vmatpush3.bf16.msra.mxu1 %v3996_v34 }
  0x29   :  { %v118_v36 = vcombine.high %v102_v26, %v102_v26  ;;  %v140_v37 = vrot.slane %v102_v26, %v4235_v9  ;;  %3923 = vmatprep.subr.bf16.mxu1 %v3997_v38  ;;  %v793_v12 = vrot.slane %v4302_v58, %v4333_v10 }
  0x2a   :  { %v128_v28 = vrot.slane %v109_v19, %v4235_v9  ;;  %v161_v29 = vmul.f32 %v124_v21, %v4240_v11  ;;  %v119_v30 = vcombine.high %v109_v19, %v109_v19  ;;  %v132_v31 = vrot.slane %v117_v20, %v4235_v9 }
  0x2b   :  { %v144_v43 = vrot.slane %v116_v35, %v4235_v9  ;;  %v165_v44 = vmul.f32 %v140_v37, %v4259_v22  ;;  %v120_v45 = vcombine.high %v116_v35, %v116_v35  ;;  %v148_v46 = vrot.slane %v118_v36, %v4235_v9 }
  0x2c   :  { %v162_v39 = vmul.f32 %v128_v28, %v4247_v17  ;;  %v136_v40 = vrot.slane %v119_v30, %v4235_v9  ;;  %v163_v41 = vmul.f32 %v132_v31, %v4252_v18  ;;  %3924 = vmatpush3.bf16.msra.mxu1 %v3997_v38 }
  0x2d   :  { %v166_v49 = vmul.f32 %v144_v43, %v4273_v32  ;;  %v152_v50 = vrot.slane %v120_v45, %v4235_v9  ;;  %v167_v51 = vmul.f32 %v148_v46, %v4278_v33  ;;  %3925 = vmatprep.subr.bf16.mxu1 %v3998_v53  ;;  %v4000_v43 = vld [vmem:[%s6136_s6 + $0x38] sm:$0xff]   ;;  %v4002_v46 = vld [vmem:[%s6136_s6 + $0x28] sm:$0xff]  }
  0x2e   :  { %v3973_v47 = vpack.i.bf16 %v162_v39, %v161_v29  ;;  %v164_v48 = vmul.f32 %v136_v40, %v4264_v25  ;;  %v4365_v40 = vsub.s32 6, %v4225_v4  ;;  %3937 = vmatprep.subr.bf16.mxu0 %v4000_v43  ;;  %v3824_v45 = vld [vmem:[%s6131_s1 + $0x18] ss:$0 sm:$0xff] }
  0x2f   :  { %v3983_v54 = vpack.i.bf16 %v166_v49, %v165_v44  ;;  %v168_v55 = vmul.f32 %v152_v50, %v4288_v42  ;;  %3938 = vmatpush3.bf16.msra.mxu0 %v4000_v43  ;;  %v4001_v44 = vld [vmem:[%s6136_s6 + $0x30] sm:$0xff]   ;;  %v4004_v49 = vld [vmem:[%s6136_s6 + $0x18] sm:$0xff]  }
  0x30   :  { %3974 = vrot.lane.b32.xlu0 %v3973_v47, %s4165_s17  ;;  %v3978_v52 = vpack.i.bf16 %v164_v48, %v163_v41  ;;  %3926 = vmatpush3.bf16.msra.mxu1 %v3998_v53  ;;  %v4003_v47 = vld [vmem:[%s6136_s6 + $0x20] sm:$0xff]   ;;  %v4005_v50 = vld [vmem:[%s6136_s6 + $0x10] sm:$0xff]  }
  0x31   :  { %3984 = vrot.lane.b32.xlu1 %v3983_v54, %s4165_s17  ;;  %v3988_v56 = vpack.i.bf16 %v168_v55, %v167_v51  ;;  %3927 = vmatprep.subr.bf16.mxu1 %v3999_v57  ;;  %v3825_v48 = vld [vmem:[%s6131_s1 + $0x20] ss:$0 sm:$0xff]  ;;  %v3826_v51 = vld [vmem:[%s6131_s1 + $0x28] ss:$0 sm:$0xff]  ;;  %v3827_v54 = vld [vmem:[%s6131_s1 + $0x30] ss:$0 sm:$0xff] }
  0x32   :  { %3939 = vmatprep.subr.bf16.mxu0 %v4001_v44  ;;  %v4007_v53 = vld [vmem:[%s6136_s6] sm:$0xff]   ;;  %v3828_v55 = vld [vmem:[%s6131_s1 + $0x38] ss:$0 sm:$0xff] }
  0x33   :  { %3940 = vmatpush3.bf16.msra.mxu0 %v4001_v44 }
  0x34   :  { %3979 = vrot.lane.b32.xlu0 %v3978_v52, %s4165_s17  ;;  %3928 = vmatpush3.bf16.msra.mxu1 %v3999_v57  ;;  %v4006_v52 = vld [vmem:[%s6136_s6 + $0x8] sm:$0xff]  }
  0x35   :  { %3989 = vrot.lane.b32.xlu1 %v3988_v56, %s4165_s17  ;;  %3941 = vmatprep.subr.bf16.mxu0 %v4002_v46  ;;  %v3829_v56 = vld [vmem:[%s6131_s1 + $0x1] ss:$0 sm:$0xff]  ;;  %v3830_v57 = vld [vmem:[%s6131_s1 + $0x9] ss:$0 sm:$0xff] }
  0x37   :  { %3942 = vmatpush3.bf16.msra.mxu0 %v4002_v46 }
  0x38   :  { %795 = vbcast.lane.b32.xlu0 %v793_v12, 256  ;;  %3943 = vmatprep.subr.bf16.mxu0 %v4003_v47 }
  0x39   :  { %788 = vbcast.lane.b32.xlu1 %v786_v59, 256  ;;  %v3832_v59 = vld [vmem:[%s6131_s1 + $0x19] ss:$0 sm:$0xff] }
  0x3b   :  { %3944 = vmatpush3.bf16.msra.mxu0 %v4003_v47 }
  0x3c   :  { %3945 = vmatprep.subr.bf16.mxu0 %v4004_v49 }
  0x3d   :  { %802 = vbcast.lane.b32.xlu1 %v800_v61, 256  ;;  %v3833_v61 = vld [vmem:[%s6131_s1 + $0x21] ss:$0 sm:$0xff] }
  0x3f   :  { %3946 = vmatpush3.bf16.msra.mxu0 %v4004_v49 }
  0x40   :  { %3947 = vmatprep.subr.bf16.mxu0 %v4005_v50 }
  0x41   :  { %809 = vbcast.lane.b32.xlu1 %v807_v63, 256  ;;  %v3834_v63 = vld [vmem:[%s6131_s1 + $0x29] ss:$0 sm:$0xff] }
  0x43   :  { %3948 = vmatpush3.bf16.msra.mxu0 %v4005_v50 }
  0x44   :  { %3949 = vmatprep.subr.bf16.mxu0 %v4006_v52 }
  0x45   :  { %823 = vbcast.lane.b32.xlu1 %v821_v2, 256  ;;  %v3835_v2 = vld [vmem:[%s6131_s1 + $0x31] ss:$0 sm:$0xff] }
  0x47   :  { %3950 = vmatpush3.bf16.msra.mxu0 %v4006_v52 }
  0x48   :  { %3951 = vmatprep.subr.bf16.mxu0 %v4007_v53 }
  0x49   :  { %837 = vbcast.lane.b32.xlu1 %v835_v5, 256  ;;  %v3785_v5 = vld [vmem:[%s6135_s5] ss:$0 sm:$0xff] }
  0x4b   :  { %3952 = vmatpush3.bf16.msra.mxu0 %v4007_v53 }
  0x4d   :  { %1191 = vbcast.lane.b32.xlu1 %v3821_v7, 256 }
  0x51   :  { %1195 = vbcast.lane.b32.xlu1 %v3821_v7, 264 }
  0x55   :  { %1199 = vbcast.lane.b32.xlu1 %v3821_v7, 272 }
  0x59   :  { %1203 = vbcast.lane.b32.xlu1 %v3821_v7, 280 }
  0x5d   :  { %1210 = vbcast.lane.b32.xlu1 %v3822_v8, 256 }
  0x61   :  { %1218 = vbcast.lane.b32.xlu1 %v3822_v8, 272 }
  0x65   :  { %1222 = vbcast.lane.b32.xlu1 %v3822_v8, 280 }
  0xa2   :  { %v3975_v13 = vpop.permute.xlu0 %3974 }
  0xa3   :  { %v3977_v14 = vunpack.i.h.bf16 %v3975_v13  ;;  %v3976_v15 = vunpack.i.l.bf16 %v3975_v13  ;;  %v3985_v20 = vpop.permute.xlu1 %3984 }
  0xa4   :  { %v3987_v24 = vunpack.i.h.bf16 %v3985_v20  ;;  %v3986_v26 = vunpack.i.l.bf16 %v3985_v20  ;;  %v3837_v20 = vld [vmem:[%s6131_s1 + $0x2] ss:$0 sm:$0xff] }
  0xa5   :  { %v203_v16 = vsel %vm201_vm1, %v4247_v17, %v3977_v14  ;;  %v202_v19 = vsel %vm201_vm1, %v4240_v11, %v3976_v15 }
  0xa6   :  { %v3980_v21 = vpop.permute.xlu0 %3979  ;;  %v210_v23 = vpack.c.bf16 %v203_v16, %v202_v19  ;;  %v207_v29 = vsel %vm201_vm1, %v4273_v32, %v3987_v24  ;;  %v206_v30 = vsel %vm201_vm1, %v4259_v22, %v3986_v26 }
  0xa7   :  { %v3982_v27 = vunpack.i.h.bf16 %v3980_v21  ;;  %v3981_v28 = vunpack.i.l.bf16 %v3980_v21  ;;  %v3990_v31 = vpop.permute.xlu1 %3989  ;;  %v212_v34 = vpack.c.bf16 %v207_v29, %v206_v30 }
  0xa8   :  { %3929 = vmatprep.mubr.msk.bf16.mxu1 %vm329_vm2, %v210_v23  ;;  %v3992_v36 = vunpack.i.h.bf16 %v3990_v31  ;;  %v3991_v37 = vunpack.i.l.bf16 %v3990_v31 }
  0xa9   :  { %v205_v17 = vsel %vm201_vm1, %v4264_v25, %v3982_v27  ;;  %v204_v11 = vsel %vm201_vm1, %v4252_v18, %v3981_v28  ;;  %v4358_v18 = vsub.s32 4, %v4225_v4 }
  0xaa   :  { %v211_v35 = vpack.c.bf16 %v205_v17, %v204_v11  ;;  %v209_v38 = vsel %vm201_vm1, %v4288_v42, %v3992_v36  ;;  %v208_v32 = vsel %vm201_vm1, %v4278_v33, %v3991_v37  ;;  %v828_v33 = vrot.slane %v4302_v58, %v4365_v40  ;;  %v3823_v42 = vld [vmem:[%s6131_s1 + $0x10] ss:$0 sm:$0xff]  ;;  %v3838_v11 = vld [vmem:[%s6131_s1 + $0xa] ss:$0 sm:$0xff] }
  0xab   :  { %v213_v22 = vpack.c.bf16 %v209_v38, %v208_v32  ;;  %v814_v25 = vrot.slane %v4302_v58, %v4358_v18  ;;  %1229 = vbcast.lane.b32.xlu1 %v3823_v42, 256  ;;  %v3831_v58 = vld [vmem:[%s6131_s1 + $0x11] ss:$0 sm:$0xff]  ;;  %v4439_v12 = vpop.permute.xlu1 %788 }
  0xac   :  { %3930 = vmatmul.mubr.msk.bf16.vlgmr.msra.gmra.mxu1 %vm329_vm2, %v211_v35 }
  0xad   :  { %3933 = vmatprep.mubr.msk.bf16.mxu1 %vm329_vm2, %v212_v34  ;;  %816 = vbcast.lane.b32.xlu0 %v814_v25, 256 }
  0xaf   :  { %1233 = vbcast.lane.b32.xlu1 %v3823_v42, 264  ;;  %v4442_v15 = vpop.permute.xlu1 %802 }
  0xb1   :  { %830 = vbcast.lane.b32.xlu0 %v828_v33, 256 }
  0xb3   :  { %1237 = vbcast.lane.b32.xlu1 %v3823_v42, 272  ;;  %v4450_v26 = vpop.permute.xlu1 %809 }
  0xb4   :  { %3934 = vmatmul.mubr.msk.bf16.gmra.mxu1 %vm329_vm2, %v213_v22 }
  0xb5   :  { %1214 = vbcast.lane.b32.xlu0 %v3822_v8, 264  ;;  %v3836_v8 = vld [vmem:[%s6131_s1 + $0x39] ss:$0 sm:$0xff] }
  0xb7   :  { %1248 = vbcast.lane.b32.xlu1 %v3824_v45, 256  ;;  %v4459_v37 = vpop.permute.xlu1 %823 }
  0xb9   :  { %1241 = vbcast.lane.b32.xlu0 %v3823_v42, 280 }
  0xbb   :  { %1256 = vbcast.lane.b32.xlu1 %v3824_v45, 272  ;;  %v4467_v49 = vpop.permute.xlu1 %837 }
  0xbd   :  { %1252 = vbcast.lane.b32.xlu0 %v3824_v45, 264 }
  0xbf   :  { %1267 = vbcast.lane.b32.xlu1 %v3825_v48, 256 }
  0xc1   :  { %1260 = vbcast.lane.b32.xlu0 %v3824_v45, 280 }
  0xc3   :  { %1275 = vbcast.lane.b32.xlu1 %v3825_v48, 272 }
  0xc5   :  { %1271 = vbcast.lane.b32.xlu0 %v3825_v48, 264 }
  0xc7   :  { %1286 = vbcast.lane.b32.xlu1 %v3826_v51, 256 }
  0xc9   :  { %1279 = vbcast.lane.b32.xlu0 %v3825_v48, 280  ;;  %v3839_v48 = vld [vmem:[%s6131_s1 + $0x12] ss:$0 sm:$0xff] }
  0xcb   :  { %1294 = vbcast.lane.b32.xlu1 %v3826_v51, 272 }
  0xcd   :  { %1290 = vbcast.lane.b32.xlu0 %v3826_v51, 264 }
  0xcf   :  { %1305 = vbcast.lane.b32.xlu1 %v3827_v54, 256 }
  0xd1   :  { %1298 = vbcast.lane.b32.xlu0 %v3826_v51, 280 }
  0xd3   :  { %1313 = vbcast.lane.b32.xlu1 %v3827_v54, 272 }
  0xd5   :  { %1309 = vbcast.lane.b32.xlu0 %v3827_v54, 264 }
  0xd7   :  { %1324 = vbcast.lane.b32.xlu1 %v3828_v55, 256 }
  0xd9   :  { %1317 = vbcast.lane.b32.xlu0 %v3827_v54, 280 }
  0xdb   :  { %1332 = vbcast.lane.b32.xlu1 %v3828_v55, 272 }
  0xdd   :  { %1328 = vbcast.lane.b32.xlu0 %v3828_v55, 264 }
  0xdf   :  { %1455 = vbcast.lane.b32.xlu1 %v3829_v56, 256 }
  0xe1   :  { %1336 = vbcast.lane.b32.xlu0 %v3828_v55, 280 }
  0xe3   :  { %1463 = vbcast.lane.b32.xlu1 %v3829_v56, 272 }
  0xe5   :  { %1459 = vbcast.lane.b32.xlu0 %v3829_v56, 264 }
  0xe6   :  { %v4362_v39 = vpop.f32.mrf.mxu1 }
  0xe7   :  { %1474 = vbcast.lane.b32.xlu1 %v3830_v57, 256  ;;  %v294_v7 = vadd.f32 %v3785_v5, %v4362_v39 }
  0xe8   :  { %v3920_v41 = vpop.f32.mrf.mxu1 }
  0xe9   :  { %1467 = vbcast.lane.b32.xlu0 %v3829_v56, 280  ;;  %v415_v13 = vrot.slane %v294_v7, %v4228_v6  ;;  %v408_v14 = vcombine.high %v294_v7, %v294_v7 }
  0xeb   :  { %1482 = vbcast.lane.b32.xlu1 %v3830_v57, 272  ;;  %v423_v16 = vcombine.high %v415_v13, %v415_v13  ;;  %v431_v19 = vrot.slane %v415_v13, %v4228_v6  ;;  %v422_v21 = vrot.slane %v408_v14, %v4228_v6 }
  0xed   :  { %1478 = vbcast.lane.b32.xlu0 %v3830_v57, 264  ;;  %v453_v23 = vcombine.high %v431_v19, %v431_v19  ;;  %v445_v24 = vrot.slane %v423_v16, %v4228_v6  ;;  %v424_v27 = vcombine.high %v422_v21, %v422_v21  ;;  %v438_v30 = vrot.slane %v422_v21, %v4228_v6 }
  0xee   :  { %v460_v34 = vrot.slane %v431_v19, %v4235_v9 }
  0xef   :  { %1493 = vbcast.lane.b32.xlu1 %v3831_v58, 256  ;;  %v468_v28 = vrot.slane %v453_v23, %v4235_v9  ;;  %v455_v29 = vcombine.high %v445_v24, %v445_v24  ;;  %v452_v36 = vrot.slane %v424_v27, %v4228_v6  ;;  %v454_v22 = vcombine.high %v438_v30, %v438_v30 }
  0xf0   :  { %v464_v42 = vrot.slane %v445_v24, %v4235_v9  ;;  %v476_v52 = vrot.slane %v438_v30, %v4235_v9 }
  0xf1   :  { %1486 = vbcast.lane.b32.xlu0 %v3830_v57, 280  ;;  %v472_v32 = vrot.slane %v455_v29, %v4235_v9  ;;  %v456_v44 = vcombine.high %v452_v36, %v452_v36  ;;  %v484_v6 = vrot.slane %v454_v22, %v4235_v9  ;;  %v3842_v22 = vld [vmem:[%s6131_s1 + $0x2a] ss:$0 sm:$0xff] }
  0xf3   :  { %1501 = vbcast.lane.b32.xlu1 %v3831_v58, 272  ;;  %v488_v55 = vrot.slane %v456_v44, %v4235_v9 }
  0xf5   :  { %1497 = vbcast.lane.b32.xlu0 %v3831_v58, 264 }
  0xf7   :  { %1512 = vbcast.lane.b32.xlu1 %v3832_v59, 256 }
  0xf9   :  { %1505 = vbcast.lane.b32.xlu0 %v3831_v58, 280 }
  0xfb   :  { %1520 = vbcast.lane.b32.xlu1 %v3832_v59, 272 }
  0xfd   :  { %1516 = vbcast.lane.b32.xlu0 %v3832_v59, 264 }
  0xff   :  { %1531 = vbcast.lane.b32.xlu1 %v3833_v61, 256 }
 0x101   :  { %1524 = vbcast.lane.b32.xlu0 %v3832_v59, 280 }
 0x103   :  { %1539 = vbcast.lane.b32.xlu1 %v3833_v61, 272 }
 0x105   :  { %1535 = vbcast.lane.b32.xlu0 %v3833_v61, 264 }
 0x107   :  { %1550 = vbcast.lane.b32.xlu1 %v3834_v63, 256 }
 0x109   :  { %1543 = vbcast.lane.b32.xlu0 %v3833_v61, 280  ;;  %v480_v61 = vrot.slane %v452_v36, %v4235_v9 }
 0x10b   :  { %1558 = vbcast.lane.b32.xlu1 %v3834_v63, 272 }
 0x10d   :  { %1554 = vbcast.lane.b32.xlu0 %v3834_v63, 264 }
 0x10f   :  { %1569 = vbcast.lane.b32.xlu1 %v3835_v2, 256 }
 0x111   :  { %1562 = vbcast.lane.b32.xlu0 %v3834_v63, 280 }
 0x113   :  { %1577 = vbcast.lane.b32.xlu1 %v3835_v2, 272 }
 0x115   :  { %1573 = vbcast.lane.b32.xlu0 %v3835_v2, 264 }
 0x117   :  { %1588 = vbcast.lane.b32.xlu1 %v3836_v8, 256 }
 0x119   :  { %1581 = vbcast.lane.b32.xlu0 %v3835_v2, 280  ;;  %v4472_v2 = vpop.permute.xlu1 %1191 }
 0x11a   :  { %6155 = vst [vmem:[#allocation12_spill] sm:$0xff] %v4472_v2 }
 0x11b   :  { %1596 = vbcast.lane.b32.xlu1 %v3836_v8, 272 }
 0x11d   :  { %1592 = vbcast.lane.b32.xlu0 %v3836_v8, 264  ;;  %v4477_v16 = vpop.permute.xlu1 %1195 }
 0x11e   :  { %6156 = vst [vmem:[#allocation13_spill] sm:$0xff] %v4477_v16 }
 0x11f   :  { %1751 = vbcast.lane.b32.xlu1 %v3837_v20, 256 }
 0x121   :  { %1600 = vbcast.lane.b32.xlu0 %v3836_v8, 280  ;;  %v3840_v8 = vld [vmem:[%s6131_s1 + $0x1a] ss:$0 sm:$0xff]  ;;  %v4482_v30 = vpop.permute.xlu1 %1199 }
 0x122   :  { %6157 = vst [vmem:[#allocation14_spill] sm:$0xff] %v4482_v30 }
 0x123   :  { %1759 = vbcast.lane.b32.xlu1 %v3837_v20, 272 }
 0x125   :  { %1755 = vbcast.lane.b32.xlu0 %v3837_v20, 264 }
 0x127   :  { %1770 = vbcast.lane.b32.xlu1 %v3838_v11, 256 }
 0x129   :  { %1763 = vbcast.lane.b32.xlu0 %v3837_v20, 280 }
 0x12b   :  { %1778 = vbcast.lane.b32.xlu1 %v3838_v11, 272 }
 0x12d   :  { %1774 = vbcast.lane.b32.xlu0 %v3838_v11, 264 }
 0x12f   :  { %1789 = vbcast.lane.b32.xlu1 %v3839_v48, 256 }
 0x131   :  { %1782 = vbcast.lane.b32.xlu0 %v3838_v11, 280 }
 0x133   :  { %1797 = vbcast.lane.b32.xlu1 %v3839_v48, 272 }
 0x135   :  { %1793 = vbcast.lane.b32.xlu0 %v3839_v48, 264 }
 0x137   :  { %1808 = vbcast.lane.b32.xlu1 %v3840_v8, 256 }
 0x139   :  { %1801 = vbcast.lane.b32.xlu0 %v3839_v48, 280 }
 0x13b   :  { %1816 = vbcast.lane.b32.xlu1 %v3840_v8, 272 }
 0x13d   :  { %1812 = vbcast.lane.b32.xlu0 %v3840_v8, 264 }
 0x141   :  { %1820 = vbcast.lane.b32.xlu0 %v3840_v8, 280 }
 0x16c   :  { %v3931_v17 = vpop.f32.mrf.mxu1 }
 0x16d   :  { %v499_v31 = vadd.f32 %v3931_v17, %v468_v28  ;;  %v3841_v28 = vld [vmem:[%s6131_s1 + $0x22] ss:$0 sm:$0xff] }
 0x16e   :  { %v376_v35 = vpop.f32.mrf.mxu1  ;;  %1831 = vbcast.lane.b32.xlu0 %v3841_v28, 264  ;;  %1827 = vbcast.lane.b32.xlu1 %v3841_v28, 256 }
 0x16f   :  { %v497_v38 = vadd.f32 %v460_v34, %v376_v35  ;;  %v3797_v25 = vmul.f32 -1.442695, %v499_v31 }
 0x170   :  { %v3932_v39 = vpop.f32.mrf.mxu1 }
 0x171   :  { %v3795_v41 = vmul.f32 -1.442695, %v497_v38  ;;  %v500_v33 = vadd.f32 %v3932_v39, %v472_v32  ;;  %v4484_v32 = vpop.permute.xlu1 %1203 }
 0x172   :  { %v379_v43 = vpop.f32.mrf.mxu1  ;;  %1839 = vbcast.lane.b32.xlu0 %v3841_v28, 280  ;;  %1835 = vbcast.lane.b32.xlu1 %v3841_v28, 272  ;;  %6158 = vst [vmem:[#allocation15_spill] sm:$0xff] %v4484_v32 }
 0x173   :  { %4008 = vpow2.f32 %v3795_v41  ;;  %v3798_v45 = vmul.f32 -1.442695, %v500_v33  ;;  %v498_v46 = vadd.f32 %v464_v42, %v379_v43  ;;  %v3843_v43 = vld [vmem:[%s6131_s1 + $0x32] ss:$0 sm:$0xff] }
 0x174   :  { %4010 = vpow2.f32 %v3797_v25  ;;  %v3935_v47 = vpop.f32.mrf.mxu1 }
 0x175   :  { %4012 = vpow2.f32 %v3798_v45  ;;  %v3796_v50 = vmul.f32 -1.442695, %v498_v46  ;;  %v503_v51 = vadd.f32 %v3935_v47, %v484_v6  ;;  %v4489_v41 = vpop.permute.xlu1 %1210  ;;  %v4494_v46 = vpop.permute.xlu0 %795 }
 0x176   :  { %v392_v53 = vpop.f32.mrf.mxu1  ;;  %1850 = vbcast.lane.b32.xlu0 %v3842_v22, 264  ;;  %1846 = vbcast.lane.b32.xlu1 %v3842_v22, 256  ;;  %6159 = vst [vmem:[#allocation16_spill] sm:$0xff] %v4489_v41 }
 0x177   :  { %4014 = vpow2.f32 %v3796_v50  ;;  %v501_v54 = vadd.f32 %v476_v52, %v392_v53  ;;  %v3801_v56 = vmul.f32 -1.442695, %v503_v51  ;;  %v3844_v53 = vld [vmem:[%s6131_s1 + $0x3a] ss:$0 sm:$0xff] }
 0x178   :  { %v3936_v57 = vpop.f32.mrf.mxu1 }
 0x179   :  { %v3799_v58 = vmul.f32 -1.442695, %v501_v54  ;;  %v504_v59 = vadd.f32 %v3936_v57, %v488_v55  ;;  %v4496_v47 = vpop.permute.xlu1 %1218  ;;  %v4498_v51 = vpop.permute.xlu0 %816 }
 0x17a   :  { %v395_v63 = vpop.f32.mrf.mxu1  ;;  %1858 = vbcast.lane.b32.xlu0 %v3842_v22, 280  ;;  %1854 = vbcast.lane.b32.xlu1 %v3842_v22, 272  ;;  %6160 = vst [vmem:[#allocation17_spill] sm:$0xff] %v4496_v47  ;;  %v3851_v22 = vld [vmem:[%s6131_s1 + $0x33] ss:$0 sm:$0xff] }
 0x17b   :  { %4016 = vpow2.f32 %v3799_v58  ;;  %v3802_v5 = vmul.f32 -1.442695, %v504_v59  ;;  %v502_v7 = vadd.f32 %v480_v61, %v395_v63  ;;  %v3845_v61 = vld [vmem:[%s6131_s1 + $0x3] ss:$0 sm:$0xff] }
 0x17c   :  { %4018 = vpow2.f32 %v3801_v56 }
 0x17d   :  { %4020 = vpow2.f32 %v3802_v5  ;;  %v3800_v13 = vmul.f32 -1.442695, %v502_v7  ;;  %v4503_v57 = vpop.permute.xlu1 %1222  ;;  %v4505_v58 = vpop.permute.xlu0 %830  ;;  %v3846_v7 = vld [vmem:[%s6131_s1 + $0xb] ss:$0 sm:$0xff] }
 0x17e   :  { %1869 = vbcast.lane.b32.xlu0 %v3843_v43, 264  ;;  %1865 = vbcast.lane.b32.xlu1 %v3843_v43, 256  ;;  %6161 = vst [vmem:[#allocation18_spill] sm:$0xff] %v4503_v57 }
 0x17f   :  { %4022 = vpow2.f32 %v3800_v13 }
 0x180   :  { %v4009_v14 = vpop.eup %4008 }
 0x181   :  { %v4011_v19 = vpop.eup %4010  ;;  %v529_v20 = vadd.f32 1.0, %v4009_v14  ;;  %v4507_v59 = vpop.permute.xlu1 %1229 }
 0x182   :  { %v4013_v21 = vpop.eup %4012  ;;  %v531_v27 = vadd.f32 1.0, %v4011_v19  ;;  %1877 = vbcast.lane.b32.xlu0 %v3843_v43, 280  ;;  %1873 = vbcast.lane.b32.xlu1 %v3843_v43, 272  ;;  %6162 = vst [vmem:[#allocation19_spill] sm:$0xff] %v4507_v59  ;;  %v4512_v63 = vpop.permute.xlu0 %1214  ;;  %v3847_v19 = vld [vmem:[%s6131_s1 + $0x13] ss:$0 sm:$0xff] }
 0x183   :  { %v532_v23 = vadd.f32 1.0, %v4013_v21  ;;  %4024 = vrcp.f32 %v529_v20  ;;  %6163 = vst [vmem:[#allocation20_spill] sm:$0xff] %v4512_v63 }
 0x184   :  { %v4015_v24 = vpop.eup %4014 }
 0x185   :  { %v530_v29 = vadd.f32 1.0, %v4015_v24  ;;  %4026 = vrcp.f32 %v532_v23  ;;  %v4514_v5 = vpop.permute.xlu1 %1233  ;;  %v3848_v24 = vld [vmem:[%s6131_s1 + $0x1b] ss:$0 sm:$0xff] }
 0x186   :  { %1888 = vbcast.lane.b32.xlu0 %v3844_v53, 264  ;;  %1884 = vbcast.lane.b32.xlu1 %v3844_v53, 256  ;;  %6164 = vst [vmem:[#allocation21_spill] sm:$0xff] %v4514_v5  ;;  %v4519_v8 = vpop.permute.xlu0 %1241 }
 0x187   :  { %4028 = vrcp.f32 %v530_v29  ;;  %6165 = vst [vmem:[#allocation22_spill] sm:$0xff] %v4519_v8  ;;  %v3849_v29 = vld [vmem:[%s6131_s1 + $0x23] ss:$0 sm:$0xff] }
 0x188   :  { %v4017_v17 = vpop.eup %4016  ;;  %4030 = vrcp.f32 %v531_v27 }
 0x189   :  { %v4019_v11 = vpop.eup %4018  ;;  %v533_v31 = vadd.f32 1.0, %v4017_v17  ;;  %v4521_v13 = vpop.permute.xlu1 %1237 }
 0x18a   :  { %v4021_v34 = vpop.eup %4020  ;;  %v535_v38 = vadd.f32 1.0, %v4019_v11  ;;  %1896 = vbcast.lane.b32.xlu0 %v3844_v53, 280  ;;  %1892 = vbcast.lane.b32.xlu1 %v3844_v53, 272  ;;  %6166 = vst [vmem:[#allocation23_spill] sm:$0xff] %v4521_v13  ;;  %v4523_v14 = vpop.permute.xlu0 %1252 }
 0x18b   :  { %v536_v35 = vadd.f32 1.0, %v4021_v34  ;;  %4032 = vrcp.f32 %v533_v31  ;;  %6167 = vst [vmem:[#allocation24_spill] sm:$0xff] %v4523_v14  ;;  %v3850_v34 = vld [vmem:[%s6131_s1 + $0x2b] ss:$0 sm:$0xff] }
 0x18c   :  { %v4023_v36 = vpop.eup %4022 }
 0x18d   :  { %v534_v25 = vadd.f32 1.0, %v4023_v36  ;;  %4034 = vrcp.f32 %v536_v35  ;;  %v4528_v20 = vpop.permute.xlu1 %1248 }
 0x18e   :  { %2051 = vbcast.lane.b32.xlu0 %v3845_v61, 264  ;;  %2047 = vbcast.lane.b32.xlu1 %v3845_v61, 256  ;;  %6168 = vst [vmem:[#allocation25_spill] sm:$0xff] %v4528_v20  ;;  %v4530_v21 = vpop.permute.xlu0 %1260 }
 0x18f   :  { %4036 = vrcp.f32 %v534_v25  ;;  %6169 = vst [vmem:[#allocation26_spill] sm:$0xff] %v4530_v21 }
 0x190   :  { %4038 = vrcp.f32 %v535_v38  ;;  %v4025_v39 = vpop.eup %4024 }
 0x191   :  { %v4532_v23 = vpop.permute.xlu1 %1256 }
 0x192   :  { %v4027_v33 = vpop.eup %4026  ;;  %2059 = vbcast.lane.b32.xlu0 %v3845_v61, 280  ;;  %2055 = vbcast.lane.b32.xlu1 %v3845_v61, 272  ;;  %6170 = vst [vmem:[#allocation27_spill] sm:$0xff] %v4532_v23  ;;  %v4537_v27 = vpop.permute.xlu0 %1271 }
 0x193   :  { %6171 = vst [vmem:[#allocation28_spill] sm:$0xff] %v4537_v27 }
 0x194   :  { %v4029_v42 = vpop.eup %4028 }
 0x195   :  { %v4031_v44 = vpop.eup %4030  ;;  %v553_v45 = vpack.c.bf16 %v4029_v42, %v4025_v39  ;;  %v4539_v28 = vpop.permute.xlu1 %1267  ;;  %v4571_v42 = vld [vmem:[%s6131_s1 + $0x3b] ss:$0 sm:$0xff] }
 0x196   :  { %v554_v6 = vpack.c.bf16 %v4027_v33, %v4031_v44  ;;  %2070 = vbcast.lane.b32.xlu0 %v3846_v7, 264  ;;  %2066 = vbcast.lane.b32.xlu1 %v3846_v7, 256  ;;  %6172 = vst [vmem:[#allocation29_spill] sm:$0xff] %v4539_v28  ;;  %v4544_v17 = vpop.permute.xlu0 %1279 }
 0x197   :  { %3953 = vmatprep.mubr.bf16.mxu0 %v553_v45  ;;  %6173 = vst [vmem:[#allocation30_spill] sm:$0xff] %v4544_v17 }
 0x198   :  { %3954 = vmatmul.mubr.bf16.vlgmr.msra.gmra.mxu0 %v554_v6  ;;  %v4033_v48 = vpop.eup %4032 }
 0x199   :  { %v4546_v11 = vpop.permute.xlu1 %1275 }
 0x19a   :  { %v4035_v50 = vpop.eup %4034  ;;  %2078 = vbcast.lane.b32.xlu0 %v3846_v7, 280  ;;  %2074 = vbcast.lane.b32.xlu1 %v3846_v7, 272  ;;  %6174 = vst [vmem:[#allocation31_spill] sm:$0xff] %v4546_v11  ;;  %v4548_v31 = vpop.permute.xlu0 %1290 }
 0x19c   :  { %v4037_v52 = vpop.eup %4036 }
 0x19d   :  { %v4039_v54 = vpop.eup %4038  ;;  %v555_v55 = vpack.c.bf16 %v4037_v52, %v4033_v48  ;;  %v4553_v35 = vpop.permute.xlu1 %1286 }
 0x19e   :  { %v556_v56 = vpack.c.bf16 %v4035_v50, %v4039_v54  ;;  %2089 = vbcast.lane.b32.xlu0 %v3847_v19, 264  ;;  %2085 = vbcast.lane.b32.xlu1 %v3847_v19, 256  ;;  %v4555_v36 = vpop.permute.xlu0 %1298 }
 0x19f   :  { %3957 = vmatprep.mubr.bf16.mxu0 %v555_v55 }
 0x1a0   :  { %3958 = vmatmul.mubr.bf16.gmra.mxu0 %v556_v56 }
 0x1a1   :  { %v4557_v38 = vpop.permute.xlu1 %1294 }
 0x1a2   :  { %2097 = vbcast.lane.b32.xlu0 %v3847_v19, 280  ;;  %2093 = vbcast.lane.b32.xlu1 %v3847_v19, 272  ;;  %v4562_v25 = vpop.permute.xlu0 %1309 }
 0x1a3   :  { %6175 = vst [vmem:[#allocation32_spill] sm:$0xff] %v4562_v25 }
 0x1a5   :  { %v4564_v39 = vpop.permute.xlu1 %1305 }
 0x1a6   :  { %2108 = vbcast.lane.b32.xlu0 %v3848_v24, 264  ;;  %2104 = vbcast.lane.b32.xlu1 %v3848_v24, 256  ;;  %v4566_v33 = vpop.permute.xlu0 %1317 }
 0x1a7   :  { %6176 = vst [vmem:[#allocation33_spill] sm:$0xff] %v4566_v33  ;;  %v6279_v33 = vlaneseq }
 0x1a9   :  { %v4574_v43 = vpop.permute.xlu1 %1313 }
 0x1aa   :  { %2116 = vbcast.lane.b32.xlu0 %v3848_v24, 280  ;;  %2112 = vbcast.lane.b32.xlu1 %v3848_v24, 272  ;;  %6177 = vst [vmem:[#allocation34_spill] sm:$0xff] %v4574_v43  ;;  %v4577_v44 = vpop.permute.xlu0 %1328 }
 0x1ab   :  { %6178 = vst [vmem:[#allocation35_spill] sm:$0xff] %v4577_v44 }
 0x1ad   :  { %v4579_v45 = vpop.permute.xlu1 %1324 }
 0x1ae   :  { %2127 = vbcast.lane.b32.xlu0 %v3849_v29, 264  ;;  %2123 = vbcast.lane.b32.xlu1 %v3849_v29, 256  ;;  %6179 = vst [vmem:[#allocation36_spill] sm:$0xff] %v4579_v45  ;;  %v4581_v6 = vpop.permute.xlu0 %1336 }
 0x1af   :  { %6180 = vst [vmem:[#allocation37_spill] sm:$0xff] %v4581_v6 }
 0x1b1   :  { %v4583_v48 = vpop.permute.xlu1 %1332 }
 0x1b2   :  { %2135 = vbcast.lane.b32.xlu0 %v3849_v29, 280  ;;  %2131 = vbcast.lane.b32.xlu1 %v3849_v29, 272  ;;  %6181 = vst [vmem:[#allocation38_spill] sm:$0xff] %v4583_v48  ;;  %v4585_v50 = vpop.permute.xlu0 %1459 }
 0x1b3   :  { %6182 = vst [vmem:[#allocation39_spill] sm:$0xff] %v4585_v50 }
 0x1b5   :  { %v4587_v52 = vpop.permute.xlu1 %1455 }
 0x1b6   :  { %2146 = vbcast.lane.b32.xlu0 %v3850_v34, 264  ;;  %2142 = vbcast.lane.b32.xlu1 %v3850_v34, 256  ;;  %6183 = vst [vmem:[#allocation40_spill] sm:$0xff] %v4587_v52  ;;  %v4589_v53 = vpop.permute.xlu0 %1467 }
 0x1b7   :  { %6184 = vst [vmem:[#allocation41_spill] sm:$0xff] %v4589_v53 }
 0x1b9   :  { %v4591_v54 = vpop.permute.xlu1 %1463 }
 0x1ba   :  { %2154 = vbcast.lane.b32.xlu0 %v3850_v34, 280  ;;  %2150 = vbcast.lane.b32.xlu1 %v3850_v34, 272  ;;  %6185 = vst [vmem:[#allocation42_spill] sm:$0xff] %v4591_v54  ;;  %v4593_v55 = vpop.permute.xlu0 %1478 }
 0x1bb   :  { %6186 = vst [vmem:[#allocation43_spill] sm:$0xff] %v4593_v55 }
 0x1bd   :  { %v4595_v56 = vpop.permute.xlu1 %1474 }
 0x1be   :  { %2165 = vbcast.lane.b32.xlu0 %v3851_v22, 264  ;;  %2161 = vbcast.lane.b32.xlu1 %v3851_v22, 256  ;;  %6187 = vst [vmem:[#allocation44_spill] sm:$0xff] %v4595_v56  ;;  %v4597_v61 = vpop.permute.xlu0 %1486 }
 0x1bf   :  { %6188 = vst [vmem:[#allocation45_spill] sm:$0xff] %v4597_v61 }
 0x1c1   :  { %v4599_v7 = vpop.permute.xlu1 %1482 }
 0x1c2   :  { %2173 = vbcast.lane.b32.xlu0 %v3851_v22, 280  ;;  %2169 = vbcast.lane.b32.xlu1 %v3851_v22, 272  ;;  %6189 = vst [vmem:[#allocation46_spill] sm:$0xff] %v4599_v7  ;;  %v4601_v19 = vpop.permute.xlu0 %1497 }
 0x1c3   :  { %6190 = vst [vmem:[#allocation47_spill] sm:$0xff] %v4601_v19 }
 0x1c5   :  { %v4603_v24 = vpop.permute.xlu1 %1493 }
 0x1c6   :  { %2184 = vbcast.lane.b32.xlu0 %v4571_v42, 264  ;;  %2180 = vbcast.lane.b32.xlu1 %v4571_v42, 256  ;;  %6191 = vst [vmem:[#allocation48_spill] sm:$0xff] %v4603_v24  ;;  %v4605_v29 = vpop.permute.xlu0 %1505 }
 0x1c7   :  { %6192 = vst [vmem:[#allocation49_spill] sm:$0xff] %v4605_v29  ;;  %v3803_v29 = vld [vmem:[%s6137_s7] ss:$0 sm:$0xff] }
 0x1c9   :  { %v4607_v34 = vpop.permute.xlu1 %1501 }
 0x1ca   :  { %6193 = vst [vmem:[#allocation50_spill] sm:$0xff] %v4607_v34  ;;  %v4609_v22 = vpop.permute.xlu0 %1516 }
 0x1cb   :  { %6194 = vst [vmem:[#allocation51_spill] sm:$0xff] %v4609_v22 }
 0x1cd   :  { %v4611_v0 = vpop.permute.xlu1 %1512 }
 0x1ce   :  { %6195 = vst [vmem:[#allocation52_spill] sm:$0xff] %v4611_v0  ;;  %v4613_v6 = vpop.permute.xlu0 %1524 }
 0x1cf   :  { %6196 = vst [vmem:[#allocation53_spill] sm:$0xff] %v4613_v6 }
 0x1d1   :  { %v4615_v48 = vpop.permute.xlu1 %1520 }
 0x1d2   :  { %6197 = vst [vmem:[#allocation54_spill] sm:$0xff] %v4615_v48  ;;  %v4617_v17 = vpop.permute.xlu0 %1535 }
 0x1d3   :  { %6198 = vst [vmem:[#allocation55_spill] sm:$0xff] %v4617_v17 }
 0x1d5   :  { %v4619_v11 = vpop.permute.xlu1 %1531 }
 0x1d6   :  { %6199 = vst [vmem:[#allocation56_spill] sm:$0xff] %v4619_v11  ;;  %v4621_v21 = vpop.permute.xlu0 %1543 }
 0x1d7   :  { %6200 = vst [vmem:[#allocation57_spill] sm:$0xff] %v4621_v21 }
 0x1d9   :  { %v4623_v27 = vpop.permute.xlu1 %1539 }
 0x1da   :  { %6201 = vst [vmem:[#allocation58_spill] sm:$0xff] %v4623_v27  ;;  %v4625_v28 = vpop.permute.xlu0 %1554 }
 0x1dd   :  { %v4627_v23 = vpop.permute.xlu1 %1550 }
 0x1de   :  { %v4629_v44 = vpop.permute.xlu0 %1562 }
 0x1e1   :  { %v4631_v20 = vpop.permute.xlu1 %1558 }
 0x1e2   :  { %v4633_v0 = vpop.permute.xlu0 %1573 }
 0x1e3   :  { %6202 = vst [vmem:[#allocation59_spill] sm:$0xff] %v4633_v0 }
 0x1e5   :  { %v4635_v6 = vpop.permute.xlu1 %1569 }
 0x1e6   :  { %v4637_v48 = vpop.permute.xlu0 %1581 }
 0x1e7   :  { %6203 = vst [vmem:[#allocation60_spill] sm:$0xff] %v4637_v48 }
 0x1e9   :  { %v4639_v17 = vpop.permute.xlu1 %1577 }
 0x1ea   :  { %6204 = vst [vmem:[#allocation61_spill] sm:$0xff] %v4639_v17  ;;  %v4641_v11 = vpop.permute.xlu0 %1592 }
 0x1eb   :  { %6205 = vst [vmem:[#allocation62_spill] sm:$0xff] %v4641_v11 }
 0x1ed   :  { %v4643_v21 = vpop.permute.xlu1 %1588 }
 0x1ee   :  { %6206 = vst [vmem:[#allocation63_spill] sm:$0xff] %v4643_v21  ;;  %v4645_v27 = vpop.permute.xlu0 %1600 }
 0x1ef   :  { %6207 = vst [vmem:[#allocation64_spill] sm:$0xff] %v4645_v27 }
 0x1f1   :  { %v4647_v22 = vpop.permute.xlu1 %1596 }
 0x1f2   :  { %6208 = vst [vmem:[#allocation65_spill] sm:$0xff] %v4647_v22  ;;  %v4649_v14 = vpop.permute.xlu0 %1755 }
 0x1f3   :  { %6209 = vst [vmem:[#allocation66_spill] sm:$0xff] %v4649_v14 }
 0x1f5   :  { %v4651_v34 = vpop.permute.xlu1 %1751 }
 0x1f6   :  { %6210 = vst [vmem:[#allocation67_spill] sm:$0xff] %v4651_v34  ;;  %v4653_v13 = vpop.permute.xlu0 %1763 }
 0x1f7   :  { %6211 = vst [vmem:[#allocation68_spill] sm:$0xff] %v4653_v13 }
 0x1f9   :  { %v4658_v59 = vpop.permute.xlu1 %1759 }
 0x1fa   :  { %6212 = vst [vmem:[#allocation69_spill] sm:$0xff] %v4658_v59  ;;  %v4660_v27 = vpop.permute.xlu0 %1774 }
 0x1fb   :  { %6213 = vst [vmem:[#allocation70_spill] sm:$0xff] %v4660_v27 }
 0x1fd   :  { %v4662_v41 = vpop.permute.xlu1 %1770 }
 0x1fe   :  { %6214 = vst [vmem:[#allocation71_spill] sm:$0xff] %v4662_v41  ;;  %v4664_v59 = vpop.permute.xlu0 %1782 }
 0x1ff   :  { %6215 = vst [vmem:[#allocation72_spill] sm:$0xff] %v4664_v59 }
 0x202   :  { %v4668_v41 = vpop.permute.xlu0 %1793 }
 0x203   :  { %6217 = vst [vmem:[#allocation74_spill] sm:$0xff] %v4668_v41 }
 0x258   :  { %v3955_v8 = vpop.f32.mrf.mxu0 }
 0x259   :  { %v671_v24 = vadd.f32 %v3955_v8, %v3803_v29 }
 0x25a   :  { %v662_v11 = vpop.f32.mrf.mxu0 }
 0x25b   :  { %v3814_v19 = vmul.f32 -1.442695, %v671_v24  ;;  %v663_v5 = vadd.f32 %v3803_v29, %v662_v11 }
 0x25c   :  { %v3956_v22 = vpop.f32.mrf.mxu0 }
 0x25d   :  { %4040 = vpow2.f32 %v3814_v19  ;;  %v3812_v7 = vmul.f32 -1.442695, %v663_v5  ;;  %v674_v47 = vadd.f32 %v3956_v22, %v3803_v29  ;;  %v4666_v22 = vpop.permute.xlu1 %1778 }
 0x25e   :  { %v665_v61 = vpop.f32.mrf.mxu0  ;;  %6216 = vst [vmem:[#allocation73_spill] sm:$0xff] %v4666_v22 }
 0x25f   :  { %4042 = vpow2.f32 %v3812_v7  ;;  %v3815_v57 = vmul.f32 -1.442695, %v674_v47  ;;  %v666_v56 = vadd.f32 %v3803_v29, %v665_v61 }
 0x260   :  { %v3959_v55 = vpop.f32.mrf.mxu0 }
 0x261   :  { %4044 = vpow2.f32 %v3815_v57  ;;  %v3813_v8 = vmul.f32 -1.442695, %v666_v56  ;;  %v687_v63 = vadd.f32 %v3959_v55, %v3803_v29 }
 0x262   :  { %v678_v24 = vpop.f32.mrf.mxu0 }
 0x263   :  { %4046 = vpow2.f32 %v3813_v8  ;;  %v3818_v11 = vmul.f32 -1.442695, %v687_v63  ;;  %v679_v27 = vadd.f32 %v3803_v29, %v678_v24  ;;  %v4670_v8 = vpop.permute.xlu1 %1789 }
 0x264   :  { %v3960_v54 = vpop.f32.mrf.mxu0  ;;  %6218 = vst [vmem:[#allocation75_spill] sm:$0xff] %v4670_v8 }
 0x265   :  { %4048 = vpow2.f32 %v3818_v11  ;;  %v3816_v5 = vmul.f32 -1.442695, %v679_v27  ;;  %v690_v19 = vadd.f32 %v3960_v54, %v3803_v29  ;;  %v4672_v27 = vpop.permute.xlu0 %1801 }
 0x266   :  { %v681_v47 = vpop.f32.mrf.mxu0  ;;  %6219 = vst [vmem:[#allocation76_spill] sm:$0xff] %v4672_v27 }
 0x267   :  { %4050 = vpow2.f32 %v3816_v5  ;;  %v3819_v61 = vmul.f32 -1.442695, %v690_v19  ;;  %v682_v7 = vadd.f32 %v3803_v29, %v681_v47  ;;  %v4674_v19 = vpop.permute.xlu1 %1797 }
 0x268   :  { %6220 = vst [vmem:[#allocation77_spill] sm:$0xff] %v4674_v19 }
 0x269   :  { %4052 = vpow2.f32 %v3819_v61  ;;  %v3817_v57 = vmul.f32 -1.442695, %v682_v7  ;;  %v4676_v7 = vpop.permute.xlu0 %1812 }
 0x26a   :  { %v4041_v55 = vpop.eup %4040  ;;  %6221 = vst [vmem:[#allocation78_spill] sm:$0xff] %v4676_v7 }
 0x26b   :  { %v719_v56 = vadd.f32 1.0, %v4041_v55  ;;  %4054 = vpow2.f32 %v3817_v57  ;;  %v4678_v27 = vpop.permute.xlu1 %1808 }
 0x26c   :  { %v4043_v63 = vpop.eup %4042  ;;  %6222 = vst [vmem:[#allocation79_spill] sm:$0xff] %v4678_v27 }
 0x26d   :  { %4056 = vrcp.f32 %v719_v56  ;;  %v717_v24 = vadd.f32 1.0, %v4043_v63 }
 0x26e   :  { %v4045_v54 = vpop.eup %4044 }
 0x26f   :  { %4058 = vrcp.f32 %v717_v24  ;;  %v720_v11 = vadd.f32 1.0, %v4045_v54  ;;  %v3820_v54 = vld [vmem:[%s6138_s8] ss:$0 sm:$0xff] }
 0x270   :  { %v4047_v5 = vpop.eup %4046 }
 0x271   :  { %4060 = vrcp.f32 %v720_v11  ;;  %v718_v29 = vadd.f32 1.0, %v4047_v5  ;;  %v4683_v5 = vpop.permute.xlu0 %1820 }
 0x272   :  { %v4049_v47 = vpop.eup %4048  ;;  %6223 = vst [vmem:[#allocation80_spill] sm:$0xff] %v4683_v5 }
 0x273   :  { %4062 = vrcp.f32 %v718_v29  ;;  %v723_v61 = vadd.f32 1.0, %v4049_v47 }
 0x274   :  { %v4051_v57 = vpop.eup %4050 }
 0x275   :  { %4064 = vrcp.f32 %v723_v61  ;;  %v721_v55 = vadd.f32 1.0, %v4051_v57  ;;  %v4688_v7 = vpop.permute.xlu0 %1831 }
 0x276   :  { %v4053_v56 = vpop.eup %4052  ;;  %6225 = vst [vmem:[#allocation82_spill] sm:$0xff] %v4688_v7 }
 0x277   :  { %4066 = vrcp.f32 %v721_v55  ;;  %v724_v63 = vadd.f32 1.0, %v4053_v56  ;;  %v4686_v56 = vpop.permute.xlu1 %1816 }
 0x278   :  { %v4055_v24 = vpop.eup %4054  ;;  %6224 = vst [vmem:[#allocation81_spill] sm:$0xff] %v4686_v56 }
 0x279   :  { %4068 = vrcp.f32 %v724_v63  ;;  %v722_v11 = vadd.f32 1.0, %v4055_v24 }
 0x27a   :  { %v4057_v29 = vpop.eup %4056 }
 0x27b   :  { %4070 = vrcp.f32 %v722_v11  ;;  %v750_v47 = vmul.f32 %v4057_v29, %v3820_v54  ;;  %v4692_v41 = vpop.permute.xlu1 %1827 }
 0x27c   :  { %v4059_v61 = vpop.eup %4058  ;;  %6226 = vst [vmem:[#allocation83_spill] sm:$0xff] %v4692_v41 }
 0x27d   :  { %v763_v57 = vsel %vm756_vm3, %v750_v47, 0.0  ;;  %v748_v55 = vmul.f32 %v4059_v61, %v3820_v54  ;;  %v4694_v61 = vpop.permute.xlu0 %1839 }
 0x27e   :  { %v4061_v27 = vpop.eup %4060  ;;  %764 = vadd.xlane.f32.xlu0 %v763_v57  ;;  %6227 = vst [vmem:[#allocation84_spill] sm:$0xff] %v4694_v61 }
 0x27f   :  { %v757_v63 = vsel %vm756_vm3, %v748_v55, 0.0  ;;  %v751_v8 = vmul.f32 %v4061_v27, %v3820_v54 }
 0x280   :  { %v4063_v19 = vpop.eup %4062 }
 0x281   :  { %v749_v24 = vmul.f32 %v4063_v19, %v3820_v54  ;;  %v766_v57 = vsel %vm756_vm3, %v751_v8, 0.0  ;;  %v4701_v41 = vpop.permute.xlu0 %1850  ;;  %v4166_v8 = vmov 0  }
 0x282   :  { %v4065_v5 = vpop.eup %4064  ;;  %758 = vadd.xlane.f32.xlu0 %v757_v63  ;;  %v4698_v63 = vpop.permute.xlu1 %1835  ;;  %3993 = vset.pattern.permute.xlu1 %v4166_v8 }
 0x283   :  { %v760_v11 = vsel %vm756_vm3, %v749_v24, 0.0  ;;  %v754_v29 = vmul.f32 %v4065_v5, %v3820_v54  ;;  %6228 = vst [vmem:[#allocation85_spill] sm:$0xff] %v4698_v63  ;;  %3994 = vset.pattern.permute.xlu0 %v4166_v8 }
 0x284   :  { %v4067_v47 = vpop.eup %4066  ;;  %761 = vadd.xlane.f32.xlu1 %v760_v11 }
 0x285   :  { %v775_v7 = vsel %vm756_vm3, %v754_v29, 0.0  ;;  %v752_v55 = vmul.f32 %v4067_v47, %v3820_v54 }
 0x286   :  { %v4069_v56 = vpop.eup %4068  ;;  %767 = vadd.xlane.f32.xlu0 %v766_v57  ;;  %v4705_v29 = vpop.permute.xlu1 %1846 }
 0x287   :  { %v755_v19 = vmul.f32 %v4069_v56, %v3820_v54  ;;  %v769_v11 = vsel %vm756_vm3, %v752_v55, 0.0  ;;  %v4707_v56 = vpop.permute.xlu0 %1858  ;;  %v3853_v55 = vld [vmem:[%s6131_s1 + $0x4] ss:$0 sm:$0xff] }
 0x288   :  { %v4071_v27 = vpop.eup %4070  ;;  %776 = vadd.xlane.f32.xlu1 %v775_v7 }
 0x289   :  { %v778_v5 = vsel %vm756_vm3, %v755_v19, 0.0  ;;  %v753_v24 = vmul.f32 %v4071_v27, %v3820_v54 }
 0x28a   :  { %v4709_v7 = vpop.permute.xlu1 %1854 }
 0x28b   :  { %v772_v61 = vsel %vm756_vm3, %v753_v24, 0.0  ;;  %v4711_v47 = vpop.permute.xlu0 %1869  ;;  %v3854_v24 = vld [vmem:[%s6131_s1 + $0xc] ss:$0 sm:$0xff] }
 0x28c   :  { %770 = vadd.xlane.f32.xlu1 %v769_v11  ;;  %6229 = vst [vmem:[#allocation86_spill] sm:$0xff] %v4711_v47 }
 0x28e   :  { %v4713_v57 = vpop.permute.xlu1 %1865 }
 0x28f   :  { %v4716_v54 = vpop.permute.xlu0 %1877 }
 0x290   :  { %6230 = vst [vmem:[#allocation87_spill] sm:$0xff] %v4716_v54 }
 0x292   :  { %v4722_v19 = vpop.permute.xlu1 %1873 }
 0x293   :  { %6231 = vst [vmem:[#allocation88_spill] sm:$0xff] %v4722_v19  ;;  %v4724_v27 = vpop.permute.xlu0 %1888 }
 0x294   :  { %6232 = vst [vmem:[#allocation89_spill] sm:$0xff] %v4724_v27 }
 0x296   :  { %v4729_v11 = vpop.permute.xlu1 %1884 }
 0x297   :  { %6233 = vst [vmem:[#allocation90_spill] sm:$0xff] %v4729_v11  ;;  %v4731_v8 = vpop.permute.xlu0 %1896 }
 0x298   :  { %6234 = vst [vmem:[#allocation91_spill] sm:$0xff] %v4731_v8 }
 0x29a   :  { %v4738_v63 = vpop.permute.xlu1 %1892 }
 0x29b   :  { %6235 = vst [vmem:[#allocation92_spill] sm:$0xff] %v4738_v63  ;;  %v4740_v27 = vpop.permute.xlu0 %2051 }
 0x29c   :  { %2192 = vbcast.lane.b32.xlu0 %v4571_v42, 280  ;;  %6236 = vst [vmem:[#allocation93_spill] sm:$0xff] %v4740_v27 }
 0x29d   :  { %2188 = vbcast.lane.b32.xlu1 %v4571_v42, 272  ;;  %v4736_v42 = vld [vmem:[%s6131_s1 + $0x14] ss:$0 sm:$0xff] }
 0x29f   :  { %v4746_v22 = vpop.permute.xlu0 %2059 }
 0x2a0   :  { %2347 = vbcast.lane.b32.xlu0 %v3853_v55, 264  ;;  %6238 = vst [vmem:[#allocation95_spill] sm:$0xff] %v4746_v22 }
 0x2a1   :  { %2343 = vbcast.lane.b32.xlu1 %v3853_v55, 256 }
 0x2a3   :  { %v4750_v59 = vpop.permute.xlu0 %2070 }
 0x2a4   :  { %2355 = vbcast.lane.b32.xlu0 %v3853_v55, 280  ;;  %6240 = vst [vmem:[#allocation97_spill] sm:$0xff] %v4750_v59 }
 0x2a5   :  { %2351 = vbcast.lane.b32.xlu1 %v3853_v55, 272  ;;  %v4744_v55 = vpop.permute.xlu1 %2047 }
 0x2a6   :  { %6237 = vst [vmem:[#allocation94_spill] sm:$0xff] %v4744_v55 }
 0x2a7   :  { %v4754_v13 = vpop.permute.xlu0 %2078 }
 0x2a8   :  { %2366 = vbcast.lane.b32.xlu0 %v3854_v24, 264  ;;  %6242 = vst [vmem:[#allocation99_spill] sm:$0xff] %v4754_v13 }
 0x2a9   :  { %2362 = vbcast.lane.b32.xlu1 %v3854_v24, 256  ;;  %v4748_v8 = vpop.permute.xlu1 %2055 }
 0x2aa   :  { %6239 = vst [vmem:[#allocation96_spill] sm:$0xff] %v4748_v8 }
 0x2ac   :  { %2374 = vbcast.lane.b32.xlu0 %v3854_v24, 280 }
 0x2ad   :  { %2370 = vbcast.lane.b32.xlu1 %v3854_v24, 272  ;;  %v4752_v30 = vpop.permute.xlu1 %2066  ;;  %v4758_v24 = vpop.permute.xlu0 %2089 }
 0x2ae   :  { %6241 = vst [vmem:[#allocation98_spill] sm:$0xff] %v4752_v30  ;;  %6244 = vst [vmem:[#allocation101_spill] sm:$0xff] %v4758_v24 }
 0x2b0   :  { %2385 = vbcast.lane.b32.xlu0 %v4736_v42, 264 }
 0x2b1   :  { %2381 = vbcast.lane.b32.xlu1 %v4736_v42, 256  ;;  %v4756_v63 = vpop.permute.xlu1 %2074  ;;  %v4762_v32 = vpop.permute.xlu0 %2097 }
 0x2b2   :  { %6243 = vst [vmem:[#allocation100_spill] sm:$0xff] %v4756_v63  ;;  %6246 = vst [vmem:[#allocation103_spill] sm:$0xff] %v4762_v32 }
 0x2b5   :  { %v4760_v53 = vpop.permute.xlu1 %2085  ;;  %v4766_v22 = vpop.permute.xlu0 %2108 }
 0x2b6   :  { %6245 = vst [vmem:[#allocation102_spill] sm:$0xff] %v4760_v53  ;;  %6248 = vst [vmem:[#allocation105_spill] sm:$0xff] %v4766_v22 }
 0x2b9   :  { %v4764_v55 = vpop.permute.xlu1 %2093  ;;  %v4770_v59 = vpop.permute.xlu0 %2116 }
 0x2ba   :  { %6247 = vst [vmem:[#allocation104_spill] sm:$0xff] %v4764_v55  ;;  %6250 = vst [vmem:[#allocation107_spill] sm:$0xff] %v4770_v59 }
 0x2bd   :  { %v4768_v8 = vpop.permute.xlu1 %2104  ;;  %v4774_v13 = vpop.permute.xlu0 %2127 }
 0x2be   :  { %6249 = vst [vmem:[#allocation106_spill] sm:$0xff] %v4768_v8  ;;  %6252 = vst [vmem:[#allocation109_spill] sm:$0xff] %v4774_v13 }
 0x2c1   :  { %v4772_v30 = vpop.permute.xlu1 %2112  ;;  %v4778_v24 = vpop.permute.xlu0 %2135 }
 0x2c2   :  { %6251 = vst [vmem:[#allocation108_spill] sm:$0xff] %v4772_v30  ;;  %6254 = vst [vmem:[#allocation111_spill] sm:$0xff] %v4778_v24 }
 0x2c5   :  { %v4776_v63 = vpop.permute.xlu1 %2123 }
 0x2c6   :  { %6253 = vst [vmem:[#allocation110_spill] sm:$0xff] %v4776_v63 }
 0x2c9   :  { %v4780_v53 = vpop.permute.xlu1 %2131 }
 0x2ca   :  { %6255 = vst [vmem:[#allocation112_spill] sm:$0xff] %v4780_v53 }
 0x2cd   :  { %v4784_v55 = vpop.permute.xlu1 %2142 }
 0x2cf   :  { %779 = vadd.xlane.f32.xlu0 %v778_v5  ;;  %v4782_v5 = vpop.permute.xlu0 %2146 }
 0x2d3   :  { %773 = vadd.xlane.f32.xlu0 %v772_v61  ;;  %v4786_v22 = vpop.permute.xlu0 %2154  ;;  %v4788_v61 = vpop.permute.xlu1 %2150 }
 0x2d7   :  { %v4790_v8 = vpop.permute.xlu0 %2165  ;;  %v4792_v59 = vpop.permute.xlu1 %2161 }
 0x2d8   :  { %6256 = vst [vmem:[#allocation113_spill] sm:$0xff] %v4790_v8  ;;  %6257 = vst [vmem:[#allocation114_spill] sm:$0xff] %v4792_v59 }
 0x2db   :  { %v4794_v30 = vpop.permute.xlu0 %2173  ;;  %v4796_v13 = vpop.permute.xlu1 %2169 }
 0x2dc   :  { %6258 = vst [vmem:[#allocation115_spill] sm:$0xff] %v4794_v30  ;;  %6259 = vst [vmem:[#allocation116_spill] sm:$0xff] %v4796_v13  ;;  %v4968_v13 = vand.u32 127, %v6279_v33 }
 0x2de   :  { %6280 = vst [vmem:[#allocation136_spill] sm:$0xff] %v4968_v13  ;;  %v4980_v19 = vsub.s32 %v4968_v13, %v4225_v4 }
 0x2df   :  { %v4798_v63 = vpop.permute.xlu0 %2184  ;;  %v4800_v53 = vpop.permute.xlu1 %2180 }
 0x2e0   :  { %6260 = vst [vmem:[#allocation117_spill] sm:$0xff] %v4798_v63  ;;  %6261 = vst [vmem:[#allocation118_spill] sm:$0xff] %v4800_v53 }
 0x2e1   :  { %6282 = vst [vmem:[#allocation138_spill] sm:$0xff] %v4980_v19 }
 0x307   :  { %v765_v24 = vpop.xlane.xlu0 %764 }
 0x308   :  { %v849_v32 = vadd.f32 %v4442_v15, %v765_v24 }
 0x30a   :  { %v4803_v11 = vmul.f32 0.35355338, %v849_v32 }
 0x30b   :  { %v759_v34 = vpop.xlane.xlu0 %758 }
 0x30c   :  { %v847_v27 = vadd.f32 %v4439_v12, %v759_v34  ;;  %878 = vperm.xlu1 %3993, %v4803_v11  }
 0x30d   :  { %v762_v52 = vpop.xlane.xlu1 %761 }
 0x30e   :  { %v4807_v2 = vmul.f32 0.35355338, %v847_v27  ;;  %v848_v30 = vadd.f32 %v4494_v46, %v762_v52  ;;  %v3860_v27 = vld [vmem:[%s6131_s1 + $0x3c] ss:$0 sm:$0xff] }
 0x30f   :  { %v768_v21 = vpop.xlane.xlu0 %767 }
 0x310   :  { %v4810_v14 = vmul.f32 0.35355338, %v848_v30  ;;  %v850_v63 = vadd.f32 %v4450_v26, %v768_v21  ;;  %872 = vperm.xlu0 %3994, %v4807_v2   ;;  %v3856_v26 = vld [vmem:[%s6131_s1 + $0x1c] ss:$0 sm:$0xff]  ;;  %v3859_v21 = vld [vmem:[%s6131_s1 + $0x34] ss:$0 sm:$0xff] }
 0x311   :  { %v777_v15 = vpop.xlane.xlu1 %776 }
 0x312   :  { %v4814_v32 = vmul.f32 0.35355338, %v850_v63  ;;  %v853_v24 = vadd.f32 %v4505_v58, %v777_v15  ;;  %875 = vperm.xlu1 %3993, %v4810_v14   ;;  %v3858_v58 = vld [vmem:[%s6131_s1 + $0x2c] ss:$0 sm:$0xff]  ;;  %v3861_v15 = vld [vmem:[%s6131_s1 + $0x5] ss:$0 sm:$0xff] }
 0x313   :  { %v4840_v52 = vpop.permute.xlu0 %2192 }
 0x314   :  { %v4818_v12 = vmul.f32 0.35355338, %v853_v24  ;;  %881 = vperm.xlu0 %3994, %v4814_v32   ;;  %6262 = vst [vmem:[#allocation119_spill] sm:$0xff] %v4840_v52 }
 0x315   :  { %v771_v34 = vpop.xlane.xlu1 %770 }
 0x316   :  { %v851_v46 = vadd.f32 %v4498_v51, %v771_v34  ;;  %890 = vperm.xlu1 %3993, %v4818_v12   ;;  %v3857_v51 = vld [vmem:[%s6131_s1 + $0x24] ss:$0 sm:$0xff] }
 0x317   :  { %v4842_v63 = vpop.permute.xlu0 %2347 }
 0x318   :  { %v4823_v30 = vmul.f32 0.35355338, %v851_v46  ;;  %2393 = vbcast.lane.b32.xlu0 %v4736_v42, 280  ;;  %6263 = vst [vmem:[#allocation120_spill] sm:$0xff] %v4842_v63  ;;  %v4859_v46 = vld [vmem:[%s6131_s1 + $0xd] ss:$0 sm:$0xff] }
 0x31a   :  { %884 = vperm.xlu1 %3993, %v4823_v30  }
 0x31c   :  { %2404 = vbcast.lane.b32.xlu0 %v3856_v26, 264 }
 0x31e   :  { %2389 = vbcast.lane.b32.xlu1 %v4736_v42, 272  ;;  %v4847_v42 = vpop.permute.xlu0 %2355 }
 0x31f   :  { %6264 = vst [vmem:[#allocation121_spill] sm:$0xff] %v4847_v42 }
 0x320   :  { %2412 = vbcast.lane.b32.xlu0 %v3856_v26, 280 }
 0x322   :  { %2400 = vbcast.lane.b32.xlu1 %v3856_v26, 256  ;;  %v4852_v24 = vpop.permute.xlu0 %2366 }
 0x323   :  { %6265 = vst [vmem:[#allocation122_spill] sm:$0xff] %v4852_v24 }
 0x324   :  { %2423 = vbcast.lane.b32.xlu0 %v3857_v51, 264 }
 0x326   :  { %2408 = vbcast.lane.b32.xlu1 %v3856_v26, 272  ;;  %v4854_v34 = vpop.permute.xlu0 %2374 }
 0x327   :  { %6266 = vst [vmem:[#allocation123_spill] sm:$0xff] %v4854_v34 }
 0x328   :  { %2431 = vbcast.lane.b32.xlu0 %v3857_v51, 280 }
 0x32a   :  { %2419 = vbcast.lane.b32.xlu1 %v3857_v51, 256  ;;  %v4862_v26 = vpop.permute.xlu0 %2385 }
 0x32b   :  { %6267 = vst [vmem:[#allocation124_spill] sm:$0xff] %v4862_v26 }
 0x32c   :  { %2442 = vbcast.lane.b32.xlu0 %v3858_v58, 264 }
 0x32e   :  { %2427 = vbcast.lane.b32.xlu1 %v3857_v51, 272 }
 0x330   :  { %2450 = vbcast.lane.b32.xlu0 %v3858_v58, 280 }
 0x332   :  { %2438 = vbcast.lane.b32.xlu1 %v3858_v58, 256 }
 0x334   :  { %2461 = vbcast.lane.b32.xlu0 %v3859_v21, 264 }
 0x336   :  { %2446 = vbcast.lane.b32.xlu1 %v3858_v58, 272 }
 0x33a   :  { %2457 = vbcast.lane.b32.xlu1 %v3859_v21, 256 }
 0x33e   :  { %2465 = vbcast.lane.b32.xlu1 %v3859_v21, 272 }
 0x342   :  { %2476 = vbcast.lane.b32.xlu1 %v3860_v27, 256 }
 0x346   :  { %2484 = vbcast.lane.b32.xlu1 %v3860_v27, 272 }
 0x34a   :  { %2639 = vbcast.lane.b32.xlu1 %v3861_v15, 256 }
 0x34e   :  { %2647 = vbcast.lane.b32.xlu1 %v3861_v15, 272 }
 0x352   :  { %2658 = vbcast.lane.b32.xlu1 %v4859_v46, 256 }
 0x358   :  { %v780_v51 = vpop.xlane.xlu0 %779 }
 0x359   :  { %v854_v58 = vadd.f32 %v4467_v49, %v780_v51  ;;  %v4877_v49 = vld [vmem:[%s6131_s1 + $0x15] ss:$0 sm:$0xff] }
 0x35b   :  { %v4865_v52 = vmul.f32 0.35355338, %v854_v58  ;;  %v4914_v58 = vld [vmem:[%s6131_s1 + $0x3d] ss:$0 sm:$0xff] }
 0x35c   :  { %v774_v53 = vpop.xlane.xlu0 %773 }
 0x35d   :  { %v852_v24 = vadd.f32 %v4459_v37, %v774_v53  ;;  %893 = vperm.xlu0 %3994, %v4865_v52   ;;  %v4884_v37 = vld [vmem:[%s6131_s1 + $0x1d] ss:$0 sm:$0xff]  ;;  %v4891_v53 = vld [vmem:[%s6131_s1 + $0x25] ss:$0 sm:$0xff] }
 0x35f   :  { %v4869_v34 = vmul.f32 0.35355338, %v852_v24  ;;  %v4908_v24 = vpop.permute.xlu1 %2188 }
 0x360   :  { %6268 = vst [vmem:[#allocation125_spill] sm:$0xff] %v4908_v24  ;;  %v4925_v24 = vld [vmem:[%s6131_s1 + $0x6] ss:$0 sm:$0xff] }
 0x361   :  { %887 = vperm.xlu0 %3994, %v4869_v34  }
 0x363   :  { %v4916_v26 = vpop.permute.xlu1 %2343 }
 0x364   :  { %6269 = vst [vmem:[#allocation126_spill] sm:$0xff] %v4916_v26 }
 0x365   :  { %2469 = vbcast.lane.b32.xlu0 %v3859_v21, 280  ;;  %v4898_v21 = vld [vmem:[%s6131_s1 + $0x2d] ss:$0 sm:$0xff] }
 0x367   :  { %v4927_v63 = vpop.permute.xlu1 %2351 }
 0x368   :  { %6271 = vst [vmem:[#allocation128_spill] sm:$0xff] %v4927_v63 }
 0x369   :  { %2480 = vbcast.lane.b32.xlu0 %v3860_v27, 264 }
 0x36b   :  { %v4932_v54 = vpop.permute.xlu1 %2362 }
 0x36c   :  { %6273 = vst [vmem:[#allocation130_spill] sm:$0xff] %v4932_v54 }
 0x36d   :  { %2488 = vbcast.lane.b32.xlu0 %v3860_v27, 280  ;;  %v4905_v27 = vld [vmem:[%s6131_s1 + $0x35] ss:$0 sm:$0xff] }
 0x36f   :  { %v4943_v48 = vpop.permute.xlu1 %2370 }
 0x370   :  { %6275 = vst [vmem:[#allocation132_spill] sm:$0xff] %v4943_v48  ;;  %v4962_v48 = vld [vmem:[%s6131_s1 + $0x1e] ss:$0 sm:$0xff] }
 0x371   :  { %2643 = vbcast.lane.b32.xlu0 %v3861_v15, 264 }
 0x373   :  { %v4953_v54 = vpop.permute.xlu1 %2381 }
 0x374   :  { %6277 = vst [vmem:[#allocation134_spill] sm:$0xff] %v4953_v54 }
 0x375   :  { %2651 = vbcast.lane.b32.xlu0 %v3861_v15, 280 }
 0x379   :  { %2662 = vbcast.lane.b32.xlu0 %v4859_v46, 264 }
 0x37d   :  { %2670 = vbcast.lane.b32.xlu0 %v4859_v46, 280 }
 0x381   :  { %2681 = vbcast.lane.b32.xlu0 %v4877_v49, 264 }
 0x385   :  { %2689 = vbcast.lane.b32.xlu0 %v4877_v49, 280 }
 0x389   :  { %2700 = vbcast.lane.b32.xlu0 %v4884_v37, 264 }
 0x38b   :  { %v873_v15 = vpop.permute.xlu0 %872 }
 0x38c   :  { %v900_v43 = vrot.slane %v873_v15, %v4980_v19 }
 0x38d   :  { %2708 = vbcast.lane.b32.xlu0 %v4884_v37, 280 }
 0x38f   :  { %v882_v51 = vpop.permute.xlu0 %881 }
 0x390   :  { %v912_v13 = vrot.slane %v882_v51, %v4980_v19 }
 0x391   :  { %2719 = vbcast.lane.b32.xlu0 %v4891_v53, 264 }
 0x393   :  { %v4919_v42 = vpop.permute.xlu0 %2393 }
 0x394   :  { %6270 = vst [vmem:[#allocation127_spill] sm:$0xff] %v4919_v42  ;;  %v4940_v42 = vld [vmem:[%s6131_s1 + $0xe] ss:$0 sm:$0xff] }
 0x395   :  { %2727 = vbcast.lane.b32.xlu0 %v4891_v53, 280 }
 0x397   :  { %v4929_v45 = vpop.permute.xlu0 %2404 }
 0x398   :  { %6272 = vst [vmem:[#allocation129_spill] sm:$0xff] %v4929_v45  ;;  %v4951_v45 = vld [vmem:[%s6131_s1 + $0x16] ss:$0 sm:$0xff] }
 0x399   :  { %2738 = vbcast.lane.b32.xlu0 %v4898_v21, 264 }
 0x39b   :  { %v4935_v26 = vpop.permute.xlu0 %2412 }
 0x39c   :  { %6274 = vst [vmem:[#allocation131_spill] sm:$0xff] %v4935_v26 }
 0x39d   :  { %2746 = vbcast.lane.b32.xlu0 %v4898_v21, 280 }
 0x39f   :  { %v4945_v63 = vpop.permute.xlu0 %2423 }
 0x3a0   :  { %6276 = vst [vmem:[#allocation133_spill] sm:$0xff] %v4945_v63  ;;  %v879_v63 = vpop.permute.xlu1 %878 }
 0x3a1   :  { %2757 = vbcast.lane.b32.xlu0 %v4905_v27, 264  ;;  %v908_v25 = vrot.slane %v879_v63, %v4980_v19 }
 0x3a3   :  { %v4956_v26 = vpop.permute.xlu0 %2431 }
 0x3a4   :  { %6278 = vst [vmem:[#allocation135_spill] sm:$0xff] %v4956_v26  ;;  %v876_v16 = vpop.permute.xlu1 %875  ;;  %v4976_v26 = vld [vmem:[%s6131_s1 + $0x26] ss:$0 sm:$0xff] }
 0x3a5   :  { %2765 = vbcast.lane.b32.xlu0 %v4905_v27, 280  ;;  %v904_v17 = vrot.slane %v876_v16, %v4980_v19 }
 0x3a7   :  { %v4964_v50 = vpop.permute.xlu0 %2442  ;;  %v930_v47 = vsel %vm929_vm4, %v904_v17, %v900_v43 }
 0x3a8   :  { %v891_v8 = vpop.permute.xlu1 %890  ;;  %v932_v59 = vsel %vm931_vm5, %v908_v25, %v930_v47 }
 0x3a9   :  { %2776 = vbcast.lane.b32.xlu0 %v4914_v58, 264  ;;  %v934_v15 = vsel %vm933_vm6, %v912_v13, %v932_v59  ;;  %v924_v17 = vrot.slane %v891_v8, %v4980_v19  ;;  %v3874_v59 = vld [vmem:[%s6131_s1 + $0x2e] ss:$0 sm:$0xff]  ;;  %v5015_v13 = vld [vmem:[%s6131_s1 + $0x3e] ss:$0 sm:$0xff] }
 0x3ab   :  { %v4971_v54 = vpop.permute.xlu0 %2450 }
 0x3ac   :  { %6281 = vst [vmem:[#allocation137_spill] sm:$0xff] %v4971_v54  ;;  %v885_v0 = vpop.permute.xlu1 %884 }
 0x3ad   :  { %2784 = vbcast.lane.b32.xlu0 %v4914_v58, 280  ;;  %v916_v16 = vrot.slane %v885_v0, %v4980_v19 }
 0x3af   :  { %v4984_v33 = vpop.permute.xlu0 %2461  ;;  %v936_v43 = vsel %vm935_vm7, %v916_v16, %v934_v15 }
 0x3b0   :  { %6283 = vst [vmem:[#allocation139_spill] sm:$0xff] %v4984_v33 }
 0x3b1   :  { %2939 = vbcast.lane.b32.xlu0 %v4925_v24, 264 }
 0x3b5   :  { %2947 = vbcast.lane.b32.xlu0 %v4925_v24, 280 }
 0x3b9   :  { %2958 = vbcast.lane.b32.xlu0 %v4940_v42, 264 }
 0x3bd   :  { %2966 = vbcast.lane.b32.xlu0 %v4940_v42, 280 }
 0x3c1   :  { %2977 = vbcast.lane.b32.xlu0 %v4951_v45, 264 }
 0x3c5   :  { %2985 = vbcast.lane.b32.xlu0 %v4951_v45, 280 }
 0x3c9   :  { %2996 = vbcast.lane.b32.xlu0 %v4962_v48, 264 }
 0x3cd   :  { %3004 = vbcast.lane.b32.xlu0 %v4962_v48, 280 }
 0x3d1   :  { %3015 = vbcast.lane.b32.xlu0 %v4976_v26, 264 }
 0x3d5   :  { %3023 = vbcast.lane.b32.xlu0 %v4976_v26, 280 }
 0x3d8   :  { %v894_v4 = vpop.permute.xlu0 %893 }
 0x3d9   :  { %v928_v63 = vrot.slane %v894_v4, %v4980_v19  ;;  %3034 = vbcast.lane.b32.xlu0 %v3874_v59, 264  ;;  %v3875_v4 = vld [vmem:[%s6131_s1 + $0x36] ss:$0 sm:$0xff] }
 0x3dc   :  { %v888_v33 = vpop.permute.xlu0 %887 }
 0x3dd   :  { %v920_v54 = vrot.slane %v888_v33, %v4980_v19  ;;  %3042 = vbcast.lane.b32.xlu0 %v3874_v59, 280 }
 0x3df   :  { %v938_v51 = vsel %vm937_vm8, %v920_v54, %v936_v43  ;;  %v5024_v54 = vpop.permute.xlu1 %2389 }
 0x3e0   :  { %v940_v0 = vsel %vm939_vm9, %v924_v17, %v938_v51  ;;  %6284 = vst [vmem:[#allocation140_spill] sm:$0xff] %v5024_v54 }
 0x3e1   :  { %v942_v25 = vsel %vm941_vm10, %v928_v63, %v940_v0  ;;  %3053 = vbcast.lane.b32.xlu0 %v3875_v4, 264 }
 0x3e2   :  { %v945_v47 = vsel %vm944_vm11, %v942_v25, -inf  ;;  %v5086_v25 = vld [vmem:[%s6131_s1 + $0x7] ss:$0 sm:$0xff] }
 0x3e3   :  { %946 = vmax.xlane.f32.xlu1 %v945_v47  ;;  %v5027_v8 = vpop.permute.xlu1 %2400 }
 0x3e4   :  { %6285 = vst [vmem:[#allocation141_spill] sm:$0xff] %v5027_v8 }
 0x3e5   :  { %3061 = vbcast.lane.b32.xlu0 %v3875_v4, 280 }
 0x3e9   :  { %3072 = vbcast.lane.b32.xlu0 %v5015_v13, 264 }
 0x3f4   :  { %2666 = vbcast.lane.b32.xlu1 %v4859_v46, 272  ;;  %v5031_v46 = vpop.permute.xlu1 %2408 }
 0x3f5   :  { %6286 = vst [vmem:[#allocation142_spill] sm:$0xff] %v5031_v46 }
 0x3f8   :  { %2677 = vbcast.lane.b32.xlu1 %v4877_v49, 256 }
 0x3fc   :  { %2685 = vbcast.lane.b32.xlu1 %v4877_v49, 272  ;;  %v5034_v49 = vpop.permute.xlu1 %2419 }
 0x3fd   :  { %6287 = vst [vmem:[#allocation143_spill] sm:$0xff] %v5034_v49  ;;  %v5104_v49 = vld [vmem:[%s6131_s1 + $0xf] ss:$0 sm:$0xff] }
 0x400   :  { %2696 = vbcast.lane.b32.xlu1 %v4884_v37, 256 }
 0x404   :  { %2704 = vbcast.lane.b32.xlu1 %v4884_v37, 272  ;;  %v5038_v37 = vpop.permute.xlu1 %2427 }
 0x405   :  { %6288 = vst [vmem:[#allocation144_spill] sm:$0xff] %v5038_v37 }
 0x408   :  { %2715 = vbcast.lane.b32.xlu1 %v4891_v53, 256 }
 0x40c   :  { %2723 = vbcast.lane.b32.xlu1 %v4891_v53, 272  ;;  %v5040_v53 = vpop.permute.xlu0 %2469 }
 0x40d   :  { %6289 = vst [vmem:[#allocation145_spill] sm:$0xff] %v5040_v53 }
 0x410   :  { %2734 = vbcast.lane.b32.xlu1 %v4898_v21, 256 }
 0x414   :  { %2742 = vbcast.lane.b32.xlu1 %v4898_v21, 272  ;;  %v5043_v21 = vpop.permute.xlu1 %2438 }
 0x418   :  { %2753 = vbcast.lane.b32.xlu1 %v4905_v27, 256 }
 0x41c   :  { %2761 = vbcast.lane.b32.xlu1 %v4905_v27, 272  ;;  %v5045_v27 = vpop.permute.xlu0 %2480 }
 0x41d   :  { %6290 = vst [vmem:[#allocation146_spill] sm:$0xff] %v5045_v27 }
 0x420   :  { %2772 = vbcast.lane.b32.xlu1 %v4914_v58, 256  ;;  %v5051_v33 = vpop.permute.xlu0 %2488 }
 0x421   :  { %6291 = vst [vmem:[#allocation147_spill] sm:$0xff] %v5051_v33 }
 0x424   :  { %2780 = vbcast.lane.b32.xlu1 %v4914_v58, 272  ;;  %v5049_v58 = vpop.permute.xlu1 %2446  ;;  %v5056_v16 = vpop.permute.xlu0 %2643 }
 0x425   :  { %6292 = vst [vmem:[#allocation148_spill] sm:$0xff] %v5056_v16 }
 0x428   :  { %2935 = vbcast.lane.b32.xlu1 %v4925_v24, 256  ;;  %v5062_v15 = vpop.permute.xlu0 %2651 }
 0x429   :  { %6294 = vst [vmem:[#allocation150_spill] sm:$0xff] %v5062_v15 }
 0x42c   :  { %2943 = vbcast.lane.b32.xlu1 %v4925_v24, 272  ;;  %v5054_v24 = vpop.permute.xlu1 %2457  ;;  %v5067_v17 = vpop.permute.xlu0 %2662 }
 0x42d   :  { %6296 = vst [vmem:[#allocation152_spill] sm:$0xff] %v5067_v17 }
 0x430   :  { %2954 = vbcast.lane.b32.xlu1 %v4940_v42, 256  ;;  %v5071_v63 = vpop.permute.xlu0 %2670 }
 0x431   :  { %6298 = vst [vmem:[#allocation154_spill] sm:$0xff] %v5071_v63 }
 0x434   :  { %2962 = vbcast.lane.b32.xlu1 %v4940_v42, 272  ;;  %v5060_v42 = vpop.permute.xlu1 %2465  ;;  %v5075_v51 = vpop.permute.xlu0 %2681 }
 0x435   :  { %6293 = vst [vmem:[#allocation149_spill] sm:$0xff] %v5060_v42  ;;  %6300 = vst [vmem:[#allocation156_spill] sm:$0xff] %v5075_v51 }
 0x438   :  { %2973 = vbcast.lane.b32.xlu1 %v4951_v45, 256 }
 0x43c   :  { %2981 = vbcast.lane.b32.xlu1 %v4951_v45, 272  ;;  %v5065_v45 = vpop.permute.xlu1 %2476 }
 0x43d   :  { %6295 = vst [vmem:[#allocation151_spill] sm:$0xff] %v5065_v45 }
 0x440   :  { %2992 = vbcast.lane.b32.xlu1 %v4962_v48, 256  ;;  %v5069_v43 = vpop.permute.xlu1 %2484 }
 0x441   :  { %6297 = vst [vmem:[#allocation153_spill] sm:$0xff] %v5069_v43 }
 0x444   :  { %3000 = vbcast.lane.b32.xlu1 %v4962_v48, 272  ;;  %v5073_v48 = vpop.permute.xlu1 %2639 }
 0x445   :  { %6299 = vst [vmem:[#allocation155_spill] sm:$0xff] %v5073_v48 }
 0x448   :  { %3011 = vbcast.lane.b32.xlu1 %v4976_v26, 256  ;;  %v5078_v0 = vpop.permute.xlu1 %2647 }
 0x449   :  { %6301 = vst [vmem:[#allocation157_spill] sm:$0xff] %v5078_v0 }
 0x44c   :  { %3019 = vbcast.lane.b32.xlu1 %v4976_v26, 272  ;;  %v5080_v26 = vpop.permute.xlu0 %2689  ;;  %v5088_v47 = vpop.permute.xlu1 %2658 }
 0x44d   :  { %6302 = vst [vmem:[#allocation158_spill] sm:$0xff] %v5080_v26  ;;  %6303 = vst [vmem:[#allocation159_spill] sm:$0xff] %v5088_v47 }
 0x450   :  { %3030 = vbcast.lane.b32.xlu1 %v3874_v59, 256 }
 0x454   :  { %3038 = vbcast.lane.b32.xlu1 %v3874_v59, 272  ;;  %v5090_v59 = vpop.permute.xlu0 %2700 }
 0x455   :  { %6304 = vst [vmem:[#allocation160_spill] sm:$0xff] %v5090_v59 }
 0x458   :  { %3049 = vbcast.lane.b32.xlu1 %v3875_v4, 256  ;;  %v5096_v53 = vpop.permute.xlu0 %2708 }
 0x459   :  { %6305 = vst [vmem:[#allocation161_spill] sm:$0xff] %v5096_v53 }
 0x45c   :  { %3057 = vbcast.lane.b32.xlu1 %v3875_v4, 272  ;;  %v5109_v54 = vpop.permute.xlu0 %2719 }
 0x45d   :  { %6306 = vst [vmem:[#allocation162_spill] sm:$0xff] %v5109_v54 }
 0x460   :  { %3068 = vbcast.lane.b32.xlu1 %v5015_v13, 256 }
 0x464   :  { %3076 = vbcast.lane.b32.xlu1 %v5015_v13, 272 }
 0x468   :  { %3231 = vbcast.lane.b32.xlu1 %v5086_v25, 256 }
 0x46c   :  { %v947_v4 = vpop.xlane.xlu1 %946  ;;  %3239 = vbcast.lane.b32.xlu1 %v5086_v25, 272 }
 0x46d   :  { %v952_v33 = vrot.slane %v947_v4, %v4235_v9  ;;  %v956_v43 = vrot.slane %v947_v4, %v4333_v10  ;;  %v960_v27 = vrot.slane %v947_v4, %v4307_v60  ;;  %v964_v8 = vrot.slane %v947_v4, %v4312_v62 }
 0x46f   :  { %v989_v45 = vsub.f32 %v4807_v2, %v952_v33  ;;  %v990_v37 = vsub.f32 %v4810_v14, %v956_v43  ;;  %v991_v59 = vsub.f32 %v4803_v11, %v960_v27  ;;  %v968_v2 = vrot.slane %v947_v4, %v4358_v18  ;;  %v5120_v11 = vpop.permute.xlu0 %2727  ;;  %v3880_v43 = vld [vmem:[%s6131_s1 + $0x1f] ss:$0 sm:$0xff] }
 0x470   :  { %3250 = vbcast.lane.b32.xlu1 %v5104_v49, 256  ;;  %v992_v14 = vsub.f32 %v4814_v32, %v964_v8  ;;  %6307 = vst [vmem:[#allocation163_spill] sm:$0xff] %v5120_v11  ;;  %v976_v32 = vrot.slane %v947_v4, %v4365_v40  ;;  %v5222_v17 = vpop.permute.xlu1 %2666 }
 0x471   :  { %v997_v46 = vmul.f32 1.442695, %v989_v45  ;;  %v999_v53 = vmul.f32 1.442695, %v990_v37  ;;  %v1001_v33 = vmul.f32 1.442695, %v991_v59  ;;  %v993_v37 = vsub.f32 %v4823_v30, %v968_v2 }
 0x472   :  { %v5117_v45 = vld [vmem:[%s6131_s1 + $0x17] ss:$0 sm:$0xff]  ;;  %v1003_v27 = vmul.f32 1.442695, %v992_v14  ;;  %v980_v30 = vrot.slane %v947_v4, %v4322_v3  ;;  %v995_v2 = vsub.f32 %v4818_v12, %v976_v32  ;;  %6324 = vst [vmem:[#allocation180_spill] sm:$0xff] %v5222_v17 }
 0x473   :  { %4072 = vpow2.f32 %v997_v46  ;;  %v972_v46 = vrot.slane %v947_v4, %v4317_v1  ;;  %v5132_v11 = vpop.permute.xlu0 %2738 }
 0x474   :  { %3258 = vbcast.lane.b32.xlu1 %v5104_v49, 272  ;;  %4074 = vpow2.f32 %v999_v53  ;;  %v1005_v53 = vmul.f32 1.442695, %v993_v37  ;;  %v1009_v37 = vmul.f32 1.442695, %v995_v2 }
 0x475   :  { %4076 = vpow2.f32 %v1001_v33  ;;  %v994_v8 = vsub.f32 %v4869_v34, %v972_v46  ;;  %v996_v46 = vsub.f32 %v4865_v52, %v980_v30 }
 0x476   :  { %4078 = vpow2.f32 %v1003_v27  ;;  %v3881_v27 = vld [vmem:[%s6131_s1 + $0x27] ss:$0 sm:$0xff] }
 0x477   :  { %4080 = vpow2.f32 %v1005_v53  ;;  %v1007_v14 = vmul.f32 1.442695, %v994_v8  ;;  %v5140_v33 = vpop.permute.xlu0 %2746  ;;  %v1011_v12 = vmul.f32 1.442695, %v996_v46 }
 0x478   :  { %3269 = vbcast.lane.b32.xlu1 %v5117_v45, 256 }
 0x479   :  { %4082 = vpow2.f32 %v1007_v14 }
 0x47a   :  { %4084 = vpow2.f32 %v1009_v37  ;;  %v5173_v37 = vld [vmem:[%s6131_s1 + $0x2f] ss:$0 sm:$0xff] }
 0x47b   :  { %v5151_v8 = vpop.permute.xlu0 %2757  ;;  %4086 = vpow2.f32 %v1011_v12 }
 0x47c   :  { %3277 = vbcast.lane.b32.xlu1 %v5117_v45, 272  ;;  %6308 = vst [vmem:[#allocation164_spill] sm:$0xff] %v5151_v8 }
 0x47f   :  { %v5157_v53 = vpop.permute.xlu0 %2765 }
 0x480   :  { %v5130_v59 = vpop.eup %4072  ;;  %3288 = vbcast.lane.b32.xlu1 %v3880_v43, 256  ;;  %6309 = vst [vmem:[#allocation165_spill] sm:$0xff] %v5157_v53 }
 0x481   :  { %1022 = vperm.xlu0 %3994, %v5130_v59   ;;  %v5137_v34 = vpop.eup %4074 }
 0x482   :  { %v5146_v4 = vpop.eup %4076 }
 0x483   :  { %v5149_v32 = vpop.eup %4078  ;;  %v5164_v14 = vpop.permute.xlu0 %2776 }
 0x484   :  { %3296 = vbcast.lane.b32.xlu1 %v3880_v43, 272  ;;  %v5154_v52 = vpop.eup %4080  ;;  %6310 = vst [vmem:[#allocation166_spill] sm:$0xff] %v5164_v14 }
 0x485   :  { %1025 = vperm.xlu0 %3994, %v5137_v34  }
 0x486   :  { %v5159_v30 = vpop.eup %4082 }
 0x487   :  { %v5162_v2 = vpop.eup %4084  ;;  %v5175_v12 = vpop.permute.xlu0 %2784 }
 0x488   :  { %3307 = vbcast.lane.b32.xlu1 %v3881_v27, 256  ;;  %v5167_v46 = vpop.eup %4086  ;;  %6311 = vst [vmem:[#allocation167_spill] sm:$0xff] %v5175_v12 }
 0x489   :  { %1028 = vperm.xlu0 %3994, %v5146_v4  }
 0x48b   :  { %v5180_v53 = vpop.permute.xlu0 %2939 }
 0x48c   :  { %3315 = vbcast.lane.b32.xlu1 %v3881_v27, 272  ;;  %6312 = vst [vmem:[#allocation168_spill] sm:$0xff] %v5180_v53 }
 0x48d   :  { %1031 = vperm.xlu0 %3994, %v5149_v32  }
 0x48f   :  { %v5184_v14 = vpop.permute.xlu0 %2947 }
 0x490   :  { %3326 = vbcast.lane.b32.xlu1 %v5173_v37, 256  ;;  %6313 = vst [vmem:[#allocation169_spill] sm:$0xff] %v5184_v14 }
 0x491   :  { %1034 = vperm.xlu0 %3994, %v5154_v52  }
 0x493   :  { %v5187_v54 = vpop.permute.xlu0 %2958 }
 0x494   :  { %3334 = vbcast.lane.b32.xlu1 %v5173_v37, 272  ;;  %6314 = vst [vmem:[#allocation170_spill] sm:$0xff] %v5187_v54 }
 0x495   :  { %1037 = vperm.xlu0 %3994, %v5159_v30  }
 0x497   :  { %v5197_v12 = vpop.permute.xlu0 %2966 }
 0x498   :  { %6315 = vst [vmem:[#allocation171_spill] sm:$0xff] %v5197_v12 }
 0x499   :  { %1040 = vperm.xlu0 %3994, %v5162_v2  }
 0x49d   :  { %1043 = vperm.xlu0 %3994, %v5167_v46  }
 0x4a1   :  { %3080 = vbcast.lane.b32.xlu0 %v5015_v13, 280  ;;  %v5193_v13 = vld [vmem:[%s6131_s1 + $0x37] ss:$0 sm:$0xff] }
 0x4a2   :  { %3345 = vbcast.lane.b32.xlu1 %v5193_v13, 256 }
 0x4a5   :  { %3235 = vbcast.lane.b32.xlu0 %v5086_v25, 264 }
 0x4a6   :  { %3353 = vbcast.lane.b32.xlu1 %v5193_v13, 272 }
 0x4a9   :  { %3243 = vbcast.lane.b32.xlu0 %v5086_v25, 280  ;;  %v3884_v25 = vld [vmem:[%s6131_s1 + $0x3f] ss:$0 sm:$0xff]  ;;  %s4167_s1 = smov [#allocation7]  }
 0x4aa   :  { %3364 = vbcast.lane.b32.xlu1 %v3884_v25, 256  ;;  %s3775_s26 = sshll.u32 %s4167_s1, 4  ;;  %s3776_s26 = int_to_ptr.vmem [resolvable:$true] %s3775_s26 }
 0x4ab   :  { %s4130_s27 = scalar_lea.vmem %s3776_s26, 128  ;;  %p4135_p11 = scmp.lt.s32.totalorder %s3776_s26, %s3776_s26 }
 0x4ac   :  { %p4131_p10 = scmp.ne.s32.totalorder %s3776_s26, %s4130_s27  ;;  %p4136_p12 = scmp.lt.s32.totalorder %s4130_s27, %s4130_s27 }
 0x4ad   :  { %3254 = vbcast.lane.b32.xlu0 %v5104_v49, 264 }
 0x4ae   :  { %3372 = vbcast.lane.b32.xlu1 %v3884_v25, 272  ;;  %p4137_p13 = por %p4136_p12, %p4135_p11 }
 0x4b0   :  { %p4138_p0 = pnand %p4137_p13, %p4131_p10 }
 0x4b1   :  { %3262 = vbcast.lane.b32.xlu0 %v5104_v49, 280  ;;  %v5204_v49 = vpop.permute.xlu0 %2977 }
 0x4b2   :  { %6316 = vst [vmem:[#allocation172_spill] sm:$0xff] %v5204_v49 }
 0x4b5   :  { %3273 = vbcast.lane.b32.xlu0 %v5117_v45, 264  ;;  %v5206_v26 = vpop.permute.xlu0 %2985 }
 0x4b6   :  { %6317 = vst [vmem:[#allocation173_spill] sm:$0xff] %v5206_v26  ;;  %v5226_v26 = vpop.permute.xlu1 %2677 }
 0x4b7   :  { %6326 = vst [vmem:[#allocation182_spill] sm:$0xff] %v5226_v26 }
 0x4b9   :  { %3281 = vbcast.lane.b32.xlu0 %v5117_v45, 280  ;;  %v5208_v51 = vpop.permute.xlu0 %2996 }
 0x4ba   :  { %6318 = vst [vmem:[#allocation174_spill] sm:$0xff] %v5208_v51 }
 0x4bd   :  { %3292 = vbcast.lane.b32.xlu0 %v3880_v43, 264  ;;  %v5210_v12 = vpop.permute.xlu0 %3004 }
 0x4be   :  { %6319 = vst [vmem:[#allocation175_spill] sm:$0xff] %v5210_v12 }
 0x4c1   :  { %3300 = vbcast.lane.b32.xlu0 %v3880_v43, 280  ;;  %v5212_v63 = vpop.permute.xlu0 %3015 }
 0x4c2   :  { %6320 = vst [vmem:[#allocation176_spill] sm:$0xff] %v5212_v63 }
 0x4c5   :  { %3311 = vbcast.lane.b32.xlu0 %v3881_v27, 264  ;;  %v5214_v45 = vpop.permute.xlu0 %3023 }
 0x4c6   :  { %6321 = vst [vmem:[#allocation177_spill] sm:$0xff] %v5214_v45 }
 0x4c9   :  { %3319 = vbcast.lane.b32.xlu0 %v3881_v27, 280  ;;  %v5216_v47 = vpop.permute.xlu0 %3034  ;;  %v5230_v27 = vpop.permute.xlu1 %2685 }
 0x4ca   :  { %6328 = vst [vmem:[#allocation184_spill] sm:$0xff] %v5230_v27 }
 0x4cd   :  { %v5218_v54 = vpop.permute.xlu0 %3042  ;;  %v5232_v0 = vpop.permute.xlu1 %2696 }
 0x4ce   :  { %6322 = vst [vmem:[#allocation178_spill] sm:$0xff] %v5218_v54  ;;  %6329 = vst [vmem:[#allocation185_spill] sm:$0xff] %v5232_v0 }
 0x4d1   :  { %v5220_v49 = vpop.permute.xlu0 %3053  ;;  %v5234_v14 = vpop.permute.xlu1 %2704 }
 0x4d2   :  { %6323 = vst [vmem:[#allocation179_spill] sm:$0xff] %v5220_v49  ;;  %6330 = vst [vmem:[#allocation186_spill] sm:$0xff] %v5234_v14 }
 0x4d5   :  { %v5224_v43 = vpop.permute.xlu0 %3061  ;;  %v5236_v49 = vpop.permute.xlu1 %2715 }
 0x4d6   :  { %6325 = vst [vmem:[#allocation181_spill] sm:$0xff] %v5224_v43  ;;  %6331 = vst [vmem:[#allocation187_spill] sm:$0xff] %v5236_v49 }
 0x4d9   :  { %v5228_v51 = vpop.permute.xlu0 %3072  ;;  %v5242_v53 = vpop.permute.xlu1 %2723 }
 0x4da   :  { %6327 = vst [vmem:[#allocation183_spill] sm:$0xff] %v5228_v51  ;;  %6332 = vst [vmem:[#allocation188_spill] sm:$0xff] %v5242_v53 }
 0x4dd   :  { %v5253_v54 = vpop.permute.xlu1 %2734 }
 0x4fc   :  { %v1023_v12 = vpop.permute.xlu0 %1022 }
 0x4fd   :  { %v1048_v51 = vrot.slane %v1023_v12, %v4980_v19 }
 0x500   :  { %v1026_v63 = vpop.permute.xlu0 %1025 }
 0x501   :  { %v1052_v43 = vrot.slane %v1026_v63, %v4980_v19 }
 0x503   :  { %v1077_v14 = vsel %vm929_vm4, %v1052_v43, %v1048_v51 }
 0x504   :  { %v1029_v45 = vpop.permute.xlu0 %1028 }
 0x505   :  { %v1056_v26 = vrot.slane %v1029_v45, %v4980_v19 }
 0x507   :  { %v1078_v49 = vsel %vm931_vm5, %v1056_v26, %v1077_v14  ;;  %v5258_v26 = vpop.permute.xlu1 %2742 }
 0x508   :  { %v1032_v15 = vpop.permute.xlu0 %1031 }
 0x509   :  { %v1060_v27 = vrot.slane %v1032_v15, %v4980_v19 }
 0x50b   :  { %v1079_v63 = vsel %vm933_vm6, %v1060_v27, %v1078_v49 }
 0x50c   :  { %v1035_v48 = vpop.permute.xlu0 %1034 }
 0x50d   :  { %v1064_v0 = vrot.slane %v1035_v48, %v4980_v19 }
 0x50f   :  { %v1080_v45 = vsel %vm935_vm7, %v1064_v0, %v1079_v63 }
 0x510   :  { %v1038_v17 = vpop.permute.xlu0 %1037 }
 0x511   :  { %v1068_v42 = vrot.slane %v1038_v17, %v4980_v19 }
 0x513   :  { %v1081_v15 = vsel %vm937_vm8, %v1068_v42, %v1080_v45 }
 0x514   :  { %v1041_v16 = vpop.permute.xlu0 %1040 }
 0x515   :  { %v1072_v8 = vrot.slane %v1041_v16, %v4980_v19  ;;  %v5260_v16 = vpop.permute.xlu1 %2753 }
 0x517   :  { %v1082_v48 = vsel %vm939_vm9, %v1072_v8, %v1081_v15 }
 0x518   :  { %v1044_v12 = vpop.permute.xlu0 %1043 }
 0x519   :  { %v1076_v53 = vrot.slane %v1044_v12, %v4980_v19  ;;  %v5262_v14 = vpop.permute.xlu1 %2761 }
 0x51a   :  { %6333 = vst [vmem:[#allocation189_spill] sm:$0xff] %v5262_v14 }
 0x51b   :  { %v1083_v51 = vsel %vm941_vm10, %v1076_v53, %v1082_v48 }
 0x51c   :  { %v1085_v17 = vsel %vm944_vm11, %v1083_v51, 0.0  ;;  %v5288_v12 = vpop.permute.xlu0 %3080 }
 0x51d   :  { %1086 = vadd.xlane.f32.xlu0 %v1085_v17  ;;  %v5264_v0 = vpop.permute.xlu1 %2772  ;;  %6344 = vst [vmem:[#allocation200_spill] sm:$0xff] %v5288_v12 }
 0x51e   :  { %6334 = vst [vmem:[#allocation190_spill] sm:$0xff] %v5264_v0 }
 0x521   :  { %v5267_v42 = vpop.permute.xlu1 %2780 }
 0x522   :  { %6335 = vst [vmem:[#allocation191_spill] sm:$0xff] %v5267_v42 }
 0x525   :  { %v5271_v8 = vpop.permute.xlu1 %2935 }
 0x526   :  { %6336 = vst [vmem:[#allocation192_spill] sm:$0xff] %v5271_v8 }
 0x529   :  { %v5274_v53 = vpop.permute.xlu1 %2943 }
 0x52a   :  { %6337 = vst [vmem:[#allocation193_spill] sm:$0xff] %v5274_v53 }
 0x52d   :  { %v5276_v49 = vpop.permute.xlu1 %2954 }
 0x52e   :  { %6338 = vst [vmem:[#allocation194_spill] sm:$0xff] %v5276_v49 }
 0x531   :  { %v5278_v43 = vpop.permute.xlu1 %2962 }
 0x532   :  { %6339 = vst [vmem:[#allocation195_spill] sm:$0xff] %v5278_v43 }
 0x533   :  { %3330 = vbcast.lane.b32.xlu0 %v5173_v37, 264 }
 0x535   :  { %v5280_v27 = vpop.permute.xlu1 %2973 }
 0x536   :  { %6340 = vst [vmem:[#allocation196_spill] sm:$0xff] %v5280_v27 }
 0x537   :  { %3338 = vbcast.lane.b32.xlu0 %v5173_v37, 280 }
 0x539   :  { %v5282_v63 = vpop.permute.xlu1 %2981 }
 0x53a   :  { %6341 = vst [vmem:[#allocation197_spill] sm:$0xff] %v5282_v63 }
 0x53b   :  { %3349 = vbcast.lane.b32.xlu0 %v5193_v13, 264 }
 0x53d   :  { %v5284_v45 = vpop.permute.xlu1 %2992 }
 0x53e   :  { %6342 = vst [vmem:[#allocation198_spill] sm:$0xff] %v5284_v45 }
 0x53f   :  { %3357 = vbcast.lane.b32.xlu0 %v5193_v13, 280  ;;  %v5292_v13 = vpop.permute.xlu0 %3235 }
 0x540   :  { %6346 = vst [vmem:[#allocation202_spill] sm:$0xff] %v5292_v13 }
 0x541   :  { %v5286_v37 = vpop.permute.xlu1 %3000 }
 0x542   :  { %6343 = vst [vmem:[#allocation199_spill] sm:$0xff] %v5286_v37 }
 0x543   :  { %3368 = vbcast.lane.b32.xlu0 %v3884_v25, 264 }
 0x545   :  { %v5290_v15 = vpop.permute.xlu1 %3011 }
 0x546   :  { %6345 = vst [vmem:[#allocation201_spill] sm:$0xff] %v5290_v15 }
 0x547   :  { %3376 = vbcast.lane.b32.xlu0 %v3884_v25, 280  ;;  %v5296_v25 = vpop.permute.xlu0 %3243 }
 0x548   :  { %6348 = vst [vmem:[#allocation204_spill] sm:$0xff] %v5296_v25 }
 0x549   :  { %v5294_v48 = vpop.permute.xlu1 %3019 }
 0x54a   :  { %6347 = vst [vmem:[#allocation203_spill] sm:$0xff] %v5294_v48 }
 0x54b   :  { %v5300_v17 = vpop.permute.xlu0 %3254 }
 0x54c   :  { %6349 = vst [vmem:[#allocation205_spill] sm:$0xff] %v5300_v17 }
 0x54d   :  { %v5298_v51 = vpop.permute.xlu1 %3030 }
 0x54f   :  { %v5304_v42 = vpop.permute.xlu0 %3262 }
 0x550   :  { %6350 = vst [vmem:[#allocation206_spill] sm:$0xff] %v5304_v42 }
 0x551   :  { %v5302_v19 = vpop.permute.xlu1 %3038 }
 0x553   :  { %v5308_v14 = vpop.permute.xlu0 %3273 }
 0x554   :  { %6351 = vst [vmem:[#allocation207_spill] sm:$0xff] %v5308_v14 }
 0x555   :  { %v5306_v0 = vpop.permute.xlu1 %3049 }
 0x557   :  { %v5312_v15 = vpop.permute.xlu0 %3281 }
 0x558   :  { %6353 = vst [vmem:[#allocation209_spill] sm:$0xff] %v5312_v15 }
 0x559   :  { %v5310_v12 = vpop.permute.xlu1 %3057 }
 0x55a   :  { %6352 = vst [vmem:[#allocation208_spill] sm:$0xff] %v5310_v12 }
 0x55b   :  { %v5316_v48 = vpop.permute.xlu0 %3292 }
 0x55c   :  { %6355 = vst [vmem:[#allocation211_spill] sm:$0xff] %v5316_v48 }
 0x55d   :  { %v5314_v37 = vpop.permute.xlu1 %3068 }
 0x55e   :  { %6354 = vst [vmem:[#allocation210_spill] sm:$0xff] %v5314_v37 }
 0x55f   :  { %v5320_v63 = vpop.permute.xlu0 %3300 }
 0x560   :  { %6357 = vst [vmem:[#allocation213_spill] sm:$0xff] %v5320_v63 }
 0x561   :  { %v5318_v45 = vpop.permute.xlu1 %3076 }
 0x562   :  { %6356 = vst [vmem:[#allocation212_spill] sm:$0xff] %v5318_v45 }
 0x563   :  { %v5324_v43 = vpop.permute.xlu0 %3311 }
 0x564   :  { %6359 = vst [vmem:[#allocation215_spill] sm:$0xff] %v5324_v43 }
 0x565   :  { %v5322_v27 = vpop.permute.xlu1 %3231 }
 0x566   :  { %6358 = vst [vmem:[#allocation214_spill] sm:$0xff] %v5322_v27 }
 0x567   :  { %v5328_v49 = vpop.permute.xlu0 %3319 }
 0x568   :  { %6361 = vst [vmem:[#allocation217_spill] sm:$0xff] %v5328_v49 }
 0x569   :  { %v5326_v42 = vpop.permute.xlu1 %3239 }
 0x56a   :  { %6360 = vst [vmem:[#allocation216_spill] sm:$0xff] %v5326_v42 }
 0x56d   :  { %v5330_v14 = vpop.permute.xlu1 %3250 }
 0x56e   :  { %6362 = vst [vmem:[#allocation218_spill] sm:$0xff] %v5330_v14 }
 0x571   :  { %v5332_v15 = vpop.permute.xlu1 %3258 }
 0x572   :  { %6363 = vst [vmem:[#allocation219_spill] sm:$0xff] %v5332_v15 }
 0x575   :  { %v5334_v37 = vpop.permute.xlu1 %3269 }
 0x576   :  { %6364 = vst [vmem:[#allocation220_spill] sm:$0xff] %v5334_v37 }
 0x579   :  { %v5338_v45 = vpop.permute.xlu1 %3277 }
 0x57a   :  { %6365 = vst [vmem:[#allocation221_spill] sm:$0xff] %v5338_v45 }
 0x57d   :  { %v5342_v43 = vpop.permute.xlu1 %3288 }
 0x57e   :  { %6366 = vst [vmem:[#allocation222_spill] sm:$0xff] %v5342_v43 }
 0x581   :  { %v5351_v15 = vpop.permute.xlu1 %3296 }
 0x582   :  { %6367 = vst [vmem:[#allocation223_spill] sm:$0xff] %v5351_v15 }
 0x585   :  { %v5366_v25 = vpop.permute.xlu1 %3307 }
 0x5a6   :  { %v1087_v12 = vpop.xlane.xlu0 %1086 }
 0x5a7   :  { %4088 = vrcp.f32 %v1087_v12 }
 0x5b4   :  { %v5336_v48 = vpop.eup %4088 }
 0x5b5   :  { %v1113_v63 = vrot.slane %v5336_v48, %v4317_v1  ;;  %v1117_v37 = vrot.slane %v5336_v48, %v4365_v40 }
 0x5b7   :  { %v5345_v17 = vmul.f32 %v5159_v30, %v1113_v63  ;;  %v5364_v15 = vmul.f32 %v5162_v2, %v1117_v37  ;;  %v1093_v37 = vrot.slane %v5336_v48, %v4235_v9 }
 0x5b9   :  { %v1169_v49 = vrot.slane %v5345_v17, %v4235_v9  ;;  %v1433_v12 = vrot.slane %v5345_v17, %v4333_v10  ;;  %v1729_v63 = vrot.slane %v5345_v17, %v4307_v60  ;;  %v5380_v2 = vrot.slane %v5364_v15, %v4333_v10 }
 0x5bb   :  { %v1390_v45 = vmul.f32 %v4553_v35, %v1169_v49  ;;  %v1654_v14 = vmul.f32 %v4627_v23, %v1433_v12  ;;  %v1391_v43 = vmul.f32 %v4548_v31, %v1169_v49  ;;  %v1655_v30 = vmul.f32 %v4625_v28, %v1433_v12 }
 0x5bc   :  { %v1392_v42 = vmul.f32 %v4557_v38, %v1169_v49  ;;  %v1656_v53 = vmul.f32 %v4631_v20, %v1433_v12  ;;  %v1950_v23 = vmul.f32 %v4705_v29, %v1729_v63  ;;  %v2025_v31 = vrot.slane %v5345_v17, %v4312_v62 }
 0x5bd   :  { %v1686_v27 = vadd.f32 %v1654_v14, %v1390_v45  ;;  %v1687_v35 = vadd.f32 %v1655_v30, %v1391_v43  ;;  %v1951_v28 = vmul.f32 %v4701_v41, %v1729_v63  ;;  %v1393_v13 = vmul.f32 %v4555_v36, %v1169_v49 }
 0x5be   :  { %v1688_v8 = vadd.f32 %v1656_v53, %v1392_v42  ;;  %v1657_v38 = vmul.f32 %v4629_v44, %v1433_v12  ;;  %v5376_v20 = vrot.slane %v5364_v15, %v4235_v9  ;;  %v1952_v43 = vmul.f32 %v4709_v7, %v1729_v63  ;;  %v5387_v42 = vpop.permute.xlu1 %3315 }
 0x5bf   :  { %v1982_v14 = vadd.f32 %v1950_v23, %v1686_v27  ;;  %v1983_v29 = vadd.f32 %v1951_v28, %v1687_v35  ;;  %v2321_v41 = vrot.slane %v5345_v17, %v4358_v18  ;;  %v1121_v36 = vrot.slane %v5336_v48, %v4322_v3  ;;  %6368 = vst [vmem:[#allocation224_spill] sm:$0xff] %v5387_v42 }
 0x5c0   :  { %v2246_v44 = vmul.f32 %v4784_v55, %v2025_v31  ;;  %v2247_v53 = vmul.f32 %v4782_v5, %v2025_v31  ;;  %v1984_v49 = vadd.f32 %v1952_v43, %v1688_v8  ;;  %v1689_v45 = vadd.f32 %v1657_v38, %v1393_v13 }
 0x5c1   :  { %v1394_v27 = vmul.f32 %v4564_v39, %v5376_v20  ;;  %v1658_v7 = vmul.f32 %v4635_v6, %v5380_v2  ;;  %v1097_v12 = vrot.slane %v5336_v48, %v4333_v10  ;;  %v2248_v55 = vmul.f32 %v4788_v61, %v2025_v31 }
 0x5c2   :  { %v2278_v30 = vadd.f32 %v2246_v44, %v1982_v14  ;;  %v2279_v35 = vadd.f32 %v2247_v53, %v1983_v29  ;;  %v1953_v5 = vmul.f32 %v4707_v56, %v1729_v63  ;;  %v2617_v8 = vrot.slane %v5345_v17, %v4317_v1  ;;  %v3327_v44 = vpop.permute.xlu1 %3326 }
 0x5c3   :  { %v5405_v39 = vrot.slane %v5364_v15, %v4307_v60  ;;  %v1101_v6 = vrot.slane %v5336_v48, %v4307_v60  ;;  %v1105_v13 = vrot.slane %v5336_v48, %v4312_v62  ;;  %v2542_v23 = vmul.f32 %v5043_v21, %v2321_v41 }
 0x5c4   :  { %v2543_v28 = vmul.f32 %v4964_v50, %v2321_v41  ;;  %v2280_v61 = vadd.f32 %v2248_v55, %v1984_v49  ;;  %v1985_v38 = vadd.f32 %v1953_v5, %v1689_v45  ;;  %v1690_v56 = vadd.f32 %v1658_v7, %v1394_v27 }
 0x5c5   :  { %v5414_v63 = vmul.f32 %v5167_v46, %v1121_v36  ;;  %v5417_v14 = vmul.f32 %v5130_v59, %v1093_v37  ;;  %v1109_v29 = vrot.slane %v5336_v48, %v4358_v18  ;;  %v2574_v43 = vadd.f32 %v2542_v23, %v2278_v30  ;;  %v3331_v30 = vpop.permute.xlu0 %3330 }
 0x5c6   :  { %v2575_v53 = vadd.f32 %v2543_v28, %v2279_v35  ;;  %v2544_v42 = vmul.f32 %v5049_v58, %v2321_v41  ;;  %v2249_v21 = vmul.f32 %v4786_v22, %v2025_v31  ;;  %v2913_v50 = vrot.slane %v5345_v17, %v4365_v40 }
 0x5c7   :  { %v1954_v46 = vmul.f32 %v4713_v57, %v5405_v39  ;;  %v5429_v59 = vrot.slane %v5364_v15, %v4312_v62  ;;  %v5432_v36 = vmul.f32 %v5137_v34, %v1097_v12  ;;  %v2838_v48 = vmul.f32 %v5253_v54, %v2617_v8  ;;  %v6369_v12 = vld [vmem:[#allocation137_spill] sm:$0xff] }
 0x5c8   :  { %v2839_v49 = vmul.f32 %v5132_v11, %v2617_v8  ;;  %v2576_v58 = vadd.f32 %v2544_v42, %v2280_v61  ;;  %v2281_v45 = vadd.f32 %v2249_v21, %v1985_v38  ;;  %v3209_v22 = vrot.slane %v5345_v17, %v4322_v3  ;;  %v6370_v11 = vld [vmem:[#allocation114_spill] sm:$0xff] }
 0x5c9   :  { %v1986_v31 = vadd.f32 %v1954_v46, %v1690_v56  ;;  %v5439_v27 = vmul.f32 %v5146_v4, %v1101_v6  ;;  %v5442_v57 = vmul.f32 %v5149_v32, %v1105_v13  ;;  %v2870_v7 = vadd.f32 %v2838_v48, %v2574_v43  ;;  %v6372_v4 = vld [vmem:[#allocation32_spill] sm:$0xff]  ;;  %v6373_v32 = vld [vmem:[#allocation59_spill] sm:$0xff] }
 0x5ca   :  { %v2871_v37 = vadd.f32 %v2839_v49, %v2575_v53  ;;  %v2840_v34 = vmul.f32 %v5258_v26, %v2617_v8  ;;  %v2545_v54 = vmul.f32 %v6369_v12, %v2321_v41  ;;  %v2250_v42 = vmul.f32 %v6370_v11, %v5429_v59  ;;  %v3335_v41 = vpop.permute.xlu1 %3334  ;;  %v6377_v49 = vld [vmem:[#allocation86_spill] sm:$0xff] }
 0x5cb   :  { %v5450_v17 = vrot.slane %v5364_v15, %v4358_v18  ;;  %v1395_v35 = vmul.f32 %v6372_v4, %v5376_v20  ;;  %v1659_v55 = vmul.f32 %v6373_v32, %v5380_v2  ;;  %v3134_v5 = vmul.f32 %v5298_v51, %v2913_v50 }
 0x5cc   :  { %v3135_v26 = vmul.f32 %v5216_v47, %v2913_v50  ;;  %v2872_v6 = vadd.f32 %v2840_v34, %v2576_v58  ;;  %v2577_v13 = vadd.f32 %v2545_v54, %v2281_v45  ;;  %v3430_v23 = vmul.f32 %v3327_v44, %v3209_v22  ;;  %v6382_v34 = vld [vmem:[#allocation178_spill] sm:$0xff] }
 0x5cd   :  { %6371 = vst [vmem:[#allocation137_spill] sm:$0xff] %v5450_v17  ;;  %v3136_v28 = vmul.f32 %v5302_v19, %v2913_v50  ;;  %v2282_v61 = vadd.f32 %v2250_v42, %v1986_v31  ;;  %v5460_v38 = vmul.f32 %v5154_v52, %v1109_v29  ;;  %v3166_v56 = vadd.f32 %v3134_v5, %v2870_v7  ;;  %v6379_v31 = vld [vmem:[#allocation61_spill] sm:$0xff]  ;;  %v6388_v5 = vld [vmem:[#allocation139_spill] sm:$0xff] }
 0x5ce   :  { %v3167_v43 = vadd.f32 %v3135_v26, %v2871_v37  ;;  %v2841_v53 = vmul.f32 %v5140_v33, %v2617_v8  ;;  %v5465_v21 = vrot.slane %v5364_v15, %v4317_v1  ;;  %v2546_v47 = vmul.f32 %v5054_v24, %v5450_v17  ;;  %v3339_v8 = vpop.permute.xlu0 %3338  ;;  %v6378_v24 = vld [vmem:[#allocation34_spill] sm:$0xff] }
 0x5cf   :  { %v5471_v51 = vrot.slane %v5364_v15, %v4365_v40  ;;  %v5475_v19 = vrot.slane %v5364_v15, %v4322_v3  ;;  %v1691_v52 = vadd.f32 %v1659_v55, %v1395_v35  ;;  %v3431_v29 = vmul.f32 %v3331_v30, %v3209_v22  ;;  %v3346_v30 = vpop.permute.xlu1 %3345 }
 0x5d0   :  { %6374 = vst [vmem:[#allocation114_spill] sm:$0xff] %v5465_v21  ;;  %v3168_v44 = vadd.f32 %v3136_v28, %v2872_v6  ;;  %v3432_v46 = vmul.f32 %v3335_v41, %v3209_v22  ;;  %v2873_v33 = vadd.f32 %v2841_v53, %v2577_v13  ;;  %v2578_v48 = vadd.f32 %v2546_v47, %v2282_v61  ;;  %v6391_v13 = vld [vmem:[#allocation88_spill] sm:$0xff] }
 0x5d1   :  { %6375 = vst [vmem:[#allocation32_spill] sm:$0xff] %v5471_v51  ;;  %6376 = vst [vmem:[#allocation59_spill] sm:$0xff] %v5475_v19  ;;  %v1955_v58 = vmul.f32 %v6377_v49, %v5405_v39  ;;  %v1396_v45 = vmul.f32 %v6378_v24, %v5376_v20  ;;  %v1660_v7 = vmul.f32 %v6379_v31, %v5380_v2  ;;  %v6392_v47 = vld [vmem:[#allocation116_spill] sm:$0xff] }
 0x5d2   :  { %v5483_v37 = vadd.f32 %v3430_v23, %v3166_v56  ;;  %v5485_v15 = vadd.f32 %v3431_v29, %v3167_v43  ;;  %v3137_v12 = vmul.f32 %v6382_v34, %v2913_v50  ;;  %v5488_v54 = vmul.f32 %v3339_v8, %v3209_v22  ;;  %v6387_v50 = vld [vmem:[#allocation113_spill] sm:$0xff] }
 0x5d3   :  { %v2842_v11 = vmul.f32 %v5260_v16, %v5465_v21  ;;  %v5494_v42 = vmul.f32 %v5306_v0, %v5471_v51  ;;  %v5497_v4 = vmul.f32 %v3346_v30, %v5475_v19  ;;  %v1987_v35 = vadd.f32 %v1955_v58, %v1691_v52  ;;  %v6389_v16 = vld [vmem:[#allocation164_spill] sm:$0xff]  ;;  %v6393_v29 = vld [vmem:[#allocation149_spill] sm:$0xff]  ;;  %v6397_v58 = vld [vmem:[#allocation39_spill] sm:$0xff] }
 0x5d4   :  { %6380 = vst [vmem:[#allocation86_spill] sm:$0xff] %v5483_v37  ;;  %6381 = vst [vmem:[#allocation34_spill] sm:$0xff] %v5485_v15  ;;  %v5499_v32 = vadd.f32 %v3432_v46, %v3168_v44  ;;  %v5501_v55 = vadd.f32 %v3137_v12, %v2873_v33  ;;  %v2251_v22 = vmul.f32 %v6387_v50, %v5429_v59  ;;  %v6395_v33 = vld [vmem:[#allocation33_spill] sm:$0xff]  ;;  %v6399_v12 = vld [vmem:[#allocation87_spill] sm:$0xff] }
 0x5d5   :  { %6383 = vst [vmem:[#allocation61_spill] sm:$0xff] %v5488_v54  ;;  %6384 = vst [vmem:[#allocation178_spill] sm:$0xff] %v5497_v4  ;;  %v2547_v26 = vmul.f32 %v6388_v5, %v5450_v17  ;;  %v5507_v6 = vadd.f32 %v2842_v11, %v2578_v48  ;;  %v5511_v0 = vmul.f32 %v6389_v16, %v5465_v21  ;;  %v6396_v48 = vld [vmem:[#allocation13_spill] sm:$0xff]  ;;  %v6411_v54 = vld [vmem:[#allocation94_spill] sm:$0xff] }
 0x5d6   :  { %6385 = vst [vmem:[#allocation225_spill] sm:$0xff] %v5499_v32  ;;  %6386 = vst [vmem:[#allocation226_spill] sm:$0xff] %v5501_v55  ;;  %v1692_v41 = vadd.f32 %v1660_v7, %v1396_v45  ;;  %v1956_v23 = vmul.f32 %v6391_v13, %v5405_v39  ;;  %v5517_v28 = vrot.slane %v5414_v63, %v4235_v9  ;;  %v6398_v7 = vld [vmem:[#allocation60_spill] sm:$0xff]  ;;  %v6414_v19 = vld [vmem:[#allocation41_spill] sm:$0xff] }
 0x5d7   :  { %6390 = vst [vmem:[#allocation113_spill] sm:$0xff] %v5511_v0  ;;  %v1149_v61 = vrot.slane %v5417_v14, %v4235_v9  ;;  %v1413_v56 = vrot.slane %v5417_v14, %v4333_v10  ;;  %v1709_v43 = vrot.slane %v5417_v14, %v4307_v60  ;;  %v2283_v53 = vadd.f32 %v2251_v22, %v1987_v35  ;;  %v6401_v22 = vld [vmem:[#allocation66_spill] sm:$0xff]  ;;  %v6403_v13 = vld [vmem:[#allocation12_spill] sm:$0xff] }
 0x5d8   :  { %v5527_v52 = vmul.f32 %v6392_v47, %v5429_v59  ;;  %v5531_v44 = vmul.f32 %v6393_v29, %v5450_v17  ;;  %v5535_v46 = vrot.slane %v5414_v63, %v4333_v10  ;;  %v1397_v8 = vmul.f32 %v6395_v33, %v5376_v20  ;;  %v6400_v20 = vld [vmem:[#allocation36_spill] sm:$0xff]  ;;  %v6415_v17 = vld [vmem:[#allocation202_spill] sm:$0xff] }
 0x5d9   :  { %v1371_v49 = vmul.f32 %v6396_v48, %v1149_v61  ;;  %v1635_v24 = vmul.f32 %v6397_v58, %v1413_v56  ;;  %v2005_v45 = vrot.slane %v5417_v14, %v4312_v62  ;;  %v5543_v31 = vadd.f32 %v1956_v23, %v1692_v41  ;;  %v6402_v41 = vld [vmem:[#allocation63_spill] sm:$0xff]  ;;  %v6404_v47 = vld [vmem:[#allocation40_spill] sm:$0xff]  ;;  %v6406_v58 = vld [vmem:[#allocation93_spill] sm:$0xff] }
 0x5da   :  { %6394 = vst [vmem:[#allocation139_spill] sm:$0xff] %v5531_v44  ;;  %v1661_v34 = vmul.f32 %v6398_v7, %v5380_v2  ;;  %v5549_v30 = vmul.f32 %v6399_v12, %v5405_v39  ;;  %v5553_v11 = vrot.slane %v5414_v63, %v4307_v60  ;;  %v1398_v35 = vmul.f32 %v6400_v20, %v5517_v28  ;;  %v6422_v44 = vld [vmem:[#allocation42_spill] sm:$0xff] }
 0x5db   :  { %v1667_v50 = vadd.f32 %v1635_v24, %v1371_v49  ;;  %v1931_v5 = vmul.f32 %v6401_v22, %v1709_v43  ;;  %v2301_v16 = vrot.slane %v5417_v14, %v4358_v18  ;;  %v1662_v2 = vmul.f32 %v6402_v41, %v5535_v46  ;;  %v6407_v22 = vld [vmem:[#allocation67_spill] sm:$0xff] }
 0x5dc   :  { %v2597_v39 = vrot.slane %v5417_v14, %v4317_v1  ;;  %v1370_v23 = vmul.f32 %v6403_v13, %v1149_v61  ;;  %v1634_v29 = vmul.f32 %v6404_v47, %v1413_v56  ;;  %v5566_v33 = vadd.f32 %v2547_v26, %v2283_v53  ;;  %v6408_v13 = vld [vmem:[#allocation90_spill] sm:$0xff] }
 0x5dd   :  { %v1963_v48 = vadd.f32 %v1931_v5, %v1667_v50  ;;  %v2227_v49 = vmul.f32 %v6406_v58, %v2005_v45  ;;  %v5571_v24 = vrot.slane %v5417_v14, %v4365_v40  ;;  %v5573_v7 = vadd.f32 %v1661_v34, %v1397_v8  ;;  %v6409_v5 = vld [vmem:[#allocation120_spill] sm:$0xff] }
 0x5de   :  { %6405 = vst [vmem:[#allocation164_spill] sm:$0xff] %v5566_v33  ;;  %v5577_v12 = vrot.slane %v5417_v14, %v4322_v3  ;;  %v1666_v20 = vadd.f32 %v1634_v29, %v1370_v23  ;;  %v1930_v41 = vmul.f32 %v6407_v22, %v1709_v43  ;;  %v5582_v26 = vmul.f32 %v6408_v13, %v5553_v11  ;;  %v6410_v34 = vld [vmem:[#allocation148_spill] sm:$0xff]  ;;  %v6413_v13 = vld [vmem:[#allocation15_spill] sm:$0xff]  ;;  %v6425_v33 = vld [vmem:[#allocation150_spill] sm:$0xff] }
 0x5df   :  { %v5586_v53 = vrot.slane %v5414_v63, %v4312_v62  ;;  %v2259_v50 = vadd.f32 %v2227_v49, %v1963_v48  ;;  %v2523_v47 = vmul.f32 %v6409_v5, %v2301_v16  ;;  %v5589_v8 = vadd.f32 %v1662_v2, %v1398_v35  ;;  %v6412_v22 = vld [vmem:[#allocation168_spill] sm:$0xff]  ;;  %v6416_v5 = vld [vmem:[#allocation126_spill] sm:$0xff]  ;;  %v6417_v2 = vld [vmem:[#allocation155_spill] sm:$0xff] }
 0x5e0   :  { %v2819_v58 = vmul.f32 %v6410_v34, %v2597_v39  ;;  %v1962_v14 = vadd.f32 %v1930_v41, %v1666_v20  ;;  %v2226_v23 = vmul.f32 %v6411_v54, %v2005_v45  ;;  %v3115_v55 = vmul.f32 %v6412_v22, %v5571_v24  ;;  %v6418_v20 = vld [vmem:[#allocation192_spill] sm:$0xff] }
 0x5e1   :  { %v2555_v29 = vadd.f32 %v2523_v47, %v2259_v50  ;;  %v1373_v32 = vmul.f32 %v6413_v13, %v1149_v61  ;;  %v1637_v4 = vmul.f32 %v6414_v19, %v1413_v56  ;;  %v3411_v48 = vmul.f32 %v6415_v17, %v5577_v12  ;;  %v6419_v50 = vld [vmem:[#allocation68_spill] sm:$0xff]  ;;  %v6420_v13 = vld [vmem:[#allocation214_spill] sm:$0xff] }
 0x5e2   :  { %v2258_v49 = vadd.f32 %v2226_v23, %v1962_v14  ;;  %v2522_v35 = vmul.f32 %v6416_v5, %v2301_v16  ;;  %v2818_v15 = vmul.f32 %v6417_v2, %v2597_v39  ;;  %v3114_v54 = vmul.f32 %v6418_v20, %v5571_v24  ;;  %v6421_v19 = vld [vmem:[#allocation14_spill] sm:$0xff]  ;;  %v6423_v5 = vld [vmem:[#allocation95_spill] sm:$0xff]  ;;  %v6424_v2 = vld [vmem:[#allocation121_spill] sm:$0xff] }
 0x5e3   :  { %v2851_v34 = vadd.f32 %v2819_v58, %v2555_v29  ;;  %v1669_v41 = vadd.f32 %v1637_v4, %v1373_v32  ;;  %v1933_v47 = vmul.f32 %v6419_v50, %v1709_v43  ;;  %v3410_v21 = vmul.f32 %v6420_v13, %v5577_v12  ;;  %v6426_v32 = vld [vmem:[#allocation69_spill] sm:$0xff] }
 0x5e4   :  { %v2554_v22 = vadd.f32 %v2522_v35, %v2258_v49  ;;  %v1372_v51 = vmul.f32 %v6421_v19, %v1149_v61  ;;  %v1636_v17 = vmul.f32 %v6422_v44, %v1413_v56  ;;  %v2229_v0 = vmul.f32 %v6423_v5, %v2005_v45  ;;  %v6427_v13 = vld [vmem:[#allocation169_spill] sm:$0xff]  ;;  %v6428_v61 = vld [vmem:[#allocation96_spill] sm:$0xff] }
 0x5e5   :  { %v3147_v14 = vadd.f32 %v3115_v55, %v2851_v34  ;;  %v1965_v23 = vadd.f32 %v1933_v47, %v1669_v41  ;;  %v2525_v58 = vmul.f32 %v6424_v2, %v2301_v16  ;;  %v2821_v20 = vmul.f32 %v6425_v33, %v2597_v39  ;;  %v6431_v47 = vld [vmem:[#allocation43_spill] sm:$0xff]  ;;  %v6433_v5 = vld [vmem:[#allocation157_spill] sm:$0xff] }
 0x5e6   :  { %v2850_v29 = vadd.f32 %v2818_v15, %v2554_v22  ;;  %v1668_v4 = vadd.f32 %v1636_v17, %v1372_v51  ;;  %v1932_v50 = vmul.f32 %v6426_v32, %v1709_v43  ;;  %v3117_v37 = vmul.f32 %v6427_v13, %v5571_v24  ;;  %v6429_v51 = vld [vmem:[#allocation128_spill] sm:$0xff] }
 0x5e7   :  { %v3443_v49 = vadd.f32 %v3411_v48, %v3147_v14  ;;  %v2261_v35 = vadd.f32 %v2229_v0, %v1965_v23  ;;  %v2228_v19 = vmul.f32 %v6428_v61, %v2005_v45  ;;  %v1153_v44 = vrot.slane %v5432_v36, %v4235_v9  ;;  %v6432_v14 = vld [vmem:[#allocation204_spill] sm:$0xff] }
 0x5e8   :  { %v3146_v56 = vadd.f32 %v3114_v54, %v2850_v29  ;;  %v1964_v55 = vadd.f32 %v1932_v50, %v1668_v4  ;;  %v1417_v15 = vrot.slane %v5432_v36, %v4333_v10  ;;  %v2524_v34 = vmul.f32 %v6429_v51, %v2301_v16  ;;  %v6430_v54 = vld [vmem:[#allocation20_spill] sm:$0xff]  ;;  %v6434_v4 = vld [vmem:[#allocation70_spill] sm:$0xff] }
 0x5e9   :  { %3510 = vperm.xlu0 %3994, %v3443_v49   ;;  %v2557_v33 = vadd.f32 %v2525_v58, %v2261_v35  ;;  %v1713_v0 = vrot.slane %v5432_v36, %v4307_v60  ;;  %v5624_v43 = vrot.slane %v5432_v36, %v4312_v62  ;;  %v1375_v41 = vmul.f32 %v6430_v54, %v1153_v44  ;;  %v6435_v49 = vld [vmem:[#allocation16_spill] sm:$0xff] }
 0x5ea   :  { %v3442_v45 = vadd.f32 %v3410_v21, %v3146_v56  ;;  %v2260_v48 = vadd.f32 %v2228_v19, %v1964_v55  ;;  %v1639_v22 = vmul.f32 %v6431_v47, %v1417_v15  ;;  %v3413_v23 = vmul.f32 %v6432_v14, %v5577_v12  ;;  %v6437_v19 = vld [vmem:[#allocation193_spill] sm:$0xff]  ;;  %v6440_v47 = vld [vmem:[#allocation216_spill] sm:$0xff]  ;;  %v6441_v14 = vld [vmem:[#allocation122_spill] sm:$0xff] }
 0x5eb   :  { %v2853_v17 = vadd.f32 %v2821_v20, %v2557_v33  ;;  %v2820_v2 = vmul.f32 %v6433_v5, %v2597_v39  ;;  %v2305_v16 = vrot.slane %v5432_v36, %v4358_v18  ;;  %v1935_v32 = vmul.f32 %v6434_v4, %v1713_v0  ;;  %v6436_v39 = vld [vmem:[#allocation44_spill] sm:$0xff]  ;;  %v6438_v33 = vld [vmem:[#allocation97_spill] sm:$0xff] }
 0x5ec   :  { %3507 = vperm.xlu1 %3993, %v3442_v45   ;;  %v2556_v58 = vadd.f32 %v2524_v34, %v2260_v48  ;;  %v1671_v29 = vadd.f32 %v1639_v22, %v1375_v41  ;;  %v5636_v21 = vrot.slane %v5432_v36, %v4317_v1  ;;  %v5640_v20 = vrot.slane %v5432_v36, %v4365_v40  ;;  %v6439_v48 = vld [vmem:[#allocation71_spill] sm:$0xff] }
 0x5ed   :  { %v3149_v50 = vadd.f32 %v3117_v37, %v2853_v17  ;;  %v1374_v35 = vmul.f32 %v6435_v49, %v1153_v44  ;;  %v1638_v13 = vmul.f32 %v6436_v39, %v1417_v15  ;;  %v3116_v56 = vmul.f32 %v6437_v19, %v5571_v24  ;;  %v6442_v24 = vld [vmem:[#allocation152_spill] sm:$0xff]  ;;  %v6445_v49 = vld [vmem:[#allocation18_spill] sm:$0xff]  ;;  %v6446_v39 = vld [vmem:[#allocation45_spill] sm:$0xff] }
 0x5ee   :  { %v2852_v61 = vadd.f32 %v2820_v2, %v2556_v58  ;;  %v1967_v55 = vadd.f32 %v1935_v32, %v1671_v29  ;;  %v2231_v51 = vmul.f32 %v6438_v33, %v5624_v43  ;;  %v5650_v37 = vrot.slane %v5432_v36, %v4322_v3  ;;  %v6444_v36 = vld [vmem:[#allocation98_spill] sm:$0xff]  ;;  %v6449_v33 = vld [vmem:[#allocation159_spill] sm:$0xff] }
 0x5ef   :  { %v3445_v34 = vadd.f32 %v3413_v23, %v3149_v50  ;;  %v1670_v45 = vadd.f32 %v1638_v13, %v1374_v35  ;;  %v1934_v54 = vmul.f32 %v6439_v48, %v1713_v0  ;;  %v3412_v22 = vmul.f32 %v6440_v47, %v5577_v12  ;;  %v6443_v23 = vld [vmem:[#allocation170_spill] sm:$0xff]  ;;  %v6447_v13 = vld [vmem:[#allocation205_spill] sm:$0xff] }
 0x5f0   :  { %v3148_v41 = vadd.f32 %v3116_v56, %v2852_v61  ;;  %v2263_v17 = vadd.f32 %v2231_v51, %v1967_v55  ;;  %v2527_v5 = vmul.f32 %v6441_v14, %v2305_v16  ;;  %v2823_v2 = vmul.f32 %v6442_v24, %v5636_v21  ;;  %v6448_v56 = vld [vmem:[#allocation130_spill] sm:$0xff] }
 0x5f1   :  { %3516 = vperm.xlu0 %3994, %v3445_v34   ;;  %v3119_v58 = vmul.f32 %v6443_v23, %v5640_v20  ;;  %v1966_v29 = vadd.f32 %v1934_v54, %v1670_v45  ;;  %v2230_v4 = vmul.f32 %v6444_v36, %v5624_v43  ;;  %v1377_v35 = vmul.f32 %v6445_v49, %v1153_v44  ;;  %v6450_v45 = vld [vmem:[#allocation194_spill] sm:$0xff]  ;;  %v6455_v49 = vld [vmem:[#allocation99_spill] sm:$0xff] }
 0x5f2   :  { %v3444_v32 = vadd.f32 %v3412_v22, %v3148_v41  ;;  %v2559_v50 = vadd.f32 %v2527_v5, %v2263_v17  ;;  %v1641_v12 = vmul.f32 %v6446_v39, %v1417_v15  ;;  %v3415_v61 = vmul.f32 %v6447_v13, %v5650_v37  ;;  %v6451_v41 = vld [vmem:[#allocation72_spill] sm:$0xff]  ;;  %v6452_v17 = vld [vmem:[#allocation218_spill] sm:$0xff]  ;;  %v6453_v5 = vld [vmem:[#allocation17_spill] sm:$0xff] }
 0x5f3   :  { %v2262_v19 = vadd.f32 %v2230_v4, %v1966_v29  ;;  %v2526_v55 = vmul.f32 %v6448_v56, %v2305_v16  ;;  %v2822_v51 = vmul.f32 %v6449_v33, %v5636_v21  ;;  %v3118_v48 = vmul.f32 %v6450_v45, %v5640_v20  ;;  %v6454_v23 = vld [vmem:[#allocation46_spill] sm:$0xff] }
 0x5f4   :  { %3513 = vperm.xlu1 %3993, %v3444_v32   ;;  %v2855_v34 = vadd.f32 %v2823_v2, %v2559_v50  ;;  %v1673_v54 = vadd.f32 %v1641_v12, %v1377_v35  ;;  %v1937_v47 = vmul.f32 %v6451_v41, %v1713_v0  ;;  %v3414_v14 = vmul.f32 %v6452_v17, %v5650_v37  ;;  %v6456_v2 = vld [vmem:[#allocation123_spill] sm:$0xff]  ;;  %v6457_v35 = vld [vmem:[#allocation154_spill] sm:$0xff] }
 0x5f5   :  { %v2558_v22 = vadd.f32 %v2526_v55, %v2262_v19  ;;  %v1376_v24 = vmul.f32 %v6453_v5, %v1153_v44  ;;  %v1640_v29 = vmul.f32 %v6454_v23, %v1417_v15  ;;  %v2233_v32 = vmul.f32 %v6455_v49, %v5624_v43  ;;  %v6458_v19 = vld [vmem:[#allocation73_spill] sm:$0xff]  ;;  %v6459_v44 = vld [vmem:[#allocation171_spill] sm:$0xff]  ;;  %v6460_v15 = vld [vmem:[#allocation100_spill] sm:$0xff] }
 0x5f6   :  { %v3151_v36 = vadd.f32 %v3119_v58, %v2855_v34  ;;  %v1969_v4 = vadd.f32 %v1937_v47, %v1673_v54  ;;  %v2529_v50 = vmul.f32 %v6456_v2, %v2305_v16  ;;  %v2825_v12 = vmul.f32 %v6457_v35, %v5636_v21  ;;  %v6462_v5 = vld [vmem:[#allocation21_spill] sm:$0xff]  ;;  %v6463_v23 = vld [vmem:[#allocation47_spill] sm:$0xff]  ;;  %v6466_v35 = vld [vmem:[#allocation74_spill] sm:$0xff] }
 0x5f7   :  { %v2854_v39 = vadd.f32 %v2822_v51, %v2558_v22  ;;  %v1672_v13 = vadd.f32 %v1640_v29, %v1376_v24  ;;  %v1936_v56 = vmul.f32 %v6458_v19, %v1713_v0  ;;  %v3121_v45 = vmul.f32 %v6459_v44, %v5640_v20  ;;  %v6461_v22 = vld [vmem:[#allocation132_spill] sm:$0xff] }
 0x5f8   :  { %v3447_v55 = vadd.f32 %v3415_v61, %v3151_v36  ;;  %v2265_v33 = vadd.f32 %v2233_v32, %v1969_v4  ;;  %v2232_v58 = vmul.f32 %v6460_v15, %v5624_v43  ;;  %v1157_v41 = vrot.slane %v5439_v27, %v4235_v9  ;;  %v6464_v4 = vld [vmem:[#allocation206_spill] sm:$0xff]  ;;  %v6465_v32 = vld [vmem:[#allocation180_spill] sm:$0xff]  ;;  %v6469_v15 = vld [vmem:[#allocation195_spill] sm:$0xff] }
 0x5f9   :  { %v3150_v34 = vadd.f32 %v3118_v48, %v2854_v39  ;;  %v1968_v54 = vadd.f32 %v1936_v56, %v1672_v13  ;;  %v1421_v51 = vrot.slane %v5439_v27, %v4333_v10  ;;  %v2528_v0 = vmul.f32 %v6461_v22, %v2305_v16  ;;  %v6467_v56 = vld [vmem:[#allocation19_spill] sm:$0xff] }
 0x5fa   :  { %3522 = vperm.xlu0 %3994, %v3447_v55   ;;  %v2561_v47 = vadd.f32 %v2529_v50, %v2265_v33  ;;  %v1717_v61 = vrot.slane %v5439_v27, %v4307_v60  ;;  %v5695_v17 = vrot.slane %v5439_v27, %v4312_v62  ;;  %v1379_v24 = vmul.f32 %v6462_v5, %v1157_v41 }
 0x5fb   :  { %v3446_v43 = vadd.f32 %v3414_v14, %v3150_v34  ;;  %v2264_v48 = vadd.f32 %v2232_v58, %v1968_v54  ;;  %v1643_v29 = vmul.f32 %v6463_v23, %v1421_v51  ;;  %v3417_v49 = vmul.f32 %v6464_v4, %v5650_v37  ;;  %v6470_v54 = vld [vmem:[#allocation101_spill] sm:$0xff] }
 0x5fc   :  { %v2857_v36 = vadd.f32 %v2825_v12, %v2561_v47  ;;  %v2824_v16 = vmul.f32 %v6465_v32, %v5636_v21  ;;  %v2309_v2 = vrot.slane %v5439_v27, %v4358_v18  ;;  %v1939_v14 = vmul.f32 %v6466_v35, %v1717_v61  ;;  %v6468_v21 = vld [vmem:[#allocation48_spill] sm:$0xff] }
 0x5fd   :  { %3519 = vperm.xlu1 %3993, %v3446_v43   ;;  %v2560_v50 = vadd.f32 %v2528_v0, %v2264_v48  ;;  %v1675_v39 = vadd.f32 %v1643_v29, %v1379_v24  ;;  %v5708_v13 = vrot.slane %v5439_v27, %v4317_v1  ;;  %v5712_v12 = vrot.slane %v5439_v27, %v4365_v40  ;;  %v6471_v43 = vld [vmem:[#allocation75_spill] sm:$0xff] }
 0x5fe   :  { %v3153_v19 = vadd.f32 %v3121_v45, %v2857_v36  ;;  %v1378_v55 = vmul.f32 %v6467_v56, %v1157_v41  ;;  %v1642_v33 = vmul.f32 %v6468_v21, %v1421_v51  ;;  %v3120_v58 = vmul.f32 %v6469_v15, %v5640_v20  ;;  %v6472_v24 = vld [vmem:[#allocation219_spill] sm:$0xff]  ;;  %v6473_v36 = vld [vmem:[#allocation124_spill] sm:$0xff]  ;;  %v6480_v15 = vld [vmem:[#allocation134_spill] sm:$0xff] }
 0x5ff   :  { %v2856_v44 = vadd.f32 %v2824_v16, %v2560_v50  ;;  %v1971_v34 = vadd.f32 %v1939_v14, %v1675_v39  ;;  %v2235_v47 = vmul.f32 %v6470_v54, %v5695_v17  ;;  %v5722_v45 = vrot.slane %v5439_v27, %v4322_v3  ;;  %v6474_v20 = vld [vmem:[#allocation156_spill] sm:$0xff]  ;;  %v6476_v27 = vld [vmem:[#allocation102_spill] sm:$0xff]  ;;  %v6479_v21 = vld [vmem:[#allocation207_spill] sm:$0xff] }
 0x600   :  { %v3449_v22 = vadd.f32 %v3417_v49, %v3153_v19  ;;  %v1674_v0 = vadd.f32 %v1642_v33, %v1378_v55  ;;  %v1938_v48 = vmul.f32 %v6471_v43, %v1717_v61  ;;  %v3416_v23 = vmul.f32 %v6472_v24, %v5650_v37  ;;  %v6475_v49 = vld [vmem:[#allocation172_spill] sm:$0xff]  ;;  %v6477_v19 = vld [vmem:[#allocation22_spill] sm:$0xff]  ;;  %v6478_v55 = vld [vmem:[#allocation49_spill] sm:$0xff] }
 0x601   :  { %v3152_v5 = vadd.f32 %v3120_v58, %v2856_v44  ;;  %v2267_v29 = vadd.f32 %v2235_v47, %v1971_v34  ;;  %v2531_v4 = vmul.f32 %v6473_v36, %v2309_v2  ;;  %v2827_v32 = vmul.f32 %v6474_v20, %v5708_v13  ;;  %v6481_v34 = vld [vmem:[#allocation182_spill] sm:$0xff]  ;;  %v6485_v36 = vld [vmem:[#allocation23_spill] sm:$0xff] }
 0x602   :  { %3528 = vperm.xlu0 %3994, %v3449_v22   ;;  %v3123_v16 = vmul.f32 %v6475_v49, %v5712_v12  ;;  %v1970_v50 = vadd.f32 %v1938_v48, %v1674_v0  ;;  %v2234_v39 = vmul.f32 %v6476_v27, %v5695_v17  ;;  %v1381_v56 = vmul.f32 %v6477_v19, %v1157_v41  ;;  %v6482_v22 = vld [vmem:[#allocation196_spill] sm:$0xff]  ;;  %v6486_v20 = vld [vmem:[#allocation50_spill] sm:$0xff] }
 0x603   :  { %v3448_v35 = vadd.f32 %v3416_v23, %v3152_v5  ;;  %v2563_v14 = vadd.f32 %v2531_v4, %v2267_v29  ;;  %v1645_v37 = vmul.f32 %v6478_v55, %v1421_v51  ;;  %v3419_v33 = vmul.f32 %v6479_v21, %v5722_v45  ;;  %v6483_v48 = vld [vmem:[#allocation76_spill] sm:$0xff]  ;;  %v6490_v21 = vld [vmem:[#allocation77_spill] sm:$0xff] }
 0x604   :  { %v2266_v44 = vadd.f32 %v2234_v39, %v1970_v50  ;;  %v2530_v58 = vmul.f32 %v6480_v15, %v2309_v2  ;;  %v2826_v54 = vmul.f32 %v6481_v34, %v5708_v13  ;;  %v3122_v0 = vmul.f32 %v6482_v22, %v5712_v12  ;;  %v6484_v23 = vld [vmem:[#allocation220_spill] sm:$0xff]  ;;  %v6487_v39 = vld [vmem:[#allocation103_spill] sm:$0xff] }
 0x605   :  { %3525 = vperm.xlu1 %3993, %v3448_v35   ;;  %v2859_v47 = vadd.f32 %v2827_v32, %v2563_v14  ;;  %v1677_v43 = vadd.f32 %v1645_v37, %v1381_v56  ;;  %v1941_v5 = vmul.f32 %v6483_v48, %v1717_v61  ;;  %v3418_v29 = vmul.f32 %v6484_v23, %v5722_v45  ;;  %v6488_v32 = vld [vmem:[#allocation127_spill] sm:$0xff]  ;;  %v6489_v56 = vld [vmem:[#allocation158_spill] sm:$0xff]  ;;  %v6494_v23 = vld [vmem:[#allocation24_spill] sm:$0xff] }
 0x606   :  { %v2562_v24 = vadd.f32 %v2530_v58, %v2266_v44  ;;  %v1380_v4 = vmul.f32 %v6485_v36, %v1157_v41  ;;  %v1644_v49 = vmul.f32 %v6486_v20, %v1421_v51  ;;  %v2237_v35 = vmul.f32 %v6487_v39, %v5695_v17  ;;  %v6491_v41 = vld [vmem:[#allocation173_spill] sm:$0xff]  ;;  %v6492_v51 = vld [vmem:[#allocation104_spill] sm:$0xff] }
 0x607   :  { %v3155_v50 = vadd.f32 %v3123_v16, %v2859_v47  ;;  %v1973_v27 = vadd.f32 %v1941_v5, %v1677_v43  ;;  %v2533_v14 = vmul.f32 %v6488_v32, %v2309_v2  ;;  %v2829_v55 = vmul.f32 %v6489_v56, %v5708_v13 }
 0x608   :  { %v2858_v19 = vadd.f32 %v2826_v54, %v2562_v24  ;;  %v1676_v37 = vadd.f32 %v1644_v49, %v1380_v4  ;;  %v1940_v44 = vmul.f32 %v6490_v21, %v1717_v61  ;;  %v3125_v34 = vmul.f32 %v6491_v41, %v5712_v12  ;;  %v6495_v4 = vld [vmem:[#allocation51_spill] sm:$0xff] }
 0x609   :  { %v3451_v15 = vadd.f32 %v3419_v33, %v3155_v50  ;;  %v2269_v58 = vadd.f32 %v2237_v35, %v1973_v27  ;;  %v2236_v16 = vmul.f32 %v6492_v51, %v5695_v17  ;;  %v5760_v43 = vrot.slane %v5442_v57, %v4235_v9  ;;  %v6493_v33 = vld [vmem:[#allocation140_spill] sm:$0xff]  ;;  %v6496_v50 = vld [vmem:[#allocation209_spill] sm:$0xff] }
 0x60a   :  { %v3154_v47 = vadd.f32 %v3122_v0, %v2858_v19  ;;  %v1972_v22 = vadd.f32 %v1940_v44, %v1676_v37  ;;  %v5764_v54 = vrot.slane %v5442_v57, %v4333_v10  ;;  %v2532_v48 = vmul.f32 %v6493_v33, %v2309_v2  ;;  %v6497_v27 = vld [vmem:[#allocation184_spill] sm:$0xff]  ;;  %v6498_v35 = vld [vmem:[#allocation197_spill] sm:$0xff]  ;;  %v6499_v19 = vld [vmem:[#allocation78_spill] sm:$0xff] }
 0x60b   :  { %3534 = vperm.xlu0 %3994, %v3451_v15   ;;  %v2565_v61 = vadd.f32 %v2533_v14, %v2269_v58  ;;  %v5769_v5 = vrot.slane %v5442_v57, %v4307_v60  ;;  %v5773_v17 = vrot.slane %v5442_v57, %v4312_v62  ;;  %v1383_v36 = vmul.f32 %v6494_v23, %v5760_v43  ;;  %v6502_v51 = vld [vmem:[#allocation105_spill] sm:$0xff]  ;;  %v6503_v33 = vld [vmem:[#allocation79_spill] sm:$0xff] }
 0x60c   :  { %v3450_v0 = vadd.f32 %v3418_v29, %v3154_v47  ;;  %v2268_v24 = vadd.f32 %v2236_v16, %v1972_v22  ;;  %v1647_v20 = vmul.f32 %v6495_v4, %v5764_v54  ;;  %v3421_v2 = vmul.f32 %v6496_v50, %v5722_v45  ;;  %v6505_v4 = vld [vmem:[#allocation129_spill] sm:$0xff] }
 0x60d   :  { %v2861_v49 = vadd.f32 %v2829_v55, %v2565_v61  ;;  %v2828_v39 = vmul.f32 %v6497_v27, %v5708_v13  ;;  %v3124_v32 = vmul.f32 %v6498_v35, %v5712_v12  ;;  %v1943_v56 = vmul.f32 %v6499_v19, %v5769_v5  ;;  %v6500_v13 = vld [vmem:[#allocation25_spill] sm:$0xff]  ;;  %v6501_v12 = vld [vmem:[#allocation52_spill] sm:$0xff]  ;;  %v6510_v19 = vld [vmem:[#allocation54_spill] sm:$0xff] }
 0x60e   :  { %3531 = vperm.xlu1 %3993, %v3450_v0   ;;  %v2564_v14 = vadd.f32 %v2532_v48, %v2268_v24  ;;  %v1679_v29 = vadd.f32 %v1647_v20, %v1383_v36  ;;  %v5789_v37 = vrot.slane %v5442_v57, %v4358_v18  ;;  %v5793_v21 = vrot.slane %v5442_v57, %v4317_v1  ;;  %v6504_v24 = vld [vmem:[#allocation221_spill] sm:$0xff] }
 0x60f   :  { %v3157_v55 = vadd.f32 %v3125_v34, %v2861_v49  ;;  %v1382_v44 = vmul.f32 %v6500_v13, %v5760_v43  ;;  %v1646_v15 = vmul.f32 %v6501_v12, %v5764_v54  ;;  %v2239_v16 = vmul.f32 %v6502_v51, %v5773_v17  ;;  %v6506_v49 = vld [vmem:[#allocation35_spill] sm:$0xff] }
 0x610   :  { %v2860_v58 = vadd.f32 %v2828_v39, %v2564_v14  ;;  %v1975_v41 = vadd.f32 %v1943_v56, %v1679_v29  ;;  %v5803_v47 = vrot.slane %v5442_v57, %v4365_v40  ;;  %v5807_v22 = vrot.slane %v5442_v57, %v4322_v3  ;;  %v6507_v57 = vld [vmem:[#allocation160_spill] sm:$0xff]  ;;  %v6508_v39 = vld [vmem:[#allocation106_spill] sm:$0xff] }
 0x611   :  { %v3453_v34 = vadd.f32 %v3421_v2, %v3157_v55  ;;  %v1678_v61 = vadd.f32 %v1646_v15, %v1382_v44  ;;  %v1942_v48 = vmul.f32 %v6503_v33, %v5769_v5  ;;  %v3420_v23 = vmul.f32 %v6504_v24, %v5722_v45  ;;  %v6509_v45 = vld [vmem:[#allocation27_spill] sm:$0xff]  ;;  %v6511_v55 = vld [vmem:[#allocation174_spill] sm:$0xff]  ;;  %v6515_v33 = vld [vmem:[#allocation81_spill] sm:$0xff] }
 0x612   :  { %v3156_v0 = vadd.f32 %v3124_v32, %v2860_v58  ;;  %v2271_v36 = vadd.f32 %v2239_v16, %v1975_v41  ;;  %v2535_v20 = vmul.f32 %v6505_v4, %v5789_v37  ;;  %v5817_v50 = vmul.f32 %v6506_v49, %v5517_v28  ;;  %v6512_v44 = vld [vmem:[#allocation211_spill] sm:$0xff]  ;;  %v6513_v58 = vld [vmem:[#allocation141_spill] sm:$0xff]  ;;  %v6516_v24 = vld [vmem:[#allocation198_spill] sm:$0xff] }
 0x613   :  { %3540 = vperm.xlu0 %3994, %v3453_v34   ;;  %v2831_v2 = vmul.f32 %v6507_v57, %v5793_v21  ;;  %v1974_v27 = vadd.f32 %v1942_v48, %v1678_v61  ;;  %v2238_v35 = vmul.f32 %v6508_v39, %v5773_v17  ;;  %v1384_v29 = vmul.f32 %v6509_v45, %v5760_v43  ;;  %v6514_v16 = vld [vmem:[#allocation185_spill] sm:$0xff]  ;;  %v6517_v57 = vld [vmem:[#allocation108_spill] sm:$0xff] }
 0x614   :  { %v3452_v32 = vadd.f32 %v3420_v23, %v3156_v0  ;;  %v2567_v14 = vadd.f32 %v2535_v20, %v2271_v36  ;;  %v1648_v56 = vmul.f32 %v6510_v19, %v5764_v54  ;;  %v3127_v13 = vmul.f32 %v6511_v55, %v5803_v47  ;;  %v6521_v55 = vld [vmem:[#allocation142_spill] sm:$0xff] }
 0x615   :  { %v3423_v12 = vmul.f32 %v6512_v44, %v5807_v22  ;;  %v2270_v15 = vadd.f32 %v2238_v35, %v1974_v27  ;;  %v2534_v41 = vmul.f32 %v6513_v58, %v5789_v37  ;;  %v2830_v34 = vmul.f32 %v6514_v16, %v5793_v21  ;;  %v6518_v35 = vld [vmem:[#allocation29_spill] sm:$0xff] }
 0x616   :  { %3537 = vperm.xlu1 %3993, %v3452_v32   ;;  %v2863_v51 = vadd.f32 %v2831_v2, %v2567_v14  ;;  %v1680_v61 = vadd.f32 %v1648_v56, %v1384_v29  ;;  %v1944_v48 = vmul.f32 %v6515_v33, %v5769_v5  ;;  %v3126_v23 = vmul.f32 %v6516_v24, %v5803_v47  ;;  %v6520_v29 = vld [vmem:[#allocation222_spill] sm:$0xff] }
 0x617   :  { %v2566_v0 = vadd.f32 %v2534_v41, %v2270_v15  ;;  %v5841_v36 = vrot.slane %v5460_v38, %v4235_v9  ;;  %v5845_v4 = vrot.slane %v5460_v38, %v4333_v10  ;;  %v2240_v2 = vmul.f32 %v6517_v57, %v5773_v17  ;;  %v6519_v9 = vld [vmem:[#allocation56_spill] sm:$0xff]  ;;  %v6522_v15 = vld [vmem:[#allocation83_spill] sm:$0xff] }
 0x618   :  { %v3159_v20 = vadd.f32 %v3127_v13, %v2863_v51  ;;  %v1976_v49 = vadd.f32 %v1944_v48, %v1680_v61  ;;  %v5851_v27 = vrot.slane %v5460_v38, %v4307_v60  ;;  %v5859_v10 = vrot.slane %v5460_v38, %v4312_v62  ;;  %v6527_v57 = vld [vmem:[#allocation199_spill] sm:$0xff] }
 0x619   :  { %v2862_v39 = vadd.f32 %v2830_v34, %v2566_v0  ;;  %v1386_v32 = vmul.f32 %v6518_v35, %v5841_v36  ;;  %v1650_v14 = vmul.f32 %v6519_v9, %v5845_v4  ;;  %v3422_v19 = vmul.f32 %v6520_v29, %v5807_v22  ;;  %v6524_v34 = vld [vmem:[#allocation28_spill] sm:$0xff]  ;;  %v6525_v0 = vld [vmem:[#allocation110_spill] sm:$0xff] }
 0x61a   :  { %v3455_v45 = vadd.f32 %v3423_v12, %v3159_v20  ;;  %v2272_v56 = vadd.f32 %v2240_v2, %v1976_v49  ;;  %v2536_v60 = vmul.f32 %v6521_v55, %v5789_v37  ;;  %v1946_v58 = vmul.f32 %v6522_v15, %v5851_v27  ;;  %v6523_v12 = vld [vmem:[#allocation186_spill] sm:$0xff]  ;;  %v6532_v15 = vld [vmem:[#allocation109_spill] sm:$0xff] }
 0x61b   :  { %v3158_v13 = vadd.f32 %v3126_v23, %v2862_v39  ;;  %v1682_v44 = vadd.f32 %v1650_v14, %v1386_v32  ;;  %v5869_v41 = vrot.slane %v5460_v38, %v4358_v18  ;;  %v2832_v51 = vmul.f32 %v6523_v12, %v5793_v21  ;;  %v6526_v23 = vld [vmem:[#allocation55_spill] sm:$0xff] }
 0x61c   :  { %3546 = vperm.xlu0 %3994, %v3455_v45   ;;  %v2568_v62 = vadd.f32 %v2536_v60, %v2272_v56  ;;  %v5875_v16 = vrot.slane %v5460_v38, %v4317_v1  ;;  %v1387_v61 = vmul.f32 %v6524_v34, %v5841_v36  ;;  %v2242_v24 = vmul.f32 %v6525_v0, %v5859_v10  ;;  %v6528_v39 = vld [vmem:[#allocation223_spill] sm:$0xff] }
 0x61d   :  { %v3454_v33 = vadd.f32 %v3422_v19, %v3158_v13  ;;  %v1978_v48 = vadd.f32 %v1946_v58, %v1682_v44  ;;  %v1651_v20 = vmul.f32 %v6526_v23, %v5845_v4  ;;  %v3128_v2 = vmul.f32 %v6527_v57, %v5803_v47  ;;  %v6529_v14 = vld [vmem:[#allocation143_spill] sm:$0xff]  ;;  %v6530_v19 = vld [vmem:[#allocation82_spill] sm:$0xff]  ;;  %v6536_v23 = vld [vmem:[#allocation133_spill] sm:$0xff] }
 0x61e   :  { %v2864_v49 = vadd.f32 %v2832_v51, %v2568_v62  ;;  %v3424_v35 = vmul.f32 %v6528_v39, %v5807_v22  ;;  %v5889_v32 = vrot.slane %v5460_v38, %v4365_v40  ;;  %v2538_v45 = vmul.f32 %v6529_v14, %v5869_v41  ;;  %v6531_v60 = vld [vmem:[#allocation187_spill] sm:$0xff]  ;;  %v6533_v51 = vld [vmem:[#allocation26_spill] sm:$0xff]  ;;  %v6537_v39 = vld [vmem:[#allocation80_spill] sm:$0xff] }
 0x61f   :  { %3543 = vperm.xlu1 %3993, %v3454_v33   ;;  %v2274_v9 = vadd.f32 %v2242_v24, %v1978_v48  ;;  %v1683_v29 = vadd.f32 %v1651_v20, %v1387_v61  ;;  %v1947_v56 = vmul.f32 %v6530_v19, %v5851_v27  ;;  %v2834_v13 = vmul.f32 %v6531_v60, %v5875_v16  ;;  %v6534_v61 = vld [vmem:[#allocation53_spill] sm:$0xff]  ;;  %v6540_v14 = vld [vmem:[#allocation58_spill] sm:$0xff] }
 0x620   :  { %v3160_v55 = vadd.f32 %v3128_v2, %v2864_v49  ;;  %v5899_v44 = vrot.slane %v5460_v38, %v4322_v3  ;;  %v2243_v58 = vmul.f32 %v6532_v15, %v5859_v10  ;;  %v1385_v34 = vmul.f32 %v6533_v51, %v5760_v43  ;;  %v6535_v24 = vld [vmem:[#allocation201_spill] sm:$0xff] }
 0x621   :  { %v2570_v62 = vadd.f32 %v2538_v45, %v2274_v9  ;;  %v1979_v12 = vadd.f32 %v1947_v56, %v1683_v29  ;;  %v1649_v33 = vmul.f32 %v6534_v61, %v5764_v54  ;;  %v5909_v48 = vadd.f32 %v5582_v26, %v5589_v8  ;;  %v6538_v26 = vld [vmem:[#allocation162_spill] sm:$0xff] }
 0x622   :  { %v3456_v0 = vadd.f32 %v3424_v35, %v3160_v55  ;;  %v3130_v38 = vmul.f32 %v6535_v24, %v5889_v32  ;;  %v2539_v20 = vmul.f32 %v6536_v23, %v5869_v41  ;;  %v1945_v43 = vmul.f32 %v6537_v39, %v5769_v5  ;;  %v6539_v35 = vld [vmem:[#allocation31_spill] sm:$0xff]  ;;  %v6542_v5 = vld [vmem:[#allocation62_spill] sm:$0xff] }
 0x623   :  { %v2866_v49 = vadd.f32 %v2834_v13, %v2570_v62  ;;  %v2275_v57 = vadd.f32 %v2243_v58, %v1979_v12  ;;  %v1681_v2 = vadd.f32 %v1649_v33, %v1385_v34  ;;  %v3426_v54 = vmul.f32 %v5366_v25, %v5899_v44  ;;  %v6541_v55 = vld [vmem:[#allocation107_spill] sm:$0xff]  ;;  %v6543_v25 = vld [vmem:[#allocation176_spill] sm:$0xff]  ;;  %v6544_v62 = vld [vmem:[#allocation85_spill] sm:$0xff] }
 0x624   :  { %3549 = vperm.xlu1 %3993, %v3456_v0   ;;  %v2835_v8 = vmul.f32 %v6538_v26, %v5875_v16  ;;  %v1388_v9 = vmul.f32 %v6539_v35, %v5841_v36  ;;  %v1652_v45 = vmul.f32 %v6540_v14, %v5845_v4  ;;  %v2241_v60 = vmul.f32 %v6541_v55, %v5773_v17  ;;  %v6545_v33 = vld [vmem:[#allocation131_spill] sm:$0xff]  ;;  %v6547_v23 = vld [vmem:[#allocation30_spill] sm:$0xff]  ;;  %v6550_v26 = vld [vmem:[#allocation161_spill] sm:$0xff] }
 0x625   :  { %v3162_v29 = vadd.f32 %v3130_v38, %v2866_v49  ;;  %v2571_v19 = vadd.f32 %v2539_v20, %v2275_v57  ;;  %v1977_v56 = vadd.f32 %v1945_v43, %v1681_v2  ;;  %v1663_v13 = vmul.f32 %v6542_v5, %v5535_v46  ;;  %v6546_v38 = vld [vmem:[#allocation112_spill] sm:$0xff]  ;;  %v6548_v49 = vld [vmem:[#allocation57_spill] sm:$0xff]  ;;  %v6549_v39 = vld [vmem:[#allocation215_spill] sm:$0xff] }
 0x626   :  { %v3131_v15 = vmul.f32 %v6543_v25, %v5889_v32  ;;  %v1684_v58 = vadd.f32 %v1652_v45, %v1388_v9  ;;  %v1948_v12 = vmul.f32 %v6544_v62, %v5851_v27  ;;  %v2537_v0 = vmul.f32 %v6545_v33, %v5789_v37  ;;  %v6551_v35 = vld [vmem:[#allocation144_spill] sm:$0xff]  ;;  %v6556_v62 = vld [vmem:[#allocation38_spill] sm:$0xff] }
 0x627   :  { %v3458_v51 = vadd.f32 %v3426_v54, %v3162_v29  ;;  %v2867_v34 = vadd.f32 %v2835_v8, %v2571_v19  ;;  %v2273_v61 = vadd.f32 %v2241_v60, %v1977_v56  ;;  %v2244_v17 = vmul.f32 %v6546_v38, %v5859_v10  ;;  %v6552_v45 = vld [vmem:[#allocation84_spill] sm:$0xff]  ;;  %v6553_v56 = vld [vmem:[#allocation175_spill] sm:$0xff] }
 0x628   :  { %v1980_v24 = vadd.f32 %v1948_v12, %v1684_v58  ;;  %v1389_v20 = vmul.f32 %v6547_v23, %v5841_v36  ;;  %v1653_v57 = vmul.f32 %v6548_v49, %v5845_v4  ;;  %v3427_v43 = vmul.f32 %v6549_v39, %v5899_v44  ;;  %v6554_v5 = vld [vmem:[#allocation188_spill] sm:$0xff]  ;;  %v6562_v23 = vld [vmem:[#allocation37_spill] sm:$0xff] }
 0x629   :  { %3555 = vperm.xlu0 %3994, %v3458_v51   ;;  %v3163_v2 = vadd.f32 %v3131_v15, %v2867_v34  ;;  %v2569_v54 = vadd.f32 %v2537_v0, %v2273_v61  ;;  %v2833_v8 = vmul.f32 %v6550_v26, %v5793_v21  ;;  %v2540_v9 = vmul.f32 %v6551_v35, %v5869_v41  ;;  %v6555_v15 = vld [vmem:[#allocation111_spill] sm:$0xff]  ;;  %v6563_v49 = vld [vmem:[#allocation64_spill] sm:$0xff] }
 0x62a   :  { %v2276_v37 = vadd.f32 %v2244_v17, %v1980_v24  ;;  %v1685_v14 = vadd.f32 %v1653_v57, %v1389_v20  ;;  %v1949_v36 = vmul.f32 %v6552_v45, %v5851_v27  ;;  %v1695_v29 = vadd.f32 %v1663_v13, %v5817_v50  ;;  %v6557_v27 = vld [vmem:[#allocation65_spill] sm:$0xff]  ;;  %v6559_v61 = vld [vmem:[#allocation203_spill] sm:$0xff] }
 0x62b   :  { %v3459_v4 = vadd.f32 %v3427_v43, %v3163_v2  ;;  %v2865_v19 = vadd.f32 %v2833_v8, %v2569_v54  ;;  %v3129_v55 = vmul.f32 %v6553_v56, %v5803_v47  ;;  %v2836_v25 = vmul.f32 %v6554_v5, %v5875_v16  ;;  %v6558_v13 = vld [vmem:[#allocation213_spill] sm:$0xff]  ;;  %v6560_v24 = vld [vmem:[#allocation135_spill] sm:$0xff]  ;;  %v3350_v56 = vpop.permute.xlu0 %3349  ;;  %v6570_v5 = vld [vmem:[#allocation92_spill] sm:$0xff] }
 0x62c   :  { %v2572_v60 = vadd.f32 %v2540_v9, %v2276_v37  ;;  %v1981_v21 = vadd.f32 %v1949_v36, %v1685_v14  ;;  %v2245_v58 = vmul.f32 %v6555_v15, %v5859_v10  ;;  %v1400_v12 = vmul.f32 %v6556_v62, %v5517_v28  ;;  %v6561_v10 = vld [vmem:[#allocation89_spill] sm:$0xff]  ;;  %v6565_v26 = vld [vmem:[#allocation163_spill] sm:$0xff]  ;;  %v6566_v37 = vld [vmem:[#allocation118_spill] sm:$0xff] }
 0x62d   :  { %v1664_v51 = vmul.f32 %v6557_v27, %v5535_v46  ;;  %3558 = vperm.xlu1 %3993, %v3459_v4   ;;  %v3161_v50 = vadd.f32 %v3129_v55, %v2865_v19  ;;  %v3425_v34 = vmul.f32 %v6558_v13, %v5807_v22  ;;  %v3132_v33 = vmul.f32 %v6559_v61, %v5889_v32  ;;  %v6564_v22 = vld [vmem:[#allocation224_spill] sm:$0xff]  ;;  %v6567_v36 = vld [vmem:[#allocation177_spill] sm:$0xff]  ;;  %v6577_v27 = vld [vmem:[#allocation139_spill] sm:$0xff] }
 0x62e   :  { %v2868_v47 = vadd.f32 %v2836_v25, %v2572_v60  ;;  %v2277_v0 = vadd.f32 %v2245_v58, %v1981_v21  ;;  %v2541_v38 = vmul.f32 %v6560_v24, %v5869_v41  ;;  %v1959_v17 = vmul.f32 %v6561_v10, %v5553_v11  ;;  %v6569_v55 = vld [vmem:[#allocation117_spill] sm:$0xff]  ;;  %v6571_v21 = vld [vmem:[#allocation151_spill] sm:$0xff]  ;;  %v6575_v58 = vld [vmem:[#allocation164_spill] sm:$0xff] }
 0x62f   :  { %v1401_v20 = vmul.f32 %v6562_v23, %v5517_v28  ;;  %v1665_v57 = vmul.f32 %v6563_v49, %v5535_v46  ;;  %v3457_v2 = vadd.f32 %v3425_v34, %v3161_v50  ;;  %v3428_v43 = vmul.f32 %v6564_v22, %v5899_v44  ;;  %v6576_v62 = vld [vmem:[#allocation113_spill] sm:$0xff]  ;;  %v6584_v49 = vld [vmem:[#allocation34_spill] sm:$0xff] }
 0x630   :  { %v3164_v39 = vadd.f32 %v3132_v33, %v2868_v47  ;;  %v2573_v54 = vadd.f32 %v2541_v38, %v2277_v0  ;;  %v2837_v8 = vmul.f32 %v6565_v26, %v5875_v16  ;;  %v2284_v41 = vadd.f32 %v5527_v52, %v5543_v31  ;;  %v6579_v0 = vld [vmem:[#allocation179_spill] sm:$0xff]  ;;  %v6581_v38 = vld [vmem:[#allocation189_spill] sm:$0xff] }
 0x631   :  { %v2254_v35 = vmul.f32 %v6566_v37, %v5586_v53  ;;  %v2329_v28 = vrot.slane %v5414_v63, %v4358_v18  ;;  %v1991_v9 = vadd.f32 %v1959_v17, %v1695_v29  ;;  %3552 = vperm.xlu0 %3994, %v3457_v2   ;;  %v1696_v46 = vadd.f32 %v1664_v51, %v1400_v12  ;;  %v6568_v18 = vld [vmem:[#allocation115_spill] sm:$0xff]  ;;  %v6582_v17 = vld [vmem:[#allocation146_spill] sm:$0xff]  ;;  %v6585_v2 = vld [vmem:[#allocation137_spill] sm:$0xff] }
 0x632   :  { %v3460_v14 = vadd.f32 %v3428_v43, %v3164_v39  ;;  %v2869_v45 = vadd.f32 %v2837_v8, %v2573_v54  ;;  %v3133_v4 = vmul.f32 %v6567_v36, %v5889_v32  ;;  %v3170_v16 = vadd.f32 %v5494_v42, %v5507_v6  ;;  %v6586_v39 = vld [vmem:[#allocation145_spill] sm:$0xff]  ;;  %v6587_v43 = vld [vmem:[#allocation190_spill] sm:$0xff]  ;;  %v6588_v8 = vld [vmem:[#allocation119_spill] sm:$0xff] }
 0x633   :  { %v1989_v52 = vadd.f32 %v5549_v30, %v5573_v7  ;;  %v2286_v31 = vadd.f32 %v2254_v35, %v5909_v48  ;;  %v1697_v19 = vadd.f32 %v1665_v57, %v1401_v20  ;;  %v2253_v29 = vmul.f32 %v6568_v18, %v5429_v59  ;;  %v6572_v30 = vld [vmem:[#allocation91_spill] sm:$0xff]  ;;  %v6573_v48 = vld [vmem:[#allocation86_spill] sm:$0xff]  ;;  %v6574_v59 = vld [vmem:[#allocation217_spill] sm:$0xff]  ;;  %v3354_v57 = vpop.permute.xlu1 %3353 }
 0x634   :  { %v2255_v60 = vmul.f32 %v6569_v55, %v5586_v53  ;;  %v1960_v25 = vmul.f32 %v6570_v5, %v5553_v11  ;;  %3561 = vperm.xlu1 %3993, %v3460_v14   ;;  %v3165_v32 = vadd.f32 %v3133_v4, %v2869_v45  ;;  %v2550_v42 = vmul.f32 %v6571_v21, %v2329_v28  ;;  %v6589_v45 = vld [vmem:[#allocation178_spill] sm:$0xff]  ;;  %v6593_v5 = vld [vmem:[#allocation153_spill] sm:$0xff] }
 0x635   :  { %v2625_v6 = vrot.slane %v5414_v63, %v4317_v1  ;;  %v1961_v7 = vmul.f32 %v6572_v30, %v5553_v11  ;;  %3567 = vperm.xlu0 %3994, %v6573_v48   ;;  %v3429_v15 = vmul.f32 %v6574_v59, %v5899_v44  ;;  %v2875_v12 = vadd.f32 %v6576_v62, %v6575_v58  ;;  %v6578_v1 = vld [vmem:[#allocation32_spill] sm:$0xff]  ;;  %v6580_v11 = vld [vmem:[#allocation114_spill] sm:$0xff]  ;;  %v6583_v44 = vld [vmem:[#allocation125_spill] sm:$0xff] }
 0x636   :  { %v2580_v51 = vadd.f32 %v6577_v27, %v2284_v41  ;;  %v2287_v50 = vadd.f32 %v2255_v60, %v1991_v9  ;;  %v1992_v13 = vadd.f32 %v1960_v25, %v1696_v46  ;;  %v2285_v34 = vadd.f32 %v2253_v29, %v1989_v52  ;;  %v3358_v9 = vpop.permute.xlu0 %3357  ;;  %v6591_v29 = vld [vmem:[#allocation208_spill] sm:$0xff]  ;;  %v6594_v25 = vld [vmem:[#allocation225_spill] sm:$0xff]  ;;  %v6598_v62 = vld [vmem:[#allocation226_spill] sm:$0xff] }
 0x637   :  { %v2582_v47 = vadd.f32 %v2550_v42, %v2286_v31  ;;  %v1993_v61 = vadd.f32 %v1961_v7, %v1697_v19  ;;  %v3461_v33 = vadd.f32 %v3429_v15, %v3165_v32  ;;  %v3139_v24 = vmul.f32 %v6579_v0, %v6578_v1  ;;  %v6590_v19 = vld [vmem:[#allocation59_spill] sm:$0xff]  ;;  %v6595_v32 = vld [vmem:[#allocation165_spill] sm:$0xff]  ;;  %v6596_v42 = vld [vmem:[#allocation210_spill] sm:$0xff] }
 0x638   :  { %v2844_v10 = vmul.f32 %v6581_v38, %v6580_v11  ;;  %v2551_v23 = vmul.f32 %v6582_v17, %v2329_v28  ;;  %v2256_v20 = vmul.f32 %v6583_v44, %v5586_v53  ;;  %3570 = vperm.xlu1 %3993, %v6584_v49   ;;  %v2549_v22 = vmul.f32 %v6586_v39, %v6585_v2  ;;  %v6597_v7 = vld [vmem:[#allocation147_spill] sm:$0xff]  ;;  %v6604_v39 = vld [vmem:[#allocation212_spill] sm:$0xff] }
 0x639   :  { %v2846_v54 = vmul.f32 %v6587_v43, %v2625_v6  ;;  %v2921_v26 = vrot.slane %v5414_v63, %v4365_v40  ;;  %v2257_v41 = vmul.f32 %v6588_v8, %v5586_v53  ;;  %3564 = vperm.xlu0 %3994, %v3461_v33   ;;  %v3171_v37 = vadd.f32 %v3139_v24, %v2875_v12  ;;  %v6592_v40 = vld [vmem:[#allocation166_spill] sm:$0xff]  ;;  %v6599_v12 = vld [vmem:[#allocation61_spill] sm:$0xff]  ;;  %v6603_v38 = vld [vmem:[#allocation167_spill] sm:$0xff] }
 0x63a   :  { %v2876_v35 = vadd.f32 %v2844_v10, %v2580_v51  ;;  %v2583_v46 = vadd.f32 %v2551_v23, %v2287_v50  ;;  %v2288_v14 = vadd.f32 %v2256_v20, %v1992_v13  ;;  %v3466_v36 = vadd.f32 %v6589_v45, %v3170_v16  ;;  %v3365_v13 = vpop.permute.xlu1 %3364  ;;  %v3369_v0 = vpop.permute.xlu0 %3368  ;;  %v6605_v8 = vld [vmem:[#allocation200_spill] sm:$0xff] }
 0x63b   :  { %v2581_v4 = vadd.f32 %v2549_v22, %v2285_v34  ;;  %v2878_v52 = vadd.f32 %v2846_v54, %v2582_v47  ;;  %v2289_v31 = vadd.f32 %v2257_v41, %v1993_v61  ;;  %v3435_v18 = vmul.f32 %v3350_v56, %v6590_v19  ;;  %v6600_v61 = vld [vmem:[#allocation183_spill] sm:$0xff] }
 0x63c   :  { %v3140_v55 = vmul.f32 %v6591_v29, %v6578_v1  ;;  %v2847_v60 = vmul.f32 %v6592_v40, %v2625_v6  ;;  %v2552_v53 = vmul.f32 %v6593_v5, %v2329_v28  ;;  %3573 = vperm.xlu1 %3993, %v6594_v25   ;;  %v2845_v21 = vmul.f32 %v6595_v32, %v6580_v11 }
 0x63d   :  { %v3142_v30 = vmul.f32 %v6596_v42, %v2921_v26  ;;  %v3217_v16 = vrot.slane %v5414_v63, %v4322_v3  ;;  %v2553_v48 = vmul.f32 %v6597_v7, %v2329_v28  ;;  %3579 = vperm.xlu0 %3994, %v3466_v36   ;;  %v3467_v56 = vadd.f32 %v3435_v18, %v3171_v37  ;;  %v6601_v3 = vld [vmem:[#allocation191_spill] sm:$0xff]  ;;  %v6602_v28 = vld [vmem:[#allocation181_spill] sm:$0xff]  ;;  %v6606_v7 = vld [vmem:[#allocation136_spill] sm:$0xff] }
 0x63e   :  { %v3172_v59 = vadd.f32 %v3140_v55, %v2876_v35  ;;  %v2879_v15 = vadd.f32 %v2847_v60, %v2583_v46  ;;  %v2584_v58 = vadd.f32 %v2552_v53, %v2288_v14  ;;  %v3465_v27 = vadd.f32 %v6599_v12, %v6598_v62  ;;  %v3373_v54 = vpop.permute.xlu1 %3372  ;;  %v6607_v62 = vld [vmem:[#allocation11_spill] sm:$0xff] }
 0x63f   :  { %v2877_v51 = vadd.f32 %v2845_v21, %v2581_v4  ;;  %v3174_v50 = vadd.f32 %v3142_v30, %v2878_v52  ;;  %v2585_v34 = vadd.f32 %v2553_v48, %v2289_v31  ;;  %v3436_v47 = vmul.f32 %v3354_v57, %v6590_v19 }
 0x640   :  { %v3143_v33 = vmul.f32 %v6600_v61, %v2921_v26  ;;  %v2848_v63 = vmul.f32 %v6601_v3, %v2625_v6  ;;  %3582 = vperm.xlu1 %3993, %v3467_v56   ;;  %v3141_v24 = vmul.f32 %v6602_v28, %v6578_v1  ;;  %v3438_v11 = vmul.f32 %v3365_v13, %v3217_v16 }
 0x641   :  { %v2849_v10 = vmul.f32 %v6603_v38, %v2625_v6  ;;  %3576 = vperm.xlu0 %3994, %v3465_v27   ;;  %v3468_v17 = vadd.f32 %v3436_v47, %v3172_v59  ;;  %v3439_v57 = vmul.f32 %v3369_v0, %v3217_v16  ;;  %v3144_v22 = vmul.f32 %v6604_v39, %v2921_v26  ;;  %v3377_v6 = vpop.permute.xlu0 %3376  ;;  %v6608_v47 = vld [vmem:[#allocation138_spill] sm:$0xff] }
 0x642   :  { %v3175_v23 = vadd.f32 %v3143_v33, %v2879_v15  ;;  %v2880_v44 = vadd.f32 %v2848_v63, %v2584_v58  ;;  %v3173_v20 = vadd.f32 %v3141_v24, %v2877_v51  ;;  %v3470_v49 = vadd.f32 %v3438_v11, %v3174_v50 }
 0x643   :  { %v2881_v2 = vadd.f32 %v2849_v10, %v2585_v34  ;;  %v3437_v43 = vmul.f32 %v3358_v9, %v6590_v19  ;;  %v3145_v41 = vmul.f32 %v6605_v8, %v2921_v26  ;;  %v3440_v14 = vmul.f32 %v3373_v54, %v3217_v16 }
 0x644   :  { %3585 = vperm.xlu1 %3993, %v3468_v17   ;;  %v3471_v1 = vadd.f32 %v3439_v57, %v3175_v23  ;;  %v3176_v37 = vadd.f32 %v3144_v22, %v2880_v44  ;;  %v3441_v45 = vmul.f32 %v3377_v6, %v3217_v16  ;;  %v3606_v48 = vadd.s32 4294967288, %v6606_v7 }
 0x645   :  { %3591 = vperm.xlu0 %3994, %v3470_v49   ;;  %v3469_v35 = vadd.f32 %v3437_v43, %v3173_v20  ;;  %v3177_v46 = vadd.f32 %v3145_v41, %v2881_v2  ;;  %v3613_v59 = vadd.s32 4294967280, %v6606_v7  ;;  %v3620_v58 = vadd.s32 4294967272, %v6606_v7 }
 0x646   :  { %v3472_v36 = vadd.f32 %v3440_v14, %v3176_v37  ;;  %v6053_v12 = vsub.s32 %v3606_v48, %v6607_v62 }
 0x647   :  { %v3473_v4 = vadd.f32 %v3441_v45, %v3177_v46  ;;  %v6056_v51 = vsub.s32 %v3613_v59, %v6607_v62  ;;  %v6059_v13 = vsub.s32 %v3620_v58, %v6607_v62 }
 0x648   :  { %3594 = vperm.xlu1 %3993, %v3471_v1  }
 0x649   :  { %3588 = vperm.xlu0 %3994, %v3469_v35  }
 0x64c   :  { %3597 = vperm.xlu1 %3993, %v3472_v36  }
 0x64d   :  { %3600 = vperm.xlu0 %3994, %v3473_v4  }
 0x664   :  { %v3511_v31 = vpop.permute.xlu0 %3510 }
 0x665   :  { %v3610_v34 = vrot.slane %v3511_v31, %v6053_v12 }
 0x667   :  { %v3508_v52 = vpop.permute.xlu1 %3507 }
 0x668   :  { %v3605_v61 = vrot.slane %v3508_v52, %v6608_v47 }
 0x66a   :  { %v3612_v11 = vsel %vm3611_vm12, %v3610_v34, %v3605_v61 }
 0x66c   :  { %v3517_v19 = vpop.permute.xlu0 %3516 }
 0x66d   :  { %v3624_v38 = vrot.slane %v3517_v19, %v6059_v13 }
 0x66f   :  { %v3514_v9 = vpop.permute.xlu1 %3513 }
 0x670   :  { %v3617_v63 = vrot.slane %v3514_v9, %v6056_v51 }
 0x672   :  { %v3619_v44 = vsel %vm3618_vm13, %v3617_v63, %v3612_v11 }
 0x673   :  { %v3626_v54 = vsel %vm3625_vm14, %v3624_v38, %v3619_v44 }
 0x675   :  { %v3523_v26 = vpop.permute.xlu0 %3522 }
 0x676   :  { %v3634_v33 = vrot.slane %v3523_v26, %v6053_v12 }
 0x678   :  { %v3520_v18 = vpop.permute.xlu1 %3519 }
 0x679   :  { %v3630_v0 = vrot.slane %v3520_v18, %v6608_v47 }
 0x67b   :  { %v3635_v10 = vsel %vm3611_vm12, %v3634_v33, %v3630_v0 }
 0x67d   :  { %v3529_v55 = vpop.permute.xlu0 %3528 }
 0x67e   :  { %v3644_v17 = vrot.slane %v3529_v55, %v6059_v13 }
 0x680   :  { %v3526_v29 = vpop.permute.xlu1 %3525 }
 0x681   :  { %v3639_v28 = vrot.slane %v3526_v29, %v6056_v51 }
 0x683   :  { %v3640_v20 = vsel %vm3618_vm13, %v3639_v28, %v3635_v10 }
 0x684   :  { %v3645_v8 = vsel %vm3625_vm14, %v3644_v17, %v3640_v20 }
 0x685   :  { %v3760_v48 = vsel %vm929_vm4, %v3645_v8, %v3626_v54 }
 0x686   :  { %v3535_v60 = vpop.permute.xlu0 %3534 }
 0x687   :  { %v3653_v49 = vrot.slane %v3535_v60, %v6053_v12 }
 0x689   :  { %v3532_v40 = vpop.permute.xlu1 %3531 }
 0x68a   :  { %v3649_v2 = vrot.slane %v3532_v40, %v6608_v47 }
 0x68c   :  { %v3654_v37 = vsel %vm3611_vm12, %v3653_v49, %v3649_v2 }
 0x68e   :  { %v6045_v53 = vpop.permute.xlu0 %3540 }
 0x68f   :  { %v3663_v6 = vrot.slane %v6045_v53, %v6059_v13 }
 0x691   :  { %v3538_v5 = vpop.permute.xlu1 %3537 }
 0x692   :  { %v3658_v39 = vrot.slane %v3538_v5, %v6056_v51 }
 0x694   :  { %v3659_v45 = vsel %vm3618_vm13, %v3658_v39, %v3654_v37 }
 0x695   :  { %v3664_v5 = vsel %vm3625_vm14, %v3663_v6, %v3659_v45 }
 0x696   :  { %v3761_v58 = vsel %vm931_vm5, %v3664_v5, %v3760_v48 }
 0x697   :  { %v3547_v32 = vpop.permute.xlu0 %3546 }
 0x698   :  { %v3672_v22 = vrot.slane %v3547_v32, %v6053_v12 }
 0x69a   :  { %v3544_v25 = vpop.permute.xlu1 %3543 }
 0x69b   :  { %v3668_v43 = vrot.slane %v3544_v25, %v6608_v47 }
 0x69d   :  { %v3673_v36 = vsel %vm3611_vm12, %v3672_v22, %v3668_v43 }
 0x69f   :  { %v3550_v21 = vpop.permute.xlu1 %3549 }
 0x6a0   :  { %v3677_v41 = vrot.slane %v3550_v21, %v6056_v51 }
 0x6a2   :  { %v3678_v26 = vsel %vm3618_vm13, %v3677_v41, %v3673_v36 }
 0x6a4   :  { %v6047_v42 = vpop.permute.xlu0 %3555 }
 0x6a5   :  { %v3687_v31 = vrot.slane %v6047_v42, %v6608_v47 }
 0x6a8   :  { %v3559_v30 = vpop.permute.xlu1 %3558 }
 0x6a9   :  { %v3691_v46 = vrot.slane %v3559_v30, %v6053_v12 }
 0x6ab   :  { %v3692_v25 = vsel %vm3611_vm12, %v3691_v46, %v3687_v31 }
 0x6ac   :  { %v3553_v16 = vpop.permute.xlu0 %3552 }
 0x6ad   :  { %v3682_v35 = vrot.slane %v3553_v16, %v6059_v13 }
 0x6af   :  { %v3562_v56 = vpop.permute.xlu1 %3561  ;;  %v3683_v53 = vsel %vm3625_vm14, %v3682_v35, %v3678_v26 }
 0x6b0   :  { %v3568_v15 = vpop.permute.xlu0 %3567  ;;  %v3696_v4 = vrot.slane %v3562_v56, %v6056_v51  ;;  %v3762_v61 = vsel %vm933_vm6, %v3683_v53, %v3761_v58 }
 0x6b1   :  { %v3706_v29 = vrot.slane %v3568_v15, %v6608_v47 }
 0x6b2   :  { %v3697_v42 = vsel %vm3618_vm13, %v3696_v4, %v3692_v25 }
 0x6b3   :  { %v3571_v27 = vpop.permute.xlu1 %3570 }
 0x6b4   :  { %v3565_v50 = vpop.permute.xlu0 %3564  ;;  %v3710_v52 = vrot.slane %v3571_v27, %v6053_v12 }
 0x6b5   :  { %v3701_v9 = vrot.slane %v3565_v50, %v6059_v13 }
 0x6b6   :  { %v3711_v30 = vsel %vm3611_vm12, %v3710_v52, %v3706_v29 }
 0x6b7   :  { %v3574_v3 = vpop.permute.xlu1 %3573  ;;  %v3702_v56 = vsel %vm3625_vm14, %v3701_v9, %v3697_v42 }
 0x6b8   :  { %v3580_v24 = vpop.permute.xlu0 %3579  ;;  %v3715_v19 = vrot.slane %v3574_v3, %v6056_v51  ;;  %v3763_v3 = vsel %vm935_vm7, %v3702_v56, %v3762_v61 }
 0x6b9   :  { %v3725_v32 = vrot.slane %v3580_v24, %v6608_v47 }
 0x6ba   :  { %v3716_v59 = vsel %vm3618_vm13, %v3715_v19, %v3711_v30 }
 0x6bb   :  { %v3583_v23 = vpop.permute.xlu1 %3582 }
 0x6bc   :  { %v3577_v57 = vpop.permute.xlu0 %3576  ;;  %v3729_v18 = vrot.slane %v3583_v23, %v6053_v12 }
 0x6bd   :  { %v3720_v55 = vrot.slane %v3577_v57, %v6059_v13 }
 0x6be   :  { %v3730_v15 = vsel %vm3611_vm12, %v3729_v18, %v3725_v32 }
 0x6bf   :  { %v3586_v1 = vpop.permute.xlu1 %3585  ;;  %v3721_v62 = vsel %vm3625_vm14, %v3720_v55, %v3716_v59 }
 0x6c0   :  { %v3592_v14 = vpop.permute.xlu0 %3591  ;;  %v3734_v40 = vrot.slane %v3586_v1, %v6056_v51 }
 0x6c1   :  { %v3744_v27 = vrot.slane %v3592_v14, %v6608_v47  ;;  %v3764_v47 = vsel %vm937_vm8, %v3721_v62, %v3763_v3 }
 0x6c2   :  { %v3735_v50 = vsel %vm3618_vm13, %v3734_v40, %v3730_v15 }
 0x6c3   :  { %v3595_v60 = vpop.permute.xlu1 %3594 }
 0x6c4   :  { %v3589_v21 = vpop.permute.xlu0 %3588  ;;  %v3748_v7 = vrot.slane %v3595_v60, %v6053_v12 }
 0x6c5   :  { %v3739_v16 = vrot.slane %v3589_v21, %v6059_v13 }
 0x6c6   :  { %v3749_v63 = vsel %vm3611_vm12, %v3748_v7, %v3744_v27 }
 0x6c7   :  { %v3598_v34 = vpop.permute.xlu1 %3597  ;;  %v3740_v12 = vsel %vm3625_vm14, %v3739_v16, %v3735_v50 }
 0x6c8   :  { %v3601_v33 = vpop.permute.xlu0 %3600  ;;  %v3753_v0 = vrot.slane %v3598_v34, %v6056_v51  ;;  %v3765_v38 = vsel %vm939_vm9, %v3740_v12, %v3764_v47 }
 0x6c9   :  { %v3758_v28 = vrot.slane %v3601_v33, %v6059_v13 }
 0x6ca   :  { %v3754_v24 = vsel %vm3618_vm13, %v3753_v0, %v3749_v63 }
 0x6cb   :  { %v3759_v11 = vsel %vm3625_vm14, %v3758_v28, %v3754_v24 }
 0x6cc   :  { %v3766_v10 = vsel %vm941_vm10, %v3759_v11, %v3765_v38 }
 0x6cd   :  { %3768 = vst.msk [vmem:[#allocation7] sm:$0xff] %vm201_vm1, %v3766_v10 }
 0x6ce   :  { %4141 = shalt.err (!%p4138_p0)
}
 0x6cf   :  { %3778 = dma.vmem_to_hbm [thread:$0]  %s3776_s26, 128, %s6139_s9, [#allocation4]  }
 0x6d0   :  { %4154 = dma.done.wait [#allocation4], 128  }
 0x6d1   :  { %4155 = vsyncadd [#allocation4], 4294967168 }
 0x6d2   :  { %3782 = vsyncpa [#allocation3], 1 }
 0x6d3   :  { %3783 = vsyncpa [#allocation6], 1 }
 0x6d4   :  { %3784 = vsyncpa [#allocation4], 1 }

</bundles_post_ra>
